<compile_context>
chip_gen: v7x
topology: tpu7x:2x2x1
jax: 0.10.0
libtpu: 0.0.40
codegen_flags: <defaults>
</compile_context>

<pallas_src>
import functools

import numpy as np
import jax
import jax.numpy as jnp
from jax import lax
from jax.experimental import pallas as pl
from jax.experimental.pallas import tpu as pltpu

IN_VIS = 63 * 50 * 2   # 6300
IN_GRU = 1000          # fc_vis output / GRU input size
LANE = 128
_MIB = 1 << 20


def _round_up(x, m):
    return ((x + m - 1) // m) * m


# ----------------------------------------------------------------------------
# Kernel 1: folded input projection  gi = x @ W1 + b1  (weight resident)
# ----------------------------------------------------------------------------
def _fc_fold_kernel(x_ref, w_ref, b_ref, o_ref):
    # In-kernel bf16 cast of the activations (saves two full HBM passes).
    x = x_ref[...].astype(jnp.bfloat16)
    o_ref[...] = (jnp.dot(x, w_ref[...], preferred_element_type=jnp.float32)
                  + b_ref[...])


def fc_fold_pallas(x, w, b, *, tm):
    """x: [Mp, K] f32, w: [K, Np] bf16, b: [1, Np] f32 -> [Mp, Np] f32."""
    Mp, K = x.shape
    K2, Np = w.shape
    assert K == K2 and Mp % tm == 0 and Np % LANE == 0

    # VMEM budget from actual buffer math (+ headroom), per the review.
    vmem = (2 * tm * K * 4        # x tile, double-buffered, f32
            + 1 * K * Np * 2      # weight, single-buffered (Buffered(1)), bf16
            + 2 * 1 * Np * 4      # bias
            + 2 * tm * Np * 4)    # output tile, double-buffered, f32
    vmem = max(32 * _MIB, vmem + 4 * _MIB)

    return pl.pallas_call(
        _fc_fold_kernel,
        out_shape=jax.ShapeDtypeStruct((Mp, Np), jnp.float32),
        grid_spec=pltpu.PrefetchScalarGridSpec(
            num_scalar_prefetch=0,
            grid=(Mp // tm,),                       # M tiles only (weight resident)
            in_specs=[
                pl.BlockSpec((tm, K), lambda m: (m, 0)),
                # Block index never changes -> fetched once; single buffer.
                pl.BlockSpec((K, Np), lambda m: (0, 0),
                             pipeline_mode=pl.Buffered(1)),
                pl.BlockSpec((1, Np), lambda m: (0, 0)),
            ],
            out_specs=pl.BlockSpec((tm, Np), lambda m: (m, 0)),
        ),
        compiler_params=pltpu.CompilerParams(
            dimension_semantics=("parallel",),
            vmem_limit_bytes=vmem,
        ),
    )(x, w, b)


# ----------------------------------------------------------------------------
# Kernel 2: GRU recurrence (T-chunked, B-tiled) + final fc on the last h.
#   gi: [Tp, Bp, 3*Hp] f32 (gate g at lanes [g*Hp, g*Hp+H), biases folded)
#   whh: [Hp, 3*Hp] bf16, wfc: [Hp, Op] bf16.  h carried in VMEM scratch
#   across T chunks; all gate slices are 128-lane aligned.
# ----------------------------------------------------------------------------
def _gru_fc_kernel(gi_ref, whh_ref, bhn_ref, wfc_ref, bfc_ref, y_ref, h_ref,
                   *, Hp, Tc, T, mask_tail):
    t_chunk = pl.program_id(1)

    @pl.when(t_chunk == 0)
    def _():
        h_ref[...] = jnp.zeros_like(h_ref)

    whh = whh_ref[...]              # [Hp, 3*Hp] bf16
    bhn = bhn_ref[...]              # [1, Hp]   f32
    t_base = t_chunk * Tc

    def step(ti, h):
        # bf16 MXU matmul on the serial chain; f32 accumulation + gate math.
        gh = jnp.dot(h.astype(jnp.bfloat16), whh,
                     preferred_element_type=jnp.float32)        # [tb, 3*Hp]
        gi = gi_ref[ti]                                         # [tb, 3*Hp]
        r = jax.nn.sigmoid(gi[:, :Hp] + gh[:, :Hp])
        z = jax.nn.sigmoid(gi[:, Hp:2 * Hp] + gh[:, Hp:2 * Hp])
        n = jnp.tanh(gi[:, 2 * Hp:] + r * (gh[:, 2 * Hp:] + bhn))
        h_new = (1.0 - z) * n + z * h
        if mask_tail:
            h_new = jnp.where(t_base + ti < T, h_new, h)        # padded steps
        return h_new

    unroll = True if Tc <= 16 else 4
    h = lax.fori_loop(0, Tc, step, h_ref[...], unroll=unroll)
    h_ref[...] = h

    @pl.when(t_chunk == pl.num_programs(1) - 1)
    def _():
        y_ref[...] = (jnp.dot(h.astype(jnp.bfloat16), wfc_ref[...],
                              preferred_element_type=jnp.float32)
                      + bfc_ref[...])


def gru_fc_pallas(gi, whh, bhn, wfc, bfc, *, tb, Tc, T):
    Tp, Bp, N3p = gi.shape
    Hp = whh.shape[0]
    Op = wfc.shape[1]
    assert Tp % Tc == 0 and Bp % tb == 0 and N3p == 3 * Hp

    vmem = (2 * Tc * tb * N3p * 4       # gi chunk, double-buffered
            + 2 * Hp * N3p * 2          # whh
            + 2 * Hp * Op * 2           # wfc
            + 2 * (Hp + Op) * 4         # biases
            + 2 * tb * Op * 4           # output tile
            + tb * Hp * 4)              # h scratch
    vmem = max(32 * _MIB, vmem + 4 * _MIB)

    kernel = functools.partial(_gru_fc_kernel, Hp=Hp, Tc=Tc, T=T,
                               mask_tail=(Tp != T))
    return pl.pallas_call(
        kernel,
        out_shape=jax.ShapeDtypeStruct((Bp, Op), jnp.float32),
        grid_spec=pltpu.PrefetchScalarGridSpec(
            num_scalar_prefetch=0,
            grid=(Bp // tb, Tp // Tc),          # (B tiles, T chunks)
            in_specs=[
                pl.BlockSpec((Tc, tb, N3p), lambda b, t: (t, b, 0)),
                pl.BlockSpec((Hp, N3p), lambda b, t: (0, 0)),
                pl.BlockSpec((1, Hp), lambda b, t: (0, 0)),
                pl.BlockSpec((Hp, Op), lambda b, t: (0, 0)),
                pl.BlockSpec((1, Op), lambda b, t: (0, 0)),
            ],
            out_specs=pl.BlockSpec((tb, Op), lambda b, t: (b, 0)),
            scratch_shapes=[pltpu.VMEM((tb, Hp), jnp.float32)],   # carried h
        ),
        compiler_params=pltpu.CompilerParams(
            dimension_semantics=("parallel", "arbitrary"),
            vmem_limit_bytes=vmem,
        ),
    )(gi, whh, bhn, wfc, bfc)


# ----------------------------------------------------------------------------
# Parameter init (deterministic, PyTorch-style uniform bounds) — raw layout.
# ----------------------------------------------------------------------------
def init_params(key, hidden_size, output_size):
    ks = jax.random.split(key, 8)
    u = lambda k, shape, bound: jax.random.uniform(
        k, shape, jnp.float32, -bound, bound)
    b_vis = 1.0 / np.sqrt(IN_VIS)
    b_h = 1.0 / np.sqrt(hidden_size)
    return dict(
        W_vis=u(ks[0], (IN_GRU, IN_VIS), b_vis),
        b_vis=u(ks[1], (IN_GRU,), b_vis),
        W_ih=u(ks[2], (3 * hidden_size, IN_GRU), b_h),
        W_hh=u(ks[3], (3 * hidden_size, hidden_size), b_h),
        b_ih=u(ks[4], (3 * hidden_size,), b_h),
        b_hh=u(ks[5], (3 * hidden_size,), b_h),
        W_fc=u(ks[6], (output_size, hidden_size), b_h),
        b_fc=u(ks[7], (output_size,), b_h),
    )


# ----------------------------------------------------------------------------
# One-time weight preparation (hoisted out of the per-call forward path).
# Gate g of every 3*Hp-wide tensor occupies lanes [g*Hp, g*Hp + H); padded
# lanes/rows are zero (see padded-lane invariant in the header comment).
# ----------------------------------------------------------------------------
def prepare_params(params, hidden_size, output_size):
    H, O = hidden_size, output_size
    Hp = _round_up(H, LANE)
    Op = _round_up(O, LANE)
    N3p = 3 * Hp

    W_vis, b_vis = params["W_vis"], params["b_vis"]
    W_ih, W_hh = params["W_ih"], params["W_hh"]
    b_ih, b_hh = params["b_ih"], params["b_hh"]
    W_fc, b_fc = params["W_fc"], params["b_fc"]

    # Fold fc_vis into the GRU input projection (affine composition, f32):
    #   W_ih @ (W_vis x + b_vis) + b_ih = (W_ih W_vis) x + (W_ih b_vis + b_ih)
    W_fold = jnp.dot(W_ih, W_vis)                       # [3H, IN_VIS]
    b_fold = jnp.dot(W_ih, b_vis) + b_ih                # [3H]
    # b_hr / b_hz are purely additive -> fold them; b_hn stays separate
    # (it sits inside the r * (...) term of the n gate).
    b_fold = b_fold + jnp.concatenate(
        [b_hh[:2 * H], jnp.zeros((H,), jnp.float32)])

    # Gate-aligned packing baked in at prepare time (no post-kernel reorg).
    W1 = jnp.zeros((IN_VIS, N3p), jnp.float32)
    b1 = jnp.zeros((1, N3p), jnp.float32)
    W_hh_all = jnp.zeros((Hp, N3p), jnp.float32)
    for g in range(3):
        W1 = W1.at[:, g * Hp:g * Hp + H].set(W_fold[g * H:(g + 1) * H, :].T)
        b1 = b1.at[0, g * Hp:g * Hp + H].set(b_fold[g * H:(g + 1) * H])
        W_hh_all = W_hh_all.at[:H, g * Hp:g * Hp + H].set(
            W_hh[g * H:(g + 1) * H, :].T)
    W1 = W1.astype(jnp.bfloat16)
    W_hh_all = W_hh_all.astype(jnp.bfloat16)            # bf16 recurrent weight

    b_hn = jnp.zeros((1, Hp), jnp.float32).at[0, :H].set(b_hh[2 * H:])
    W_fc_p = (jnp.zeros((Hp, Op), jnp.float32).at[:H, :O].set(W_fc.T)
              .astype(jnp.bfloat16))
    b_fc_p = jnp.zeros((1, Op), jnp.float32).at[0, :O].set(b_fc)

    return dict(W1=W1, b1=b1, W_hh_all=W_hh_all, b_hn=b_hn,
                W_fc_p=W_fc_p, b_fc_p=b_fc_p)


# ----------------------------------------------------------------------------
# Full forward (glue in plain JAX, hot path in Pallas)
# ----------------------------------------------------------------------------
@functools.partial(jax.jit, static_argnums=(2, 3))
def vis_mlp_gru_forward(in_vis, prep, hidden_size, output_size):
    O = output_size
    Hp = prep["W_hh_all"].shape[0]
    N3p = prep["W1"].shape[1]
    B = in_vis.shape[0]
    T = in_vis.shape[-1]
    M = B * T

    # Row-major reshape == torch's in_vis.reshape([B, T, 50*63*2]) flattened
    # over (B, T); activations stay f32 (cast to bf16 inside the kernel).
    x = in_vis.reshape(M, IN_VIS).astype(jnp.float32)

    # tm: single tile for tiny M, else 128 (>=2 parallel tiles, minimal pad).
    tm = _round_up(M, 8) if M <= 128 else 128
    Mp = _round_up(M, tm)
    if Mp != M:
        x = jnp.pad(x, ((0, Mp - M), (0, 0)))

    # Kernel 1: gi = x @ W1 + b1   -> [Mp, 3*Hp] f32, gate-aligned lanes.
    gi_flat = fc_fold_pallas(x, prep["W1"], prep["b1"], tm=tm)

    # Pure reshape + transpose (gate padding already baked into W1/b1).
    gi = gi_flat[:M].reshape(B, T, N3p)
    gi = jnp.transpose(gi, (1, 0, 2))                    # [T, B, 3*Hp]

    # B tiling (cap 32 for vreg pressure; pad only if needed).
    if B <= 32:
        tb, Bp = B, B
    else:
        tb = 32
        Bp = _round_up(B, tb)
        gi = jnp.pad(gi, ((0, 0), (0, Bp - B), (0, 0)))

    # T chunking: bound the streamed gi block to ~2 MiB per buffer.
    Tc = max(1, min(T, (2 * _MIB) // max(1, tb * N3p * 4)))
    Tp = _round_up(T, Tc)
    if Tp != T:
        gi = jnp.pad(gi, ((0, Tp - T), (0, 0), (0, 0)))

    # Kernel 2: GRU recurrence over T + final Linear on the last hidden state.
    y_full = gru_fc_pallas(gi, prep["W_hh_all"], prep["b_hn"],
                           prep["W_fc_p"], prep["b_fc_p"],
                           tb=tb, Tc=Tc, T=T)
    return y_full[:B, :O]


# ----------------------------------------------------------------------------
# Pure-JAX f32 reference (unfused) for the correctness check.
# ----------------------------------------------------------------------------
def reference_forward(in_vis, params, hidden_size):
    B = in_vis.shape[0]
    T = in_vis.shape[-1]
    H = hidden_size
    vis = in_vis.reshape(B, T, IN_VIS).astype(jnp.float32)   # == torch reshape
    emb = vis @ params["W_vis"].T + params["b_vis"]          # [B, T, IN_GRU]
    emb = jnp.transpose(emb, (1, 0, 2))                      # [T, B, IN_GRU]
    W_ih, W_hh = params["W_ih"], params["W_hh"]
    b_ih, b_hh = params["b_ih"], params["b_hh"]
    h = jnp.zeros((B, H), jnp.float32)
    for t in range(T):
        xt = emb[t]
        gi = xt @ W_ih.T + b_ih
        gh = h @ W_hh.T + b_hh
        r = jax.nn.sigmoid(gi[:, :H] + gh[:, :H])
        z = jax.nn.sigmoid(gi[:, H:2 * H] + gh[:, H:2 * H])
        n = jnp.tanh(gi[:, 2 * H:] + r * gh[:, 2 * H:])
        h = (1.0 - z) * n + z * h
    return h @ params["W_fc"].T + params["b_fc"]


if __name__ == "__main__":
    key = jax.random.PRNGKey(0)
    k_params, k_x = jax.random.split(key)

    B, T = 2, 4
    hidden_size, output_size = 32, 8

    params = init_params(k_params, hidden_size, output_size)
    prep = prepare_params(params, hidden_size, output_size)

    # layout: [B, C=2, H=63, W=50, T]
    in_vis = jax.random.normal(k_x, (B, 2, 63, 50, T), dtype=jnp.float32)

    y = vis_mlp_gru_forward(in_vis, prep, hidden_size, output_size)
    y = jax.block_until_ready(y)

    y_ref = reference_forward(in_vis, params, hidden_size)
    # bf16 folded/recurrent weights vs f32 reference -> 3e-2 tolerance.
    np.testing.assert_allclose(np.asarray(y), np.asarray(y_ref),
                               rtol=3e-2, atol=3e-2)
    print("KERNEL_OK")
</pallas_src>

<mosaic_0001>
module attributes {stable_mosaic.version = 11 : i64} {
  func.func @_fc_fold_kernel(%arg0: i32, %arg1: memref<8x6300xf32, #tpu.memory_space<vmem>>, %arg2: memref<6300x384xbf16, #tpu.memory_space<vmem>>, %arg3: memref<1x384xf32, #tpu.memory_space<vmem>>, %arg4: memref<8x384xf32, #tpu.memory_space<vmem>>) attributes {dimension_semantics = [#tpu.dimension_semantics<parallel>], iteration_bounds = array<i64: 1>, scalar_prefetch = 0 : i64, scratch_operands = 0 : i64, tpu.core_type = #tpu.core_type<tc>, window_params = [{transform_indices = @transform_0, window_bounds = array<i64: 8, 6300>}, {pipeline_mode = #tpu.pipeline_mode<synchronous>, transform_indices = @transform_1, window_bounds = array<i64: 6300, 384>}, {pipeline_mode = #tpu.pipeline_mode<synchronous>, transform_indices = @transform_2, window_bounds = array<i64: 1, 384>}, {transform_indices = @transform_3, window_bounds = array<i64: 8, 384>}]} {
    %c0 = arith.constant 0 : index
    %c0_0 = arith.constant 0 : index
    %0 = vector.load %arg1[%c0, %c0_0] : memref<8x6300xf32, #tpu.memory_space<vmem>>, vector<8x6300xf32>
    %1 = arith.truncf %0 : vector<8x6300xf32> to vector<8x6300xbf16>
    %c0_1 = arith.constant 0 : index
    %c0_2 = arith.constant 0 : index
    %2 = vector.load %arg2[%c0_1, %c0_2] : memref<6300x384xbf16, #tpu.memory_space<vmem>>, vector<6300x384xbf16>
    %cst = arith.constant dense<0.000000e+00> : vector<8x384xf32>
    %3 = tpu.matmul %1, %2, %cst {dimension_numbers = #tpu.dot_dimension_numbers<[1], [0], [0], [1], [0, 0, 1, 1], [], []>} : vector<8x6300xbf16>, vector<6300x384xbf16>, vector<8x384xf32> -> vector<8x384xf32>
    %c0_3 = arith.constant 0 : index
    %c0_4 = arith.constant 0 : index
    %4 = vector.load %arg3[%c0_3, %c0_4] : memref<1x384xf32, #tpu.memory_space<vmem>>, vector<1x384xf32>
    %5 = vector.broadcast %4 : vector<1x384xf32> to vector<8x384xf32>
    %6 = arith.addf %3, %5 : vector<8x384xf32>
    %c0_5 = arith.constant 0 : index
    %c0_6 = arith.constant 0 : index
    %7 = vector.load %arg4[%c0_5, %c0_6] : memref<8x384xf32, #tpu.memory_space<vmem>>, vector<8x384xf32>
    tpu.vector_store %arg4[%c0_5, %c0_6], %6 {strides = array<i32>} : memref<8x384xf32, #tpu.memory_space<vmem>>, vector<8x384xf32>,
    return
  }
  func.func @transform_0(%arg0: i32) -> (i32, i32) {
    %c0_i32 = arith.constant 0 : i32
    %c0_i32_0 = arith.constant 0 : i32
    return %arg0, %c0_i32 : i32, i32
  }
  func.func @transform_1(%arg0: i32) -> (i32, i32) {
    %c0_i32 = arith.constant 0 : i32
    %c0_i32_0 = arith.constant 0 : i32
    %c0_i32_1 = arith.constant 0 : i32
    return %c0_i32, %c0_i32_0 : i32, i32
  }
  func.func @transform_2(%arg0: i32) -> (i32, i32) {
    %c0_i32 = arith.constant 0 : i32
    %c0_i32_0 = arith.constant 0 : i32
    %c0_i32_1 = arith.constant 0 : i32
    return %c0_i32, %c0_i32_0 : i32, i32
  }
  func.func @transform_3(%arg0: i32) -> (i32, i32) {
    %c0_i32 = arith.constant 0 : i32
    %c0_i32_0 = arith.constant 0 : i32
    return %arg0, %c0_i32 : i32, i32
  }
}

module attributes {stable_mosaic.version = 11 : i64} {
  func.func @_gru_fc_kernel(%arg0: i32, %arg1: i32, %arg2: memref<4x2x384xf32, #tpu.memory_space<vmem>>, %arg3: memref<128x384xbf16, #tpu.memory_space<vmem>>, %arg4: memref<1x128xf32, #tpu.memory_space<vmem>>, %arg5: memref<128x128xbf16, #tpu.memory_space<vmem>>, %arg6: memref<1x128xf32, #tpu.memory_space<vmem>>, %arg7: memref<2x128xf32, #tpu.memory_space<vmem>>, %arg8: memref<2x128xf32, #tpu.memory_space<vmem>>) attributes {dimension_semantics = [#tpu.dimension_semantics<parallel>, #tpu.dimension_semantics<arbitrary>], iteration_bounds = array<i64: 1, 1>, scalar_prefetch = 0 : i64, scratch_operands = 1 : i64, tpu.core_type = #tpu.core_type<tc>, window_params = [{transform_indices = @transform_0, window_bounds = array<i64: 4, 2, 384>}, {pipeline_mode = #tpu.pipeline_mode<synchronous>, transform_indices = @transform_1, window_bounds = array<i64: 128, 384>}, {pipeline_mode = #tpu.pipeline_mode<synchronous>, transform_indices = @transform_2, window_bounds = array<i64: 1, 128>}, {pipeline_mode = #tpu.pipeline_mode<synchronous>, transform_indices = @transform_3, window_bounds = array<i64: 128, 128>}, {pipeline_mode = #tpu.pipeline_mode<synchronous>, transform_indices = @transform_4, window_bounds = array<i64: 1, 128>}, {transform_indices = @transform_5, window_bounds = array<i64: 2, 128>}]} {
    %c0_i32 = arith.constant 0 : i32
    %0 = arith.cmpi eq, %arg1, %c0_i32 : i32
    %1 = arith.extui %0 : i1 to i32
    %c0_i32_0 = arith.constant 0 : i32
    %2 = arith.cmpi ne, %1, %c0_i32_0 : i32
    scf.if %2 {
      %cst_34 = arith.constant 0.000000e+00 : f32
      %142 = vector.broadcast %cst_34 : f32 to vector<2x128xf32>
      %c0_35 = arith.constant 0 : index
      %c0_36 = arith.constant 0 : index
      %143 = vector.load %arg8[%c0_35, %c0_36] : memref<2x128xf32, #tpu.memory_space<vmem>>, vector<2x128xf32>
      tpu.vector_store %arg8[%c0_35, %c0_36], %142 {strides = array<i32>} : memref<2x128xf32, #tpu.memory_space<vmem>>, vector<2x128xf32>,
    } else {
    }
    %c0 = arith.constant 0 : index
    %c0_1 = arith.constant 0 : index
    %3 = vector.load %arg3[%c0, %c0_1] : memref<128x384xbf16, #tpu.memory_space<vmem>>, vector<128x384xbf16>
    %c0_2 = arith.constant 0 : index
    %c0_3 = arith.constant 0 : index
    %4 = vector.load %arg4[%c0_2, %c0_3] : memref<1x128xf32, #tpu.memory_space<vmem>>, vector<1x128xf32>
    %c0_4 = arith.constant 0 : index
    %c0_5 = arith.constant 0 : index
    %5 = vector.load %arg8[%c0_4, %c0_5] : memref<2x128xf32, #tpu.memory_space<vmem>>, vector<2x128xf32>
    %c0_i32_6 = arith.constant 0 : i32
    %6 = arith.truncf %5 : vector<2x128xf32> to vector<2x128xbf16>
    %cst = arith.constant dense<0.000000e+00> : vector<2x384xf32>
    %7 = tpu.matmul %6, %3, %cst {dimension_numbers = #tpu.dot_dimension_numbers<[1], [0], [0], [1], [0, 0, 1, 1], [], []>} : vector<2x128xbf16>, vector<128x384xbf16>, vector<2x384xf32> -> vector<2x384xf32>
    %8 = arith.index_cast %c0_i32_6 : i32 to index
    %c0_7 = arith.constant 0 : index
    %c0_8 = arith.constant 0 : index
    %9 = vector.load %arg2[%8, %c0_7, %c0_8] : memref<4x2x384xf32, #tpu.memory_space<vmem>>, vector<1x2x384xf32>
    %10 = vector.shape_cast %9 : vector<1x2x384xf32> to vector<2x384xf32>
    %11 = vector.extract_strided_slice %10 {offsets = [0, 0], sizes = [2, 128], strides = [1, 1]} : vector<2x384xf32> to vector<2x128xf32>
    %12 = vector.extract_strided_slice %7 {offsets = [0, 0], sizes = [2, 128], strides = [1, 1]} : vector<2x384xf32> to vector<2x128xf32>
    %13 = arith.addf %11, %12 : vector<2x128xf32>
    %14 = arith.negf %13 : vector<2x128xf32>
    %15 = math.exp %14 : vector<2x128xf32>
    %cst_9 = arith.constant 1.000000e+00 : f32
    %16 = vector.broadcast %cst_9 : f32 to vector<2x128xf32>
    %17 = arith.addf %16, %15 : vector<2x128xf32>
    %18 = arith.divf %16, %17 : vector<2x128xf32>
    %19 = vector.extract_strided_slice %10 {offsets = [0, 128], sizes = [2, 128], strides = [1, 1]} : vector<2x384xf32> to vector<2x128xf32>
    %20 = vector.extract_strided_slice %7 {offsets = [0, 128], sizes = [2, 128], strides = [1, 1]} : vector<2x384xf32> to vector<2x128xf32>
    %21 = arith.addf %19, %20 : vector<2x128xf32>
    %22 = arith.negf %21 : vector<2x128xf32>
    %23 = math.exp %22 : vector<2x128xf32>
    %cst_10 = arith.constant 1.000000e+00 : f32
    %24 = vector.broadcast %cst_10 : f32 to vector<2x128xf32>
    %25 = arith.addf %24, %23 : vector<2x128xf32>
    %26 = arith.divf %24, %25 : vector<2x128xf32>
    %27 = vector.extract_strided_slice %10 {offsets = [0, 256], sizes = [2, 128], strides = [1, 1]} : vector<2x384xf32> to vector<2x128xf32>
    %28 = vector.extract_strided_slice %7 {offsets = [0, 256], sizes = [2, 128], strides = [1, 1]} : vector<2x384xf32> to vector<2x128xf32>
    %29 = vector.broadcast %4 : vector<1x128xf32> to vector<2x128xf32>
    %30 = arith.addf %28, %29 : vector<2x128xf32>
    %31 = arith.mulf %18, %30 : vector<2x128xf32>
    %32 = arith.addf %27, %31 : vector<2x128xf32>
    %33 = math.tanh %32 : vector<2x128xf32>
    %cst_11 = arith.constant 1.000000e+00 : f32
    %34 = vector.broadcast %cst_11 : f32 to vector<2x128xf32>
    %35 = arith.subf %34, %26 : vector<2x128xf32>
    %36 = arith.mulf %35, %33 : vector<2x128xf32>
    %37 = arith.mulf %26, %5 : vector<2x128xf32>
    %38 = arith.addf %36, %37 : vector<2x128xf32>
    %c1_i32 = arith.constant 1 : i32
    %39 = arith.truncf %38 : vector<2x128xf32> to vector<2x128xbf16>
    %cst_12 = arith.constant dense<0.000000e+00> : vector<2x384xf32>
    %40 = tpu.matmul %39, %3, %cst_12 {dimension_numbers = #tpu.dot_dimension_numbers<[1], [0], [0], [1], [0, 0, 1, 1], [], []>} : vector<2x128xbf16>, vector<128x384xbf16>, vector<2x384xf32> -> vector<2x384xf32>
    %41 = arith.index_cast %c1_i32 : i32 to index
    %c0_13 = arith.constant 0 : index
    %c0_14 = arith.constant 0 : index
    %42 = vector.load %arg2[%41, %c0_13, %c0_14] : memref<4x2x384xf32, #tpu.memory_space<vmem>>, vector<1x2x384xf32>
    %43 = vector.shape_cast %42 : vector<1x2x384xf32> to vector<2x384xf32>
    %44 = vector.extract_strided_slice %43 {offsets = [0, 0], sizes = [2, 128], strides = [1, 1]} : vector<2x384xf32> to vector<2x128xf32>
    %45 = vector.extract_strided_slice %40 {offsets = [0, 0], sizes = [2, 128], strides = [1, 1]} : vector<2x384xf32> to vector<2x128xf32>
    %46 = arith.addf %44, %45 : vector<2x128xf32>
    %47 = arith.negf %46 : vector<2x128xf32>
    %48 = math.exp %47 : vector<2x128xf32>
    %cst_15 = arith.constant 1.000000e+00 : f32
    %49 = vector.broadcast %cst_15 : f32 to vector<2x128xf32>
    %50 = arith.addf %49, %48 : vector<2x128xf32>
    %51 = arith.divf %49, %50 : vector<2x128xf32>
    %52 = vector.extract_strided_slice %43 {offsets = [0, 128], sizes = [2, 128], strides = [1, 1]} : vector<2x384xf32> to vector<2x128xf32>
    %53 = vector.extract_strided_slice %40 {offsets = [0, 128], sizes = [2, 128], strides = [1, 1]} : vector<2x384xf32> to vector<2x128xf32>
    %54 = arith.addf %52, %53 : vector<2x128xf32>
    %55 = arith.negf %54 : vector<2x128xf32>
    %56 = math.exp %55 : vector<2x128xf32>
    %cst_16 = arith.constant 1.000000e+00 : f32
    %57 = vector.broadcast %cst_16 : f32 to vector<2x128xf32>
    %58 = arith.addf %57, %56 : vector<2x128xf32>
    %59 = arith.divf %57, %58 : vector<2x128xf32>
    %60 = vector.extract_strided_slice %43 {offsets = [0, 256], sizes = [2, 128], strides = [1, 1]} : vector<2x384xf32> to vector<2x128xf32>
    %61 = vector.extract_strided_slice %40 {offsets = [0, 256], sizes = [2, 128], strides = [1, 1]} : vector<2x384xf32> to vector<2x128xf32>
    %62 = vector.broadcast %4 : vector<1x128xf32> to vector<2x128xf32>
    %63 = arith.addf %61, %62 : vector<2x128xf32>
    %64 = arith.mulf %51, %63 : vector<2x128xf32>
    %65 = arith.addf %60, %64 : vector<2x128xf32>
    %66 = math.tanh %65 : vector<2x128xf32>
    %cst_17 = arith.constant 1.000000e+00 : f32
    %67 = vector.broadcast %cst_17 : f32 to vector<2x128xf32>
    %68 = arith.subf %67, %59 : vector<2x128xf32>
    %69 = arith.mulf %68, %66 : vector<2x128xf32>
    %70 = arith.mulf %59, %38 : vector<2x128xf32>
    %71 = arith.addf %69, %70 : vector<2x128xf32>
    %c2_i32 = arith.constant 2 : i32
    %72 = arith.truncf %71 : vector<2x128xf32> to vector<2x128xbf16>
    %cst_18 = arith.constant dense<0.000000e+00> : vector<2x384xf32>
    %73 = tpu.matmul %72, %3, %cst_18 {dimension_numbers = #tpu.dot_dimension_numbers<[1], [0], [0], [1], [0, 0, 1, 1], [], []>} : vector<2x128xbf16>, vector<128x384xbf16>, vector<2x384xf32> -> vector<2x384xf32>
    %74 = arith.index_cast %c2_i32 : i32 to index
    %c0_19 = arith.constant 0 : index
    %c0_20 = arith.constant 0 : index
    %75 = vector.load %arg2[%74, %c0_19, %c0_20] : memref<4x2x384xf32, #tpu.memory_space<vmem>>, vector<1x2x384xf32>
    %76 = vector.shape_cast %75 : vector<1x2x384xf32> to vector<2x384xf32>
    %77 = vector.extract_strided_slice %76 {offsets = [0, 0], sizes = [2, 128], strides = [1, 1]} : vector<2x384xf32> to vector<2x128xf32>
    %78 = vector.extract_strided_slice %73 {offsets = [0, 0], sizes = [2, 128], strides = [1, 1]} : vector<2x384xf32> to vector<2x128xf32>
    %79 = arith.addf %77, %78 : vector<2x128xf32>
    %80 = arith.negf %79 : vector<2x128xf32>
    %81 = math.exp %80 : vector<2x128xf32>
    %cst_21 = arith.constant 1.000000e+00 : f32
    %82 = vector.broadcast %cst_21 : f32 to vector<2x128xf32>
    %83 = arith.addf %82, %81 : vector<2x128xf32>
    %84 = arith.divf %82, %83 : vector<2x128xf32>
    %85 = vector.extract_strided_slice %76 {offsets = [0, 128], sizes = [2, 128], strides = [1, 1]} : vector<2x384xf32> to vector<2x128xf32>
    %86 = vector.extract_strided_slice %73 {offsets = [0, 128], sizes = [2, 128], strides = [1, 1]} : vector<2x384xf32> to vector<2x128xf32>
    %87 = arith.addf %85, %86 : vector<2x128xf32>
    %88 = arith.negf %87 : vector<2x128xf32>
    %89 = math.exp %88 : vector<2x128xf32>
    %cst_22 = arith.constant 1.000000e+00 : f32
    %90 = vector.broadcast %cst_22 : f32 to vector<2x128xf32>
    %91 = arith.addf %90, %89 : vector<2x128xf32>
    %92 = arith.divf %90, %91 : vector<2x128xf32>
    %93 = vector.extract_strided_slice %76 {offsets = [0, 256], sizes = [2, 128], strides = [1, 1]} : vector<2x384xf32> to vector<2x128xf32>
    %94 = vector.extract_strided_slice %73 {offsets = [0, 256], sizes = [2, 128], strides = [1, 1]} : vector<2x384xf32> to vector<2x128xf32>
    %95 = vector.broadcast %4 : vector<1x128xf32> to vector<2x128xf32>
    %96 = arith.addf %94, %95 : vector<2x128xf32>
    %97 = arith.mulf %84, %96 : vector<2x128xf32>
    %98 = arith.addf %93, %97 : vector<2x128xf32>
    %99 = math.tanh %98 : vector<2x128xf32>
    %cst_23 = arith.constant 1.000000e+00 : f32
    %100 = vector.broadcast %cst_23 : f32 to vector<2x128xf32>
    %101 = arith.subf %100, %92 : vector<2x128xf32>
    %102 = arith.mulf %101, %99 : vector<2x128xf32>
    %103 = arith.mulf %92, %71 : vector<2x128xf32>
    %104 = arith.addf %102, %103 : vector<2x128xf32>
    %c3_i32 = arith.constant 3 : i32
    %105 = arith.truncf %104 : vector<2x128xf32> to vector<2x128xbf16>
    %cst_24 = arith.constant dense<0.000000e+00> : vector<2x384xf32>
    %106 = tpu.matmul %105, %3, %cst_24 {dimension_numbers = #tpu.dot_dimension_numbers<[1], [0], [0], [1], [0, 0, 1, 1], [], []>} : vector<2x128xbf16>, vector<128x384xbf16>, vector<2x384xf32> -> vector<2x384xf32>
    %107 = arith.index_cast %c3_i32 : i32 to index
    %c0_25 = arith.constant 0 : index
    %c0_26 = arith.constant 0 : index
    %108 = vector.load %arg2[%107, %c0_25, %c0_26] : memref<4x2x384xf32, #tpu.memory_space<vmem>>, vector<1x2x384xf32>
    %109 = vector.shape_cast %108 : vector<1x2x384xf32> to vector<2x384xf32>
    %110 = vector.extract_strided_slice %109 {offsets = [0, 0], sizes = [2, 128], strides = [1, 1]} : vector<2x384xf32> to vector<2x128xf32>
    %111 = vector.extract_strided_slice %106 {offsets = [0, 0], sizes = [2, 128], strides = [1, 1]} : vector<2x384xf32> to vector<2x128xf32>
    %112 = arith.addf %110, %111 : vector<2x128xf32>
    %113 = arith.negf %112 : vector<2x128xf32>
    %114 = math.exp %113 : vector<2x128xf32>
    %cst_27 = arith.constant 1.000000e+00 : f32
    %115 = vector.broadcast %cst_27 : f32 to vector<2x128xf32>
    %116 = arith.addf %115, %114 : vector<2x128xf32>
    %117 = arith.divf %115, %116 : vector<2x128xf32>
    %118 = vector.extract_strided_slice %109 {offsets = [0, 128], sizes = [2, 128], strides = [1, 1]} : vector<2x384xf32> to vector<2x128xf32>
    %119 = vector.extract_strided_slice %106 {offsets = [0, 128], sizes = [2, 128], strides = [1, 1]} : vector<2x384xf32> to vector<2x128xf32>
    %120 = arith.addf %118, %119 : vector<2x128xf32>
    %121 = arith.negf %120 : vector<2x128xf32>
    %122 = math.exp %121 : vector<2x128xf32>
    %cst_28 = arith.constant 1.000000e+00 : f32
    %123 = vector.broadcast %cst_28 : f32 to vector<2x128xf32>
    %124 = arith.addf %123, %122 : vector<2x128xf32>
    %125 = arith.divf %123, %124 : vector<2x128xf32>
    %126 = vector.extract_strided_slice %109 {offsets = [0, 256], sizes = [2, 128], strides = [1, 1]} : vector<2x384xf32> to vector<2x128xf32>
    %127 = vector.extract_strided_slice %106 {offsets = [0, 256], sizes = [2, 128], strides = [1, 1]} : vector<2x384xf32> to vector<2x128xf32>
    %128 = vector.broadcast %4 : vector<1x128xf32> to vector<2x128xf32>
    %129 = arith.addf %127, %128 : vector<2x128xf32>
    %130 = arith.mulf %117, %129 : vector<2x128xf32>
    %131 = arith.addf %126, %130 : vector<2x128xf32>
    %132 = math.tanh %131 : vector<2x128xf32>
    %cst_29 = arith.constant 1.000000e+00 : f32
    %133 = vector.broadcast %cst_29 : f32 to vector<2x128xf32>
    %134 = arith.subf %133, %125 : vector<2x128xf32>
    %135 = arith.mulf %134, %132 : vector<2x128xf32>
    %136 = arith.mulf %125, %104 : vector<2x128xf32>
    %137 = arith.addf %135, %136 : vector<2x128xf32>
    %c4_i32 = arith.constant 4 : i32
    %c0_30 = arith.constant 0 : index
    %c0_31 = arith.constant 0 : index
    %138 = vector.load %arg8[%c0_30, %c0_31] : memref<2x128xf32, #tpu.memory_space<vmem>>, vector<2x128xf32>
    tpu.vector_store %arg8[%c0_30, %c0_31], %137 {strides = array<i32>} : memref<2x128xf32, #tpu.memory_space<vmem>>, vector<2x128xf32>,
    %c0_i32_32 = arith.constant 0 : i32
    %139 = arith.cmpi eq, %arg1, %c0_i32_32 : i32
    %140 = arith.extui %139 : i1 to i32
    %c0_i32_33 = arith.constant 0 : i32
    %141 = arith.cmpi ne, %140, %c0_i32_33 : i32
    scf.if %141 {
      %142 = arith.truncf %137 : vector<2x128xf32> to vector<2x128xbf16>
      %c0_34 = arith.constant 0 : index
      %c0_35 = arith.constant 0 : index
      %143 = vector.load %arg5[%c0_34, %c0_35] : memref<128x128xbf16, #tpu.memory_space<vmem>>, vector<128x128xbf16>
      %cst_36 = arith.constant dense<0.000000e+00> : vector<2x128xf32>
      %144 = tpu.matmul %142, %143, %cst_36 {dimension_numbers = #tpu.dot_dimension_numbers<[1], [0], [0], [1], [0, 0, 1, 1], [], []>} : vector<2x128xbf16>, vector<128x128xbf16>, vector<2x128xf32> -> vector<2x128xf32>
      %c0_37 = arith.constant 0 : index
      %c0_38 = arith.constant 0 : index
      %145 = vector.load %arg6[%c0_37, %c0_38] : memref<1x128xf32, #tpu.memory_space<vmem>>, vector<1x128xf32>
      %146 = vector.broadcast %145 : vector<1x128xf32> to vector<2x128xf32>
      %147 = arith.addf %144, %146 : vector<2x128xf32>
      %c0_39 = arith.constant 0 : index
      %c0_40 = arith.constant 0 : index
      %148 = vector.load %arg7[%c0_39, %c0_40] : memref<2x128xf32, #tpu.memory_space<vmem>>, vector<2x128xf32>
      tpu.vector_store %arg7[%c0_39, %c0_40], %147 {strides = array<i32>} : memref<2x128xf32, #tpu.memory_space<vmem>>, vector<2x128xf32>,
    } else {
    }
    return
  }
  func.func @transform_0(%arg0: i32, %arg1: i32) -> (i32, i32, i32) {
    %c0_i32 = arith.constant 0 : i32
    %c0_i32_0 = arith.constant 0 : i32
    return %arg1, %arg0, %c0_i32 : i32, i32, i32
  }
  func.func @transform_1(%arg0: i32, %arg1: i32) -> (i32, i32) {
    %c0_i32 = arith.constant 0 : i32
    %c0_i32_0 = arith.constant 0 : i32
    %c0_i32_1 = arith.constant 0 : i32
    return %c0_i32, %c0_i32_0 : i32, i32
  }
  func.func @transform_2(%arg0: i32, %arg1: i32) -> (i32, i32) {
    %c0_i32 = arith.constant 0 : i32
    %c0_i32_0 = arith.constant 0 : i32
    %c0_i32_1 = arith.constant 0 : i32
    return %c0_i32, %c0_i32_0 : i32, i32
  }
  func.func @transform_3(%arg0: i32, %arg1: i32) -> (i32, i32) {
    %c0_i32 = arith.constant 0 : i32
    %c0_i32_0 = arith.constant 0 : i32
    %c0_i32_1 = arith.constant 0 : i32
    return %c0_i32, %c0_i32_0 : i32, i32
  }
  func.func @transform_4(%arg0: i32, %arg1: i32) -> (i32, i32) {
    %c0_i32 = arith.constant 0 : i32
    %c0_i32_0 = arith.constant 0 : i32
    %c0_i32_1 = arith.constant 0 : i32
    return %c0_i32, %c0_i32_0 : i32, i32
  }
  func.func @transform_5(%arg0: i32, %arg1: i32) -> (i32, i32) {
    %c0_i32 = arith.constant 0 : i32
    %c0_i32_0 = arith.constant 0 : i32
    return %arg0, %c0_i32 : i32, i32
  }
}

</mosaic_0001>

<bundles_post_ra>
// kernel: vis_mlp_gru_forward.3
= control target key start
LH: loop header
LB: loop body
LE: loop exit
PB: predicated region body
PF: predicated region fallthrough
CT: control target
= control target key end

     0   :  { %v1067_v2 = vmov 0.0   ;;  %v1068_v3 = vmov 0   ;;  %vm1069_vm0 = vmmov 0   ;;  %s1447_s0 = inlined_call_operand.vmem [shape: f32[4,2,384], index: 0, kind: input, shape index: {}]   ;;  %s1448_s1 = inlined_call_operand.vmem [shape: bf16[128,384], index: 1, kind: input, shape index: {}]   ;;  %s1449_s2 = inlined_call_operand.vmem [shape: f32[1,128], index: 2, kind: input, shape index: {}]   ;;  %s1450_s3 = inlined_call_operand.vmem [shape: bf16[128,128], index: 3, kind: input, shape index: {}]   ;;  %s1451_s4 = inlined_call_operand.vmem [shape: f32[1,128], index: 4, kind: input, shape index: {}]   ;;  %s1452_s5 = inlined_call_operand.hbm [shape: f32[2,128], index: 5, kind: output, shape index: {}]  }
   0x1   :  { %v1104_v0 = vld [vmem:[%s1448_s1 + $0x4] ss:$12 sps:$4 sm:$0xff]   ;;  %v1109_v1 = vld [vmem:[%s1448_s1] ss:$12 sps:$4 sm:$0xff]   ;;  %859 = vmatprep.subr.bf16.mxu1 %v1067_v2  ;;  %26 = vst [vmem:[#allocation2] sm:$0x3] %v1067_v2  ;;  %222 = vmatprep.mubr.bf16.mxu0 %v1068_v3 }
   0x2   :  { %190 = vmatprep.subr.bf16.mxu0 %v1104_v0  ;;  %v1118_v4 = vld [vmem:[%s1448_s1 + $0x1c] ss:$12 sps:$4 sm:$0xff]   ;;  %875 = vmatprep.mubr.msk.bf16.mxu1 %vm1069_vm0, %v1067_v2  ;;  %v1126_v5 = vld [vmem:[%s1448_s1 + $0x18] ss:$12 sps:$4 sm:$0xff]   ;;  %v1132_v6 = vld [vmem:[%s1448_s1 + $0x34] ss:$12 sps:$4 sm:$0xff]  }
   0x3   :  { %191 = vmatpush1.bf16.msra.mxu0 %v1109_v1  ;;  %v1138_v7 = vld [vmem:[%s1448_s1 + $0x30] ss:$12 sps:$4 sm:$0xff]   ;;  %v1144_v8 = vld [vmem:[%s1448_s1 + $0x4c] ss:$12 sps:$4 sm:$0xff]   ;;  %v1149_v9 = vld [vmem:[%s1448_s1 + $0x8] ss:$12 sps:$4 sm:$0xff]  }
   0x4   :  { %192 = vmatprep.subr.bf16.mxu0 %v1118_v4  ;;  %v1155_v10 = vld [vmem:[%s1448_s1 + $0x48] ss:$12 sps:$4 sm:$0xff]   ;;  %860 = vmatpush3.bf16.msra.mxu1 %v1149_v9  ;;  %v1162_v11 = vld [vmem:[%s1448_s1 + $0x64] ss:$12 sps:$4 sm:$0xff]   ;;  %v1168_v12 = vld [vmem:[%s1448_s1 + $0x20] ss:$12 sps:$4 sm:$0xff]  }
   0x5   :  { %861 = vmatprep.subr.bf16.mxu1 %v1067_v2  ;;  %v1173_v13 = vld [vmem:[%s1448_s1 + $0x60] ss:$12 sps:$4 sm:$0xff]   ;;  %v1180_v14 = vld [vmem:[%s1448_s1 + $0x38] ss:$12 sps:$4 sm:$0xff]   ;;  %v1186_v15 = vld [vmem:[%s1448_s1 + $0x7c] ss:$12 sps:$4 sm:$0xff]  }
   0x6   :  { %v1192_v16 = vld [vmem:[%s1448_s1 + $0x78] ss:$12 sps:$4 sm:$0xff]   ;;  %v1197_v17 = vld [vmem:[%s1448_s1 + $0x94] ss:$12 sps:$4 sm:$0xff]   ;;  %v1202_v18 = vld [vmem:[%s1448_s1 + $0x50] ss:$12 sps:$4 sm:$0xff]  }
   0x7   :  { %193 = vmatpush1.bf16.msra.mxu0 %v1126_v5  ;;  %v1211_v19 = vld [vmem:[%s1448_s1 + $0x90] ss:$12 sps:$4 sm:$0xff]   ;;  %v1216_v20 = vld [vmem:[%s1448_s1 + $0x68] ss:$12 sps:$4 sm:$0xff]   ;;  %v1224_v21 = vld [vmem:[%s1448_s1 + $0xac] ss:$12 sps:$4 sm:$0xff]  }
   0x8   :  { %194 = vmatprep.subr.bf16.mxu0 %v1132_v6  ;;  %862 = vmatpush3.bf16.msra.mxu1 %v1168_v12 }
   0x9   :  { %863 = vmatprep.subr.bf16.mxu1 %v1067_v2 }
   0xb   :  { %195 = vmatpush1.bf16.msra.mxu0 %v1138_v7 }
   0xc   :  { %196 = vmatprep.subr.bf16.mxu0 %v1144_v8  ;;  %864 = vmatpush3.bf16.msra.mxu1 %v1180_v14 }
   0xd   :  { %865 = vmatprep.subr.bf16.mxu1 %v1067_v2 }
   0xf   :  { %197 = vmatpush1.bf16.msra.mxu0 %v1155_v10 }
  0x10   :  { %198 = vmatprep.subr.bf16.mxu0 %v1162_v11  ;;  %866 = vmatpush3.bf16.msra.mxu1 %v1202_v18 }
  0x11   :  { %867 = vmatprep.subr.bf16.mxu1 %v1067_v2 }
  0x13   :  { %199 = vmatpush1.bf16.msra.mxu0 %v1173_v13 }
  0x14   :  { %200 = vmatprep.subr.bf16.mxu0 %v1186_v15 }
  0x17   :  { %201 = vmatpush1.bf16.msra.mxu0 %v1192_v16 }
  0x18   :  { %202 = vmatprep.subr.bf16.mxu0 %v1197_v17 }
  0x19   :  { %10 = vsyncpa [#allocation4], 0  ;;  %v1231_v22 = vld [vmem:[%s1448_s1 + $0xa8] ss:$12 sps:$4 sm:$0xff]   ;;  %v1233_v23 = vld [vmem:[#allocation2] sm:$0x3]  ;;  %868 = vmatpush3.bf16.msra.mxu1 %v1216_v20 }
  0x1a   :  { %v1239_v24 = vld [vmem:[%s1448_s1 + $0x80] ss:$12 sps:$4 sm:$0xff]   ;;  %869 = vmatprep.subr.bf16.mxu1 %v1067_v2  ;;  %v61_v25 = vpack.c.bf16 %v1233_v23, %v1233_v23  ;;  %v1250_v26 = vld [vmem:[%s1448_s1 + $0x98] ss:$12 sps:$4 sm:$0xff]   ;;  %v1258_v27 = vld [vmem:[%s1448_s1 + $0xb0] ss:$12 sps:$4 sm:$0xff]  }
  0x1b   :  { %203 = vmatpush1.bf16.msra.mxu0 %v1211_v19  ;;  %v271_v28 = vld [vmem:[%s1447_s0] sm:$0x3f]  ;;  %v796_v59 = vld [vmem:[%s1447_s0 + $0x6] sm:$0x3f]  ;;  %s1070_s15 = smov [#allocation3]  }
  0x1c   :  { %204 = vmatprep.subr.bf16.mxu0 %v1224_v21  ;;  %v280_v30 = vrot.slane %v271_v28, 2  ;;  %v1304_v45 = vld [vmem:[%s1449_s2] ss:$0 sm:$0xff]  ;;  %v297_v48 = vrot.slane %v271_v28, 4  ;;  %v397_v62 = vrot.slane %v796_v59, 2  ;;  %s761_s1 = sshll.u32 %s1070_s15, 4  ;;  %s762_s1 = int_to_ptr.vmem [resolvable:$true] %s761_s1 }
  0x1d   :  { %870 = vmatpush3.bf16.msra.mxu1 %v1239_v24  ;;  %s1043_s16 = scalar_lea.vmem %s762_s1, 32  ;;  %p1048_p1 = scmp.lt.s32.totalorder %s762_s1, %s762_s1 }
  0x1e   :  { %871 = vmatprep.subr.bf16.mxu1 %v1067_v2  ;;  %p1044_p0 = scmp.ne.s32.totalorder %s762_s1, %s1043_s16  ;;  %p1049_p2 = scmp.lt.s32.totalorder %s1043_s16, %s1043_s16 }
  0x1f   :  { %205 = vmatpush1.bf16.msra.mxu0 %v1231_v22 }
  0x20   :  { %306 = vmatprep.subr.bf16.mxu0 %v1104_v0  ;;  %p1050_p3 = por %p1049_p2, %p1048_p1 }
  0x21   :  { %872 = vmatpush3.bf16.msra.mxu1 %v1250_v26 }
  0x22   :  { %223 = vmatmul.mubr.bf16.vlgmr.msra.gmra.mrb[0].mxu0 %v61_v25  ;;  %873 = vmatprep.subr.bf16.mxu1 %v1067_v2  ;;  %p1051_p4 = pnand %p1050_p3, %p1044_p0 }
  0x23   :  { %307 = vmatpush1.bf16.msra.mxu0 %v1109_v1  ;;  %338 = vmatprep.mubr.bf16.mxu0 %v1068_v3 }
  0x24   :  { %308 = vmatprep.subr.bf16.mxu0 %v1118_v4 }
  0x25   :  { %874 = vmatpush3.bf16.msra.mxu1 %v1258_v27 }
  0x26   :  { %879 = vmatprep.subr.bf16.mxu1 %v1067_v2 }
  0x27   :  { %309 = vmatpush1.bf16.msra.mxu0 %v1126_v5 }
  0x28   :  { %310 = vmatprep.subr.bf16.mxu0 %v1132_v6  ;;  %876 = vmatmul.mubr.bf16.vlgmr.msra.gmra.mrb[0].mxu1 %v61_v25 }
  0x29   :  { %880 = vmatpush3.bf16.msra.mxu1 %v1149_v9  ;;  %895 = vmatprep.mubr.msk.bf16.mxu1 %vm1069_vm0, %v1067_v2 }
  0x2a   :  { %881 = vmatprep.subr.bf16.mxu1 %v1067_v2 }
  0x2b   :  { %311 = vmatpush1.bf16.msra.mxu0 %v1138_v7 }
  0x2c   :  { %312 = vmatprep.subr.bf16.mxu0 %v1144_v8 }
  0x2d   :  { %882 = vmatpush3.bf16.msra.mxu1 %v1168_v12 }
  0x2e   :  { %883 = vmatprep.subr.bf16.mxu1 %v1067_v2 }
  0x2f   :  { %313 = vmatpush1.bf16.msra.mxu0 %v1155_v10 }
  0x30   :  { %314 = vmatprep.subr.bf16.mxu0 %v1162_v11 }
  0x31   :  { %884 = vmatpush3.bf16.msra.mxu1 %v1180_v14 }
  0x32   :  { %885 = vmatprep.subr.bf16.mxu1 %v1067_v2 }
  0x33   :  { %315 = vmatpush1.bf16.msra.mxu0 %v1173_v13 }
  0x34   :  { %316 = vmatprep.subr.bf16.mxu0 %v1186_v15 }
  0x35   :  { %886 = vmatpush3.bf16.msra.mxu1 %v1202_v18 }
  0x36   :  { %887 = vmatprep.subr.bf16.mxu1 %v1067_v2 }
  0x37   :  { %317 = vmatpush1.bf16.msra.mxu0 %v1192_v16 }
  0x38   :  { %318 = vmatprep.subr.bf16.mxu0 %v1197_v17 }
  0x39   :  { %888 = vmatpush3.bf16.msra.mxu1 %v1216_v20 }
  0x3a   :  { %889 = vmatprep.subr.bf16.mxu1 %v1067_v2 }
  0x3b   :  { %319 = vmatpush1.bf16.msra.mxu0 %v1211_v19 }
  0x3c   :  { %320 = vmatprep.subr.bf16.mxu0 %v1224_v21 }
  0x3d   :  { %890 = vmatpush3.bf16.msra.mxu1 %v1239_v24 }
  0x3e   :  { %891 = vmatprep.subr.bf16.mxu1 %v1067_v2 }
  0x3f   :  { %321 = vmatpush1.bf16.msra.mxu0 %v1231_v22 }
  0x40   :  { %417 = vmatprep.subr.bf16.mxu0 %v1104_v0 }
  0x41   :  { %892 = vmatpush3.bf16.msra.mxu1 %v1250_v26 }
  0x42   :  { %893 = vmatprep.subr.bf16.mxu1 %v1067_v2 }
  0x45   :  { %894 = vmatpush3.bf16.msra.mxu1 %v1258_v27 }
  0x46   :  { %899 = vmatprep.subr.bf16.mxu1 %v1067_v2 }
  0xf5   :  { %v224_v29 = vpop.f32.mrb[0].mxu0 }
  0xf6   :  { %v272_v31 = vadd.f32 %v271_v28, %v224_v29  ;;  %v226_v32 = vpop.f32.mrb[1].mxu0 }
  0xf7   :  { %v228_v33 = vpop.f32.mrb[2].mxu0  ;;  %v282_v36 = vadd.f32 %v280_v30, %v226_v32 }
  0xf8   :  { %v793_v34 = vmul.f32 -1.442695, %v272_v31  ;;  %v229_v35 = vpop.f32.mrb[3].mxu0 }
  0xf9   :  { %v794_v37 = vmul.f32 -1.442695, %v282_v36 }
  0xfa   :  { %1003 = vpow2.f32 %v793_v34 }
  0xfb   :  { %v265_v38 = vpop.f32.mrb[0].mxu1  ;;  %1005 = vpow2.f32 %v794_v37 }
  0xfc   :  { %v877_v39 = vpop.f32.mrb[1].mxu1  ;;  %v295_v47 = vadd.f32 %v1304_v45, %v265_v38  ;;  %v408_v38 = vrot.slane %v796_v59, 4 }
  0xfd   :  { %v268_v40 = vpop.f32.mrb[2].mxu1 }
  0xfe   :  { %v878_v41 = vpop.f32.mrb[3].mxu1 }
 0x104   :  { %v1004_v42 = vpop.eup %1003 }
 0x105   :  { %v276_v43 = vadd.f32 1.0, %v1004_v42  ;;  %v1006_v44 = vpop.eup %1005 }
 0x106   :  { %v286_v46 = vadd.f32 1.0, %v1006_v44 }
 0x107   :  { %1007 = vrcp.f32 %v276_v43 }
 0x108   :  { %1009 = vrcp.f32 %v286_v46 }
 0x111   :  { %v1008_v49 = vpop.eup %1007 }
 0x112   :  { %v296_v50 = vmul.f32 %v1008_v49, %v295_v47  ;;  %v1010_v52 = vpop.eup %1009 }
 0x113   :  { %v301_v53 = vsub.f32 1.0, %v1010_v52  ;;  %v303_v56 = vmul.f32 %v1010_v52, %v1233_v23 }
 0x114   :  { %v299_v51 = vadd.f32 %v297_v48, %v296_v50 }
 0x116   :  { %1011 = vtanh.f32 %v299_v51 }
 0x120   :  { %v1012_v54 = vpop.eup %1011 }
 0x121   :  { %v302_v55 = vmul.f32 %v1012_v54, %v301_v53 }
 0x123   :  { %v1308_v57 = vadd.f32 %v303_v56, %v302_v55 }
 0x125   :  { %v305_v58 = vpack.c.bf16 %v1308_v57, %v1308_v57 }
 0x127   :  { %339 = vmatmul.mubr.bf16.vlgmr.msra.gmra.mrb[4].mxu0 %v305_v58  ;;  %896 = vmatmul.mubr.bf16.vlgmr.msra.gmra.mrb[4].mxu1 %v305_v58  ;;  %v996_v58 = vld [vmem:[%s1450_s3 + $0x8] sm:$0xff]  }
 0x128   :  { %418 = vmatpush1.bf16.msra.mxu0 %v1109_v1  ;;  %900 = vmatpush3.bf16.msra.mxu1 %v1149_v9 }
 0x129   :  { %419 = vmatprep.subr.bf16.mxu0 %v1118_v4  ;;  %901 = vmatprep.subr.bf16.mxu1 %v1067_v2 }
 0x12a   :  { %449 = vmatprep.mubr.bf16.mxu0 %v1068_v3  ;;  %915 = vmatprep.mubr.msk.bf16.mxu1 %vm1069_vm0, %v1067_v2 }
 0x12c   :  { %420 = vmatpush1.bf16.msra.mxu0 %v1126_v5  ;;  %902 = vmatpush3.bf16.msra.mxu1 %v1168_v12 }
 0x12d   :  { %421 = vmatprep.subr.bf16.mxu0 %v1132_v6  ;;  %903 = vmatprep.subr.bf16.mxu1 %v1067_v2 }
 0x130   :  { %422 = vmatpush1.bf16.msra.mxu0 %v1138_v7  ;;  %904 = vmatpush3.bf16.msra.mxu1 %v1180_v14 }
 0x131   :  { %423 = vmatprep.subr.bf16.mxu0 %v1144_v8  ;;  %905 = vmatprep.subr.bf16.mxu1 %v1067_v2 }
 0x134   :  { %424 = vmatpush1.bf16.msra.mxu0 %v1155_v10  ;;  %906 = vmatpush3.bf16.msra.mxu1 %v1202_v18 }
 0x135   :  { %425 = vmatprep.subr.bf16.mxu0 %v1162_v11  ;;  %907 = vmatprep.subr.bf16.mxu1 %v1067_v2 }
 0x138   :  { %426 = vmatpush1.bf16.msra.mxu0 %v1173_v13  ;;  %908 = vmatpush3.bf16.msra.mxu1 %v1216_v20 }
 0x139   :  { %427 = vmatprep.subr.bf16.mxu0 %v1186_v15  ;;  %909 = vmatprep.subr.bf16.mxu1 %v1067_v2 }
 0x13c   :  { %428 = vmatpush1.bf16.msra.mxu0 %v1192_v16  ;;  %910 = vmatpush3.bf16.msra.mxu1 %v1239_v24 }
 0x13d   :  { %429 = vmatprep.subr.bf16.mxu0 %v1197_v17  ;;  %911 = vmatprep.subr.bf16.mxu1 %v1067_v2 }
 0x140   :  { %430 = vmatpush1.bf16.msra.mxu0 %v1211_v19  ;;  %912 = vmatpush3.bf16.msra.mxu1 %v1250_v26 }
 0x141   :  { %431 = vmatprep.subr.bf16.mxu0 %v1224_v21  ;;  %913 = vmatprep.subr.bf16.mxu1 %v1067_v2 }
 0x144   :  { %432 = vmatpush1.bf16.msra.mxu0 %v1231_v22  ;;  %914 = vmatpush3.bf16.msra.mxu1 %v1258_v27 }
 0x145   :  { %528 = vmatprep.subr.bf16.mxu0 %v1104_v0  ;;  %919 = vmatprep.subr.bf16.mxu1 %v1067_v2 }
 0x1fa   :  { %v340_v60 = vpop.f32.mrb[4].mxu0  ;;  %v381_v61 = vpop.f32.mrb[4].mxu1 }
 0x1fb   :  { %v389_v63 = vadd.f32 %v796_v59, %v340_v60  ;;  %v342_v23 = vpop.f32.mrb[5].mxu0  ;;  %v897_v25 = vpop.f32.mrb[5].mxu1  ;;  %v406_v39 = vadd.f32 %v1304_v45, %v381_v61  ;;  %v997_v59 = vld [vmem:[%s1450_s3 + $0x10] sm:$0xff]   ;;  %v998_v60 = vld [vmem:[%s1450_s3 + $0x18] sm:$0xff]   ;;  %v999_v61 = vld [vmem:[%s1450_s3 + $0x20] sm:$0xff]  }
 0x1fc   :  { %v344_v28 = vpop.f32.mrb[6].mxu0  ;;  %v384_v29 = vpop.f32.mrb[6].mxu1  ;;  %v399_v33 = vadd.f32 %v397_v62, %v342_v23  ;;  %v1000_v62 = vld [vmem:[%s1450_s3 + $0x28] sm:$0xff]   ;;  %v1002_v23 = vld [vmem:[%s1450_s3 + $0x38] sm:$0xff]   ;;  %v802_v25 = vld [vmem:[%s1447_s0 + $0x12] sm:$0x3f] }
 0x1fd   :  { %v797_v30 = vmul.f32 -1.442695, %v389_v63  ;;  %v345_v31 = vpop.f32.mrb[7].mxu0  ;;  %v898_v32 = vpop.f32.mrb[7].mxu1  ;;  %v1001_v63 = vld [vmem:[%s1450_s3 + $0x30] sm:$0xff]  }
 0x1fe   :  { %v798_v0 = vmul.f32 -1.442695, %v399_v33 }
 0x1ff   :  { %1013 = vpow2.f32 %v797_v30  ;;  %v619_v30 = vrot.slane %v802_v25, 2 }
 0x200   :  { %1015 = vpow2.f32 %v798_v0 }
 0x209   :  { %v1014_v34 = vpop.eup %1013 }
 0x20a   :  { %v393_v35 = vadd.f32 1.0, %v1014_v34  ;;  %v1016_v36 = vpop.eup %1015 }
 0x20b   :  { %v403_v37 = vadd.f32 1.0, %v1016_v36 }
 0x20c   :  { %1017 = vrcp.f32 %v393_v35 }
 0x20d   :  { %1019 = vrcp.f32 %v403_v37 }
 0x216   :  { %v1018_v40 = vpop.eup %1017 }
 0x217   :  { %v407_v41 = vmul.f32 %v1018_v40, %v406_v39  ;;  %v1020_v43 = vpop.eup %1019 }
 0x218   :  { %v412_v44 = vsub.f32 1.0, %v1020_v43  ;;  %v414_v48 = vmul.f32 %v1020_v43, %v1308_v57  ;;  %v995_v57 = vld [vmem:[%s1450_s3] sm:$0xff]   ;;  %v630_v43 = vrot.slane %v802_v25, 4 }
 0x219   :  { %v410_v42 = vadd.f32 %v408_v38, %v407_v41 }
 0x21b   :  { %1021 = vtanh.f32 %v410_v42 }
 0x225   :  { %v1022_v46 = vpop.eup %1021 }
 0x226   :  { %v413_v47 = vmul.f32 %v1022_v46, %v412_v44 }
 0x228   :  { %v1352_v49 = vadd.f32 %v414_v48, %v413_v47 }
 0x22a   :  { %v416_v50 = vpack.c.bf16 %v1352_v49, %v1352_v49 }
 0x22c   :  { %450 = vmatmul.mubr.bf16.vlgmr.msra.gmra.mrb[8].mxu0 %v416_v50  ;;  %916 = vmatmul.mubr.bf16.vlgmr.msra.gmra.mrb[8].mxu1 %v416_v50 }
 0x22d   :  { %529 = vmatpush1.bf16.msra.mxu0 %v1109_v1  ;;  %920 = vmatpush3.bf16.msra.mxu1 %v1149_v9  ;;  %v799_v1 = vld [vmem:[%s1447_s0 + $0xc] sm:$0x3f] }
 0x22e   :  { %530 = vmatprep.subr.bf16.mxu0 %v1118_v4  ;;  %921 = vmatprep.subr.bf16.mxu1 %v1067_v2 }
 0x22f   :  { %560 = vmatprep.mubr.bf16.mxu0 %v1068_v3  ;;  %935 = vmatprep.mubr.msk.bf16.mxu1 %vm1069_vm0, %v1067_v2 }
 0x231   :  { %531 = vmatpush1.bf16.msra.mxu0 %v1126_v5  ;;  %922 = vmatpush3.bf16.msra.mxu1 %v1168_v12  ;;  %v508_v5 = vrot.slane %v799_v1, 2 }
 0x232   :  { %532 = vmatprep.subr.bf16.mxu0 %v1132_v6  ;;  %923 = vmatprep.subr.bf16.mxu1 %v1067_v2 }
 0x235   :  { %533 = vmatpush1.bf16.msra.mxu0 %v1138_v7  ;;  %924 = vmatpush3.bf16.msra.mxu1 %v1180_v14 }
 0x236   :  { %534 = vmatprep.subr.bf16.mxu0 %v1144_v8  ;;  %925 = vmatprep.subr.bf16.mxu1 %v1067_v2 }
 0x239   :  { %535 = vmatpush1.bf16.msra.mxu0 %v1155_v10  ;;  %926 = vmatpush3.bf16.msra.mxu1 %v1202_v18 }
 0x23a   :  { %536 = vmatprep.subr.bf16.mxu0 %v1162_v11  ;;  %927 = vmatprep.subr.bf16.mxu1 %v1067_v2 }
 0x23d   :  { %537 = vmatpush1.bf16.msra.mxu0 %v1173_v13  ;;  %928 = vmatpush3.bf16.msra.mxu1 %v1216_v20  ;;  %v519_v20 = vrot.slane %v799_v1, 4 }
 0x23e   :  { %538 = vmatprep.subr.bf16.mxu0 %v1186_v15  ;;  %929 = vmatprep.subr.bf16.mxu1 %v1067_v2 }
 0x241   :  { %539 = vmatpush1.bf16.msra.mxu0 %v1192_v16  ;;  %930 = vmatpush3.bf16.msra.mxu1 %v1239_v24 }
 0x242   :  { %540 = vmatprep.subr.bf16.mxu0 %v1197_v17  ;;  %931 = vmatprep.subr.bf16.mxu1 %v1067_v2 }
 0x245   :  { %541 = vmatpush1.bf16.msra.mxu0 %v1211_v19  ;;  %932 = vmatpush3.bf16.msra.mxu1 %v1250_v26 }
 0x246   :  { %542 = vmatprep.subr.bf16.mxu0 %v1224_v21  ;;  %933 = vmatprep.subr.bf16.mxu1 %v1067_v2 }
 0x249   :  { %543 = vmatpush1.bf16.msra.mxu0 %v1231_v22  ;;  %934 = vmatpush3.bf16.msra.mxu1 %v1258_v27 }
 0x24a   :  { %939 = vmatprep.subr.bf16.mxu0 %v1067_v2 }
 0x2ff   :  { %v451_v3 = vpop.f32.mrb[8].mxu0  ;;  %v492_v4 = vpop.f32.mrb[8].mxu1 }
 0x300   :  { %v500_v6 = vadd.f32 %v799_v1, %v451_v3  ;;  %v453_v7 = vpop.f32.mrb[9].mxu0  ;;  %v917_v8 = vpop.f32.mrb[9].mxu1  ;;  %v517_v21 = vadd.f32 %v1304_v45, %v492_v4 }
 0x301   :  { %v455_v9 = vpop.f32.mrb[10].mxu0  ;;  %v495_v10 = vpop.f32.mrb[10].mxu1  ;;  %v510_v14 = vadd.f32 %v508_v5, %v453_v7  ;;  %v805_v7 = vld [vmem:[%s1451_s4] ss:$0 sm:$0xff] }
 0x302   :  { %v800_v11 = vmul.f32 -1.442695, %v500_v6  ;;  %v456_v12 = vpop.f32.mrb[11].mxu0  ;;  %v918_v13 = vpop.f32.mrb[11].mxu1 }
 0x303   :  { %v801_v15 = vmul.f32 -1.442695, %v510_v14 }
 0x304   :  { %1023 = vpow2.f32 %v800_v11 }
 0x305   :  { %1025 = vpow2.f32 %v801_v15 }
 0x30e   :  { %v1024_v16 = vpop.eup %1023 }
 0x30f   :  { %v504_v17 = vadd.f32 1.0, %v1024_v16  ;;  %v1026_v18 = vpop.eup %1025 }
 0x310   :  { %v514_v19 = vadd.f32 1.0, %v1026_v18 }
 0x311   :  { %1027 = vrcp.f32 %v504_v17 }
 0x312   :  { %1029 = vrcp.f32 %v514_v19 }
 0x31b   :  { %v1028_v22 = vpop.eup %1027 }
 0x31c   :  { %v518_v24 = vmul.f32 %v1028_v22, %v517_v21  ;;  %v1030_v27 = vpop.eup %1029 }
 0x31d   :  { %v523_v51 = vsub.f32 1.0, %v1030_v27  ;;  %v525_v54 = vmul.f32 %v1030_v27, %v1352_v49 }
 0x31e   :  { %v521_v26 = vadd.f32 %v519_v20, %v518_v24 }
 0x320   :  { %1031 = vtanh.f32 %v521_v26 }
 0x32a   :  { %v1032_v52 = vpop.eup %1031 }
 0x32b   :  { %v524_v53 = vmul.f32 %v1032_v52, %v523_v51 }
 0x32d   :  { %v526_v55 = vadd.f32 %v525_v54, %v524_v53 }
 0x32f   :  { %v527_v56 = vpack.c.bf16 %v526_v55, %v526_v55 }
 0x331   :  { %561 = vmatmul.mubr.bf16.vlgmr.msra.gmra.mrb[12].mxu0 %v527_v56  ;;  %936 = vmatmul.mubr.bf16.vlgmr.msra.gmra.mrb[12].mxu1 %v527_v56 }
 0x332   :  { %955 = vmatprep.mubr.msk.bf16.mxu0 %vm1069_vm0, %v1067_v2  ;;  %940 = vmatpush3.bf16.msra.mxu0 %v995_v57 }
 0x333   :  { %941 = vmatprep.subr.bf16.mxu0 %v1067_v2 }
 0x336   :  { %942 = vmatpush3.bf16.msra.mxu0 %v996_v58 }
 0x337   :  { %943 = vmatprep.subr.bf16.mxu0 %v1067_v2 }
 0x33a   :  { %944 = vmatpush3.bf16.msra.mxu0 %v997_v59 }
 0x33b   :  { %945 = vmatprep.subr.bf16.mxu0 %v1067_v2 }
 0x33e   :  { %946 = vmatpush3.bf16.msra.mxu0 %v998_v60 }
 0x33f   :  { %947 = vmatprep.subr.bf16.mxu0 %v1067_v2 }
 0x342   :  { %948 = vmatpush3.bf16.msra.mxu0 %v999_v61 }
 0x343   :  { %949 = vmatprep.subr.bf16.mxu0 %v1067_v2 }
 0x346   :  { %950 = vmatpush3.bf16.msra.mxu0 %v1000_v62 }
 0x347   :  { %951 = vmatprep.subr.bf16.mxu0 %v1067_v2 }
 0x34a   :  { %952 = vmatpush3.bf16.msra.mxu0 %v1001_v63 }
 0x34b   :  { %953 = vmatprep.subr.bf16.mxu0 %v1067_v2 }
 0x34e   :  { %954 = vmatpush3.bf16.msra.mxu0 %v1002_v23 }
 0x404   :  { %v562_v28 = vpop.f32.mrb[12].mxu0  ;;  %v603_v29 = vpop.f32.mrb[12].mxu1 }
 0x405   :  { %v611_v31 = vadd.f32 %v802_v25, %v562_v28  ;;  %v564_v32 = vpop.f32.mrb[13].mxu0  ;;  %v937_v33 = vpop.f32.mrb[13].mxu1  ;;  %v628_v44 = vadd.f32 %v1304_v45, %v603_v29 }
 0x406   :  { %v566_v0 = vpop.f32.mrb[14].mxu0  ;;  %v606_v34 = vpop.f32.mrb[14].mxu1  ;;  %v621_v38 = vadd.f32 %v619_v30, %v564_v32 }
 0x407   :  { %v803_v35 = vmul.f32 -1.442695, %v611_v31  ;;  %v567_v36 = vpop.f32.mrb[15].mxu0  ;;  %v938_v37 = vpop.f32.mrb[15].mxu1 }
 0x408   :  { %v804_v39 = vmul.f32 -1.442695, %v621_v38 }
 0x409   :  { %1033 = vpow2.f32 %v803_v35 }
 0x40a   :  { %1035 = vpow2.f32 %v804_v39 }
 0x413   :  { %v1034_v2 = vpop.eup %1033 }
 0x414   :  { %v615_v40 = vadd.f32 1.0, %v1034_v2  ;;  %v1036_v41 = vpop.eup %1035 }
 0x415   :  { %v625_v42 = vadd.f32 1.0, %v1036_v41 }
 0x416   :  { %1037 = vrcp.f32 %v615_v40 }
 0x417   :  { %1039 = vrcp.f32 %v625_v42 }
 0x420   :  { %v1038_v46 = vpop.eup %1037 }
 0x421   :  { %v629_v47 = vmul.f32 %v1038_v46, %v628_v44  ;;  %v1040_v49 = vpop.eup %1039 }
 0x422   :  { %v634_v50 = vsub.f32 1.0, %v1040_v49  ;;  %v636_v4 = vmul.f32 %v1040_v49, %v526_v55 }
 0x423   :  { %v632_v48 = vadd.f32 %v630_v43, %v629_v47 }
 0x425   :  { %1041 = vtanh.f32 %v632_v48 }
 0x42f   :  { %v1042_v1 = vpop.eup %1041 }
 0x430   :  { %v635_v3 = vmul.f32 %v1042_v1, %v634_v50 }
 0x432   :  { %v637_v5 = vadd.f32 %v636_v4, %v635_v3 }
 0x434   :  { %638 = vst [vmem:[#allocation2] sm:$0x3] %v637_v5  ;;  %v642_v6 = vpack.c.bf16 %v637_v5, %v637_v5 }
 0x436   :  { %956 = vmatmul.mubr.bf16.vlgmr.msra.gmra.mrb[16].mxu0 %v642_v6 }
 0x509   :  { %v748_v45 = vpop.f32.mrb[16].mxu0 }
 0x50a   :  { %v749_v8 = vadd.f32 %v805_v7, %v748_v45  ;;  %v957_v9 = vpop.f32.mrb[17].mxu0 }
 0x50b   :  { %v751_v10 = vpop.f32.mrb[18].mxu0 }
 0x50c   :  { %754 = vst [vmem:[#allocation3] sm:$0x3] %v749_v8  ;;  %v958_v11 = vpop.f32.mrb[19].mxu0 }
 0x50d   :  { %1054 = shalt.err (!%p1051_p4)
}
 0x50e   :  { %s1055_s4 = scalar_lea.hbm %s1452_s5, 32 }
 0x50f   :  { %p1056_p5 = scmp.ne.s32.totalorder %s1452_s5, %s1055_s4  ;;  %p1059_p6 = scmp.lt.u32.totalorder %s1055_s4, %s1452_s5 }
 0x511   :  { %p1061_p7 = pnand %p1059_p6, %p1056_p5 }
 0x513   :  { %1064 = shalt.err (!%p1061_p7)
}
 0x514   :  { %764 = dma.vmem_to_hbm [thread:$0]  %s762_s1, 32, %s1452_s5, [#allocation4]  }
 0x515   :  { %1065 = dma.done.wait [#allocation4], 32  }
 0x516   :  { %1066 = vsyncadd [#allocation4], 4294967264 }
 0x517   :  { %768 = vsyncpa [#allocation4], 1 }

// kernel: vis_mlp_gru_forward.2
= control target key start
LH: loop header
LB: loop body
LE: loop exit
PB: predicated region body
PF: predicated region fallthrough
CT: control target
= control target key end

     0   :  { %vm8009_vm0 = vcmask 228352   ;;  %vm8013_vm1 = vcmask 1045504   ;;  %s17434_s1 = inlined_call_operand.vmem [shape: bf16[6300,384], index: 1, kind: input, shape index: {}]   ;;  %s17435_s0 = inlined_call_operand.vmem [shape: f32[8,6300], index: 0, kind: input, shape index: {}]   ;;  %s17436_s2 = inlined_call_operand.vmem [shape: f32[1,384], index: 2, kind: input, shape index: {}]   ;;  %s17437_s3 = inlined_call_operand.vmem [shape: f32[8,384], index: 3, kind: output, shape index: {}]  }
   0x1   :  { %v11865_v0 = vld [vmem:[%s17434_s1 + $0x4] ss:$12 sps:$4 sm:$0xff]   ;;  %v11869_v2 = vld [vmem:[%s17434_s1] ss:$12 sps:$4 sm:$0xff]   ;;  %v11871_v4 = vld [vmem:[%s17434_s1 + $0x1c] ss:$12 sps:$4 sm:$0xff]  }
   0x2   :  { %v11867_v1 = vld [vmem:[%s17434_s1 + $0x904] ss:$12 sps:$4 sm:$0xff]   ;;  %8023 = vmatprep.subr.bf16.mxu1 %v11865_v0  ;;  %v11870_v3 = vld [vmem:[%s17434_s1 + $0x900] ss:$12 sps:$4 sm:$0xff]   ;;  %v11873_v5 = vld [vmem:[%s17434_s1 + $0x91c] ss:$12 sps:$4 sm:$0xff]  }
   0x3   :  { %8269 = vmatprep.subr.bf16.mxu0 %v11867_v1  ;;  %8024 = vmatpush1.bf16.msra.mxu1 %v11869_v2  ;;  %v11875_v6 = vld [vmem:[%s17434_s1 + $0x18] ss:$12 sps:$4 sm:$0xff]   ;;  %v11877_v8 = vld [vmem:[%s17434_s1 + $0x34] ss:$12 sps:$4 sm:$0xff]   ;;  %v11881_v10 = vld [vmem:[%s17434_s1 + $0x30] ss:$12 sps:$4 sm:$0xff]  }
   0x4   :  { %8270 = vmatpush1.bf16.msra.mxu0 %v11870_v3  ;;  %8025 = vmatprep.subr.bf16.mxu1 %v11871_v4  ;;  %v11876_v7 = vld [vmem:[%s17434_s1 + $0x918] ss:$12 sps:$4 sm:$0xff]   ;;  %v11879_v9 = vld [vmem:[%s17434_s1 + $0x934] ss:$12 sps:$4 sm:$0xff]   ;;  %v11882_v11 = vld [vmem:[%s17434_s1 + $0x930] ss:$12 sps:$4 sm:$0xff]  }
   0x5   :  { %8271 = vmatprep.subr.bf16.mxu0 %v11873_v5  ;;  %v11883_v12 = vld [vmem:[%s17434_s1 + $0x4c] ss:$12 sps:$4 sm:$0xff]   ;;  %v11887_v14 = vld [vmem:[%s17434_s1 + $0x48] ss:$12 sps:$4 sm:$0xff]   ;;  %v11889_v16 = vld [vmem:[%s17434_s1 + $0x64] ss:$12 sps:$4 sm:$0xff]  }
   0x6   :  { %v11885_v13 = vld [vmem:[%s17434_s1 + $0x94c] ss:$12 sps:$4 sm:$0xff]   ;;  %v11888_v15 = vld [vmem:[%s17434_s1 + $0x948] ss:$12 sps:$4 sm:$0xff]   ;;  %v11891_v17 = vld [vmem:[%s17434_s1 + $0x964] ss:$12 sps:$4 sm:$0xff]  }
   0x7   :  { %8026 = vmatpush1.bf16.msra.mxu1 %v11875_v6  ;;  %v11893_v18 = vld [vmem:[%s17434_s1 + $0x60] ss:$12 sps:$4 sm:$0xff]   ;;  %v11895_v20 = vld [vmem:[%s17434_s1 + $0x7c] ss:$12 sps:$4 sm:$0xff]   ;;  %v11899_v22 = vld [vmem:[%s17434_s1 + $0x78] ss:$12 sps:$4 sm:$0xff]  }
   0x8   :  { %8272 = vmatpush1.bf16.msra.mxu0 %v11876_v7  ;;  %8027 = vmatprep.subr.bf16.mxu1 %v11877_v8  ;;  %v11894_v19 = vld [vmem:[%s17434_s1 + $0x960] ss:$12 sps:$4 sm:$0xff]   ;;  %v11897_v21 = vld [vmem:[%s17434_s1 + $0x97c] ss:$12 sps:$4 sm:$0xff]   ;;  %v11900_v23 = vld [vmem:[%s17434_s1 + $0x978] ss:$12 sps:$4 sm:$0xff]  }
   0x9   :  { %8273 = vmatprep.subr.bf16.mxu0 %v11879_v9  ;;  %v11901_v24 = vld [vmem:[%s17434_s1 + $0x94] ss:$12 sps:$4 sm:$0xff]   ;;  %v11905_v26 = vld [vmem:[%s17434_s1 + $0x90] ss:$12 sps:$4 sm:$0xff]   ;;  %v11907_v28 = vld [vmem:[%s17434_s1 + $0xac] ss:$12 sps:$4 sm:$0xff]  }
   0xa   :  { %v11903_v25 = vld [vmem:[%s17434_s1 + $0x994] ss:$12 sps:$4 sm:$0xff]   ;;  %v11906_v27 = vld [vmem:[%s17434_s1 + $0x990] ss:$12 sps:$4 sm:$0xff]   ;;  %v11909_v29 = vld [vmem:[%s17434_s1 + $0x9ac] ss:$12 sps:$4 sm:$0xff]  }
   0xb   :  { %8028 = vmatpush1.bf16.msra.mxu1 %v11881_v10  ;;  %v11911_v30 = vld [vmem:[%s17434_s1 + $0xa8] ss:$12 sps:$4 sm:$0xff]   ;;  %v11913_v32 = vld [vmem:[%s17434_s1 + $0xc4] ss:$12 sps:$4 sm:$0xff]   ;;  %v11917_v34 = vld [vmem:[%s17434_s1 + $0xc0] ss:$12 sps:$4 sm:$0xff]  }
   0xc   :  { %8274 = vmatpush1.bf16.msra.mxu0 %v11882_v11  ;;  %8029 = vmatprep.subr.bf16.mxu1 %v11883_v12  ;;  %v11912_v31 = vld [vmem:[%s17434_s1 + $0x9a8] ss:$12 sps:$4 sm:$0xff]   ;;  %v11915_v33 = vld [vmem:[%s17434_s1 + $0x9c4] ss:$12 sps:$4 sm:$0xff]   ;;  %v11918_v35 = vld [vmem:[%s17434_s1 + $0x9c0] ss:$12 sps:$4 sm:$0xff]  }
   0xd   :  { %8275 = vmatprep.subr.bf16.mxu0 %v11885_v13  ;;  %v11919_v36 = vld [vmem:[%s17434_s1 + $0xdc] ss:$12 sps:$4 sm:$0xff]   ;;  %v11923_v38 = vld [vmem:[%s17434_s1 + $0xd8] ss:$12 sps:$4 sm:$0xff]   ;;  %v11925_v40 = vld [vmem:[%s17434_s1 + $0xf4] ss:$12 sps:$4 sm:$0xff]  }
   0xe   :  { %v11921_v37 = vld [vmem:[%s17434_s1 + $0x9dc] ss:$12 sps:$4 sm:$0xff]   ;;  %v11924_v39 = vld [vmem:[%s17434_s1 + $0x9d8] ss:$12 sps:$4 sm:$0xff]   ;;  %v11927_v41 = vld [vmem:[%s17434_s1 + $0x9f4] ss:$12 sps:$4 sm:$0xff]  }
   0xf   :  { %8030 = vmatpush1.bf16.msra.mxu1 %v11887_v14  ;;  %v11929_v42 = vld [vmem:[%s17434_s1 + $0xf0] ss:$12 sps:$4 sm:$0xff]   ;;  %v11931_v44 = vld [vmem:[%s17434_s1 + $0x10c] ss:$12 sps:$4 sm:$0xff]   ;;  %v11935_v47 = vld [vmem:[%s17434_s1 + $0x108] ss:$12 sps:$4 sm:$0xff]  }
  0x10   :  { %8276 = vmatpush1.bf16.msra.mxu0 %v11888_v15  ;;  %8031 = vmatprep.subr.bf16.mxu1 %v11889_v16  ;;  %v11930_v43 = vld [vmem:[%s17434_s1 + $0x9f0] ss:$12 sps:$4 sm:$0xff]   ;;  %v11933_v45 = vld [vmem:[%s17434_s1 + $0xa0c] ss:$12 sps:$4 sm:$0xff]   ;;  %v11936_v49 = vld [vmem:[%s17434_s1 + $0xa08] ss:$12 sps:$4 sm:$0xff]  }
  0x11   :  { %8277 = vmatprep.subr.bf16.mxu0 %v11891_v17  ;;  %v16_v46 = vld [vmem:[%s17435_s0 + $0x8] sm:$0xff]  ;;  %v11937_v51 = vld [vmem:[%s17434_s1 + $0x124] ss:$12 sps:$4 sm:$0xff]   ;;  %v11949_v60 = vld [vmem:[%s17434_s1 + $0x154] ss:$12 sps:$4 sm:$0xff]  }
  0x12   :  { %v13607_v48 = vpack.c.bf16 %v16_v46, %v16_v46  ;;  %v28_v50 = vld [vmem:[%s17435_s0 + $0x68] sm:$0xff]  ;;  %v11939_v52 = vld [vmem:[%s17434_s1 + $0xa24] ss:$12 sps:$4 sm:$0xff]   ;;  %v11951_v61 = vld [vmem:[%s17434_s1 + $0xa54] ss:$12 sps:$4 sm:$0xff]  }
  0x13   :  { %8032 = vmatpush1.bf16.msra.mxu1 %v11893_v18  ;;  %v13621_v53 = vpack.c.bf16 %v28_v50, %v28_v50  ;;  %v11941_v54 = vld [vmem:[%s17434_s1 + $0x120] ss:$12 sps:$4 sm:$0xff]   ;;  %v11943_v56 = vld [vmem:[%s17434_s1 + $0x13c] ss:$12 sps:$4 sm:$0xff]   ;;  %v11947_v58 = vld [vmem:[%s17434_s1 + $0x138] ss:$12 sps:$4 sm:$0xff]  }
  0x14   :  { %8278 = vmatpush1.bf16.msra.mxu0 %v11894_v19  ;;  %8033 = vmatprep.subr.bf16.mxu1 %v11895_v20  ;;  %v11942_v55 = vld [vmem:[%s17434_s1 + $0xa20] ss:$12 sps:$4 sm:$0xff]   ;;  %v11945_v57 = vld [vmem:[%s17434_s1 + $0xa3c] ss:$12 sps:$4 sm:$0xff]   ;;  %v11948_v59 = vld [vmem:[%s17434_s1 + $0xa38] ss:$12 sps:$4 sm:$0xff]  }
  0x15   :  { %8279 = vmatprep.subr.bf16.mxu0 %v11897_v21  ;;  %8055 = vmatprep.mubr.bf16.mxu1 %v13607_v48  ;;  %v11953_v62 = vld [vmem:[%s17434_s1 + $0x150] ss:$12 sps:$4 sm:$0xff]   ;;  %v11955_v0 = vld [vmem:[%s17434_s1 + $0x16c] ss:$12 sps:$4 sm:$0xff]   ;;  %v11959_v2 = vld [vmem:[%s17434_s1 + $0x168] ss:$12 sps:$4 sm:$0xff]  }
  0x16   :  { %8301 = vmatprep.mubr.bf16.mxu0 %v13621_v53  ;;  %v11954_v63 = vld [vmem:[%s17434_s1 + $0xa50] ss:$12 sps:$4 sm:$0xff]   ;;  %v11957_v1 = vld [vmem:[%s17434_s1 + $0xa6c] ss:$12 sps:$4 sm:$0xff]   ;;  %v11960_v3 = vld [vmem:[%s17434_s1 + $0xa68] ss:$12 sps:$4 sm:$0xff]  }
  0x17   :  { %8034 = vmatpush1.bf16.msra.mxu1 %v11899_v22  ;;  %v11963_v4 = vld [vmem:[%s17434_s1 + $0x184] ss:$12 sps:$4 sm:$0xff]   ;;  %v11961_v8 = vld [vmem:[%s17434_s1 + $0x180] ss:$12 sps:$4 sm:$0xff]   ;;  %v11969_v12 = vld [vmem:[%s17434_s1 + $0x19c] ss:$12 sps:$4 sm:$0xff]  }
  0x18   :  { %8280 = vmatpush1.bf16.msra.mxu0 %v11900_v23  ;;  %8035 = vmatprep.subr.bf16.mxu1 %v11901_v24  ;;  %v15_v5 = vld [vmem:[%s17435_s0] sm:$0xff]  ;;  %v11972_v13 = vld [vmem:[%s17434_s1 + $0xa9c] ss:$12 sps:$4 sm:$0xff]   ;;  %v11981_v20 = vld [vmem:[%s17434_s1 + $0x1cc] ss:$12 sps:$4 sm:$0xff]  }
  0x19   :  { %8281 = vmatprep.subr.bf16.mxu0 %v11903_v25  ;;  %v27_v6 = vld [vmem:[%s17435_s0 + $0x60] sm:$0xff]  ;;  %v13685_v10 = vpack.c.bf16 %v15_v5, %v15_v5  ;;  %v11973_v18 = vld [vmem:[%s17434_s1 + $0x1b0] ss:$12 sps:$4 sm:$0xff]   ;;  %v11984_v21 = vld [vmem:[%s17434_s1 + $0xacc] ss:$12 sps:$4 sm:$0xff]  }
  0x1a   :  { %v11966_v7 = vld [vmem:[%s17434_s1 + $0xa84] ss:$12 sps:$4 sm:$0xff]   ;;  %v11964_v9 = vld [vmem:[%s17434_s1 + $0xa80] ss:$12 sps:$4 sm:$0xff]   ;;  %v13687_v11 = vpack.c.bf16 %v27_v6, %v27_v6  ;;  %v11979_v22 = vld [vmem:[%s17434_s1 + $0x1c8] ss:$12 sps:$4 sm:$0xff]  }
  0x1b   :  { %8036 = vmatpush1.bf16.msra.mxu1 %v11905_v26  ;;  %v11967_v14 = vld [vmem:[%s17434_s1 + $0x198] ss:$12 sps:$4 sm:$0xff]   ;;  %v11975_v16 = vld [vmem:[%s17434_s1 + $0x1b4] ss:$12 sps:$4 sm:$0xff]   ;;  %v11976_v19 = vld [vmem:[%s17434_s1 + $0xab0] ss:$12 sps:$4 sm:$0xff]  }
  0x1c   :  { %8282 = vmatpush1.bf16.msra.mxu0 %v11906_v27  ;;  %8037 = vmatprep.subr.bf16.mxu1 %v11907_v28  ;;  %v11970_v15 = vld [vmem:[%s17434_s1 + $0xa98] ss:$12 sps:$4 sm:$0xff]   ;;  %v11978_v17 = vld [vmem:[%s17434_s1 + $0xab4] ss:$12 sps:$4 sm:$0xff]   ;;  %v11993_v28 = vld [vmem:[%s17434_s1 + $0x1fc] ss:$12 sps:$4 sm:$0xff]  }
  0x1d   :  { %8283 = vmatprep.subr.bf16.mxu0 %v11909_v29  ;;  %v11982_v23 = vld [vmem:[%s17434_s1 + $0xac8] ss:$12 sps:$4 sm:$0xff]   ;;  %v11987_v24 = vld [vmem:[%s17434_s1 + $0x1e4] ss:$12 sps:$4 sm:$0xff]   ;;  %v11985_v26 = vld [vmem:[%s17434_s1 + $0x1e0] ss:$12 sps:$4 sm:$0xff]  }
  0x1e   :  { %v11990_v25 = vld [vmem:[%s17434_s1 + $0xae4] ss:$12 sps:$4 sm:$0xff]   ;;  %v11988_v27 = vld [vmem:[%s17434_s1 + $0xae0] ss:$12 sps:$4 sm:$0xff]   ;;  %v11996_v29 = vld [vmem:[%s17434_s1 + $0xafc] ss:$12 sps:$4 sm:$0xff]  }
  0x1f   :  { %8038 = vmatpush1.bf16.msra.mxu1 %v11911_v30  ;;  %v11991_v30 = vld [vmem:[%s17434_s1 + $0x1f8] ss:$12 sps:$4 sm:$0xff]   ;;  %v12009_v46 = vld [vmem:[%s17434_s1 + $0x240] ss:$12 sps:$4 sm:$0xff]   ;;  %v12020_v50 = vld [vmem:[%s17434_s1 + $0xb5c] ss:$12 sps:$4 sm:$0xff]  }
  0x20   :  { %8284 = vmatpush1.bf16.msra.mxu0 %v11912_v31  ;;  %8039 = vmatprep.subr.bf16.mxu1 %v11913_v32  ;;  %v11994_v31 = vld [vmem:[%s17434_s1 + $0xaf8] ss:$12 sps:$4 sm:$0xff]   ;;  %v11999_v32 = vld [vmem:[%s17434_s1 + $0x214] ss:$12 sps:$4 sm:$0xff]  }
  0x21   :  { %8285 = vmatprep.subr.bf16.mxu0 %v11915_v33  ;;  %v12002_v33 = vld [vmem:[%s17434_s1 + $0xb14] ss:$12 sps:$4 sm:$0xff]   ;;  %v12042_v5 = vld [vmem:[%s17434_s1 + $0xbb8] ss:$12 sps:$4 sm:$0xff]  }
  0x22   :  { %v12047_v6 = vld [vmem:[%s17434_s1 + $0x2d4] ss:$12 sps:$4 sm:$0xff]  }
  0x23   :  { %8040 = vmatpush1.bf16.msra.mxu1 %v11917_v34  ;;  %v18_v34 = vld [vmem:[%s17435_s0 + $0x18] sm:$0xff] }
  0x24   :  { %8286 = vmatpush1.bf16.msra.mxu0 %v11918_v35  ;;  %8041 = vmatprep.subr.bf16.mxu1 %v11919_v36  ;;  %v11997_v35 = vld [vmem:[%s17434_s1 + $0x210] ss:$12 sps:$4 sm:$0xff]   ;;  %v13763_v36 = vpack.c.bf16 %v18_v34, %v18_v34 }
  0x25   :  { %8287 = vmatprep.subr.bf16.mxu0 %v11921_v37  ;;  %v12000_v37 = vld [vmem:[%s17434_s1 + $0xb10] ss:$12 sps:$4 sm:$0xff]  }
  0x26   :  { %v12069_v34 = vld [vmem:[%s17434_s1 + $0x330] ss:$12 sps:$4 sm:$0xff]  }
  0x27   :  { %8042 = vmatpush1.bf16.msra.mxu1 %v11923_v38  ;;  %v30_v38 = vld [vmem:[%s17435_s0 + $0x78] sm:$0xff] }
  0x28   :  { %8288 = vmatpush1.bf16.msra.mxu0 %v11924_v39  ;;  %8043 = vmatprep.subr.bf16.mxu1 %v11925_v40  ;;  %v12005_v39 = vld [vmem:[%s17434_s1 + $0x22c] ss:$12 sps:$4 sm:$0xff]  }
  0x29   :  { %8289 = vmatprep.subr.bf16.mxu0 %v11927_v41  ;;  %v12008_v40 = vld [vmem:[%s17434_s1 + $0xb2c] ss:$12 sps:$4 sm:$0xff]   ;;  %v13777_v41 = vpack.c.bf16 %v30_v38, %v30_v38 }
  0x2a   :  { %v12080_v38 = vld [vmem:[%s17434_s1 + $0xc4c] ss:$12 sps:$4 sm:$0xff]  }
  0x2b   :  { %8044 = vmatpush1.bf16.msra.mxu1 %v11929_v42  ;;  %v12003_v42 = vld [vmem:[%s17434_s1 + $0x228] ss:$12 sps:$4 sm:$0xff]  }
  0x2c   :  { %8290 = vmatpush1.bf16.msra.mxu0 %v11930_v43  ;;  %8045 = vmatprep.subr.bf16.mxu1 %v11931_v44  ;;  %v12006_v43 = vld [vmem:[%s17434_s1 + $0xb28] ss:$12 sps:$4 sm:$0xff]   ;;  %v12011_v44 = vld [vmem:[%s17434_s1 + $0x244] ss:$12 sps:$4 sm:$0xff]  }
  0x2d   :  { %8291 = vmatprep.subr.bf16.mxu0 %v11933_v45  ;;  %v12014_v45 = vld [vmem:[%s17434_s1 + $0xb44] ss:$12 sps:$4 sm:$0xff]  }
  0x2f   :  { %8046 = vmatpush1.bf16.msra.mxu1 %v11935_v47  ;;  %v12012_v47 = vld [vmem:[%s17434_s1 + $0xb40] ss:$12 sps:$4 sm:$0xff]  }
  0x30   :  { %8292 = vmatpush1.bf16.msra.mxu0 %v11936_v49  ;;  %8047 = vmatprep.subr.bf16.mxu1 %v11937_v51  ;;  %v12017_v49 = vld [vmem:[%s17434_s1 + $0x25c] ss:$12 sps:$4 sm:$0xff]   ;;  %v12015_v51 = vld [vmem:[%s17434_s1 + $0x258] ss:$12 sps:$4 sm:$0xff]  }
  0x31   :  { %8293 = vmatprep.subr.bf16.mxu0 %v11939_v52  ;;  %v12018_v52 = vld [vmem:[%s17434_s1 + $0xb58] ss:$12 sps:$4 sm:$0xff]  }
  0x33   :  { %8048 = vmatpush1.bf16.msra.mxu1 %v11941_v54  ;;  %v12023_v54 = vld [vmem:[%s17434_s1 + $0x274] ss:$12 sps:$4 sm:$0xff]  }
  0x34   :  { %8294 = vmatpush1.bf16.msra.mxu0 %v11942_v55  ;;  %8049 = vmatprep.subr.bf16.mxu1 %v11943_v56  ;;  %v12026_v55 = vld [vmem:[%s17434_s1 + $0xb74] ss:$12 sps:$4 sm:$0xff]   ;;  %v12021_v56 = vld [vmem:[%s17434_s1 + $0x270] ss:$12 sps:$4 sm:$0xff]  }
  0x35   :  { %8295 = vmatprep.subr.bf16.mxu0 %v11945_v57  ;;  %v12024_v57 = vld [vmem:[%s17434_s1 + $0xb70] ss:$12 sps:$4 sm:$0xff]  }
  0x37   :  { %8050 = vmatpush1.bf16.msra.mxu1 %v11947_v58  ;;  %v12029_v58 = vld [vmem:[%s17434_s1 + $0x28c] ss:$12 sps:$4 sm:$0xff]  }
  0x38   :  { %8296 = vmatpush1.bf16.msra.mxu0 %v11948_v59  ;;  %8051 = vmatprep.subr.bf16.mxu1 %v11949_v60  ;;  %v12032_v59 = vld [vmem:[%s17434_s1 + $0xb8c] ss:$12 sps:$4 sm:$0xff]   ;;  %v12027_v60 = vld [vmem:[%s17434_s1 + $0x288] ss:$12 sps:$4 sm:$0xff]  }
  0x39   :  { %8297 = vmatprep.subr.bf16.mxu0 %v11951_v61  ;;  %v12030_v61 = vld [vmem:[%s17434_s1 + $0xb88] ss:$12 sps:$4 sm:$0xff]  }
  0x3b   :  { %8052 = vmatpush1.bf16.msra.mxu1 %v11953_v62  ;;  %v12035_v62 = vld [vmem:[%s17434_s1 + $0x2a4] ss:$12 sps:$4 sm:$0xff]  }
  0x3c   :  { %8298 = vmatpush1.bf16.msra.mxu0 %v11954_v63  ;;  %8053 = vmatprep.subr.bf16.mxu1 %v11955_v0  ;;  %v12038_v63 = vld [vmem:[%s17434_s1 + $0xba4] ss:$12 sps:$4 sm:$0xff]   ;;  %v12033_v0 = vld [vmem:[%s17434_s1 + $0x2a0] ss:$12 sps:$4 sm:$0xff]  }
  0x3d   :  { %8299 = vmatprep.subr.bf16.mxu0 %v11957_v1  ;;  %v12036_v1 = vld [vmem:[%s17434_s1 + $0xba0] ss:$12 sps:$4 sm:$0xff]  }
  0x3f   :  { %8054 = vmatpush1.bf16.msra.mxu1 %v11959_v2  ;;  %v12041_v2 = vld [vmem:[%s17434_s1 + $0x2bc] ss:$12 sps:$4 sm:$0xff]  }
  0x40   :  { %8300 = vmatpush1.bf16.msra.mxu0 %v11960_v3  ;;  %8064 = vmatprep.subr.bf16.mxu1 %v11963_v4  ;;  %v12044_v3 = vld [vmem:[%s17434_s1 + $0xbbc] ss:$12 sps:$4 sm:$0xff]   ;;  %v12039_v4 = vld [vmem:[%s17434_s1 + $0x2b8] ss:$12 sps:$4 sm:$0xff]  }
  0x41   :  { %8310 = vmatprep.subr.bf16.mxu0 %v11966_v7  ;;  %v12050_v7 = vld [vmem:[%s17434_s1 + $0xbd4] ss:$12 sps:$4 sm:$0xff]  }
  0x42   :  { %8056 = vmatmul.mubr.bf16.vlgmr.msra.gmra.mrb[0].mxu1 %v13685_v10 }
  0x43   :  { %8302 = vmatmul.mubr.bf16.vlgmr.msra.gmra.mrb[0].mxu0 %v13687_v11  ;;  %8065 = vmatpush1.bf16.msra.mxu1 %v11961_v8  ;;  %v12045_v8 = vld [vmem:[%s17434_s1 + $0x2d0] ss:$12 sps:$4 sm:$0xff]  }
  0x44   :  { %8311 = vmatpush1.bf16.msra.mxu0 %v11964_v9  ;;  %8066 = vmatprep.subr.bf16.mxu1 %v11969_v12  ;;  %v12048_v9 = vld [vmem:[%s17434_s1 + $0xbd0] ss:$12 sps:$4 sm:$0xff]   ;;  %v12053_v12 = vld [vmem:[%s17434_s1 + $0x2ec] ss:$12 sps:$4 sm:$0xff]  }
  0x45   :  { %8312 = vmatprep.subr.bf16.mxu0 %v11972_v13  ;;  %8096 = vmatprep.mubr.bf16.mxu1 %v13763_v36  ;;  %v12056_v13 = vld [vmem:[%s17434_s1 + $0xbec] ss:$12 sps:$4 sm:$0xff]  }
  0x46   :  { %8342 = vmatprep.mubr.bf16.mxu0 %v13777_v41 }
  0x47   :  { %8067 = vmatpush1.bf16.msra.mxu1 %v11967_v14  ;;  %v12051_v14 = vld [vmem:[%s17434_s1 + $0x2e8] ss:$12 sps:$4 sm:$0xff]  }
  0x48   :  { %8313 = vmatpush1.bf16.msra.mxu0 %v11970_v15  ;;  %8068 = vmatprep.subr.bf16.mxu1 %v11975_v16  ;;  %v12054_v15 = vld [vmem:[%s17434_s1 + $0xbe8] ss:$12 sps:$4 sm:$0xff]   ;;  %v12059_v16 = vld [vmem:[%s17434_s1 + $0x304] ss:$12 sps:$4 sm:$0xff]  }
  0x49   :  { %8314 = vmatprep.subr.bf16.mxu0 %v11978_v17  ;;  %v17_v17 = vld [vmem:[%s17435_s0 + $0x10] sm:$0xff] }
  0x4b   :  { %8069 = vmatpush1.bf16.msra.mxu1 %v11973_v18  ;;  %v29_v18 = vld [vmem:[%s17435_s0 + $0x70] sm:$0xff] }
  0x4c   :  { %8315 = vmatpush1.bf16.msra.mxu0 %v11976_v19  ;;  %8070 = vmatprep.subr.bf16.mxu1 %v11981_v20  ;;  %v12062_v19 = vld [vmem:[%s17434_s1 + $0xc04] ss:$12 sps:$4 sm:$0xff]   ;;  %v12057_v20 = vld [vmem:[%s17434_s1 + $0x300] ss:$12 sps:$4 sm:$0xff]  }
  0x4d   :  { %8316 = vmatprep.subr.bf16.mxu0 %v11984_v21  ;;  %v12060_v21 = vld [vmem:[%s17434_s1 + $0xc00] ss:$12 sps:$4 sm:$0xff]  }
  0x4f   :  { %8071 = vmatpush1.bf16.msra.mxu1 %v11979_v22  ;;  %v13901_v22 = vpack.c.bf16 %v17_v17, %v17_v17  ;;  %v12132_v17 = vld [vmem:[%s17434_s1 + $0xd20] ss:$12 sps:$4 sm:$0xff]  }
  0x50   :  { %8317 = vmatpush1.bf16.msra.mxu0 %v11982_v23  ;;  %8072 = vmatprep.subr.bf16.mxu1 %v11987_v24  ;;  %v13903_v23 = vpack.c.bf16 %v29_v18, %v29_v18  ;;  %v12065_v24 = vld [vmem:[%s17434_s1 + $0x31c] ss:$12 sps:$4 sm:$0xff]  }
  0x51   :  { %8318 = vmatprep.subr.bf16.mxu0 %v11990_v25  ;;  %v12068_v25 = vld [vmem:[%s17434_s1 + $0xc1c] ss:$12 sps:$4 sm:$0xff]  }
  0x52   :  { %v12137_v18 = vld [vmem:[%s17434_s1 + $0x43c] ss:$12 sps:$4 sm:$0xff]  }
  0x53   :  { %8073 = vmatpush1.bf16.msra.mxu1 %v11985_v26  ;;  %v20_v26 = vld [vmem:[%s17435_s0 + $0x28] sm:$0xff] }
  0x54   :  { %8319 = vmatpush1.bf16.msra.mxu0 %v11988_v27  ;;  %8074 = vmatprep.subr.bf16.mxu1 %v11993_v28  ;;  %v12063_v27 = vld [vmem:[%s17434_s1 + $0x318] ss:$12 sps:$4 sm:$0xff]   ;;  %v13919_v28 = vpack.c.bf16 %v20_v26, %v20_v26  ;;  %v12141_v26 = vld [vmem:[%s17434_s1 + $0x450] ss:$12 sps:$4 sm:$0xff]  }
  0x55   :  { %8320 = vmatprep.subr.bf16.mxu0 %v11996_v29  ;;  %v12066_v29 = vld [vmem:[%s17434_s1 + $0xc18] ss:$12 sps:$4 sm:$0xff]  }
  0x57   :  { %8075 = vmatpush1.bf16.msra.mxu1 %v11991_v30  ;;  %v32_v30 = vld [vmem:[%s17435_s0 + $0x88] sm:$0xff] }
  0x58   :  { %8321 = vmatpush1.bf16.msra.mxu0 %v11994_v31  ;;  %8076 = vmatprep.subr.bf16.mxu1 %v11999_v32  ;;  %v12071_v31 = vld [vmem:[%s17434_s1 + $0x334] ss:$12 sps:$4 sm:$0xff]  }
  0x59   :  { %8322 = vmatprep.subr.bf16.mxu0 %v12002_v33  ;;  %v12074_v32 = vld [vmem:[%s17434_s1 + $0xc34] ss:$12 sps:$4 sm:$0xff]   ;;  %v13933_v33 = vpack.c.bf16 %v32_v30, %v32_v30  ;;  %v12152_v30 = vld [vmem:[%s17434_s1 + $0xd6c] ss:$12 sps:$4 sm:$0xff]  }
  0x5b   :  { %8077 = vmatpush1.bf16.msra.mxu1 %v11997_v35  ;;  %v12072_v35 = vld [vmem:[%s17434_s1 + $0xc30] ss:$12 sps:$4 sm:$0xff]  }
  0x5c   :  { %8323 = vmatpush1.bf16.msra.mxu0 %v12000_v37  ;;  %8078 = vmatprep.subr.bf16.mxu1 %v12005_v39  ;;  %v12077_v37 = vld [vmem:[%s17434_s1 + $0x34c] ss:$12 sps:$4 sm:$0xff]   ;;  %v12075_v39 = vld [vmem:[%s17434_s1 + $0x348] ss:$12 sps:$4 sm:$0xff]  }
  0x5d   :  { %8324 = vmatprep.subr.bf16.mxu0 %v12008_v40  ;;  %v12078_v40 = vld [vmem:[%s17434_s1 + $0xc48] ss:$12 sps:$4 sm:$0xff]  }
  0x5f   :  { %8079 = vmatpush1.bf16.msra.mxu1 %v12003_v42  ;;  %v12083_v42 = vld [vmem:[%s17434_s1 + $0x364] ss:$12 sps:$4 sm:$0xff]  }
  0x60   :  { %8325 = vmatpush1.bf16.msra.mxu0 %v12006_v43  ;;  %8080 = vmatprep.subr.bf16.mxu1 %v12011_v44  ;;  %v12086_v43 = vld [vmem:[%s17434_s1 + $0xc64] ss:$12 sps:$4 sm:$0xff]   ;;  %v12081_v44 = vld [vmem:[%s17434_s1 + $0x360] ss:$12 sps:$4 sm:$0xff]  }
  0x61   :  { %8326 = vmatprep.subr.bf16.mxu0 %v12014_v45  ;;  %v12084_v45 = vld [vmem:[%s17434_s1 + $0xc60] ss:$12 sps:$4 sm:$0xff]  }
  0x63   :  { %8081 = vmatpush1.bf16.msra.mxu1 %v12009_v46  ;;  %v12089_v46 = vld [vmem:[%s17434_s1 + $0x37c] ss:$12 sps:$4 sm:$0xff]  }
  0x64   :  { %8327 = vmatpush1.bf16.msra.mxu0 %v12012_v47  ;;  %8082 = vmatprep.subr.bf16.mxu1 %v12017_v49  ;;  %v12092_v47 = vld [vmem:[%s17434_s1 + $0xc7c] ss:$12 sps:$4 sm:$0xff]   ;;  %v12087_v49 = vld [vmem:[%s17434_s1 + $0x378] ss:$12 sps:$4 sm:$0xff]  }
  0x65   :  { %8328 = vmatprep.subr.bf16.mxu0 %v12020_v50  ;;  %v12090_v50 = vld [vmem:[%s17434_s1 + $0xc78] ss:$12 sps:$4 sm:$0xff]  }
  0x67   :  { %8083 = vmatpush1.bf16.msra.mxu1 %v12015_v51  ;;  %v12095_v51 = vld [vmem:[%s17434_s1 + $0x394] ss:$12 sps:$4 sm:$0xff]  }
  0x68   :  { %8329 = vmatpush1.bf16.msra.mxu0 %v12018_v52  ;;  %8084 = vmatprep.subr.bf16.mxu1 %v12023_v54  ;;  %v12098_v52 = vld [vmem:[%s17434_s1 + $0xc94] ss:$12 sps:$4 sm:$0xff]   ;;  %v12093_v54 = vld [vmem:[%s17434_s1 + $0x390] ss:$12 sps:$4 sm:$0xff]  }
  0x69   :  { %8330 = vmatprep.subr.bf16.mxu0 %v12026_v55  ;;  %v12096_v55 = vld [vmem:[%s17434_s1 + $0xc90] ss:$12 sps:$4 sm:$0xff]  }
  0x6b   :  { %8085 = vmatpush1.bf16.msra.mxu1 %v12021_v56  ;;  %v12101_v56 = vld [vmem:[%s17434_s1 + $0x3ac] ss:$12 sps:$4 sm:$0xff]  }
  0x6c   :  { %8331 = vmatpush1.bf16.msra.mxu0 %v12024_v57  ;;  %8086 = vmatprep.subr.bf16.mxu1 %v12029_v58  ;;  %v12104_v57 = vld [vmem:[%s17434_s1 + $0xcac] ss:$12 sps:$4 sm:$0xff]   ;;  %v12099_v58 = vld [vmem:[%s17434_s1 + $0x3a8] ss:$12 sps:$4 sm:$0xff]  }
  0x6d   :  { %8332 = vmatprep.subr.bf16.mxu0 %v12032_v59  ;;  %v12102_v59 = vld [vmem:[%s17434_s1 + $0xca8] ss:$12 sps:$4 sm:$0xff]  }
  0x6f   :  { %8087 = vmatpush1.bf16.msra.mxu1 %v12027_v60  ;;  %v12107_v60 = vld [vmem:[%s17434_s1 + $0x3c4] ss:$12 sps:$4 sm:$0xff]  }
  0x70   :  { %8333 = vmatpush1.bf16.msra.mxu0 %v12030_v61  ;;  %8088 = vmatprep.subr.bf16.mxu1 %v12035_v62  ;;  %v12110_v61 = vld [vmem:[%s17434_s1 + $0xcc4] ss:$12 sps:$4 sm:$0xff]   ;;  %v12105_v62 = vld [vmem:[%s17434_s1 + $0x3c0] ss:$12 sps:$4 sm:$0xff]  }
  0x71   :  { %8334 = vmatprep.subr.bf16.mxu0 %v12038_v63  ;;  %v12108_v63 = vld [vmem:[%s17434_s1 + $0xcc0] ss:$12 sps:$4 sm:$0xff]  }
  0x73   :  { %8089 = vmatpush1.bf16.msra.mxu1 %v12033_v0  ;;  %v12113_v0 = vld [vmem:[%s17434_s1 + $0x3dc] ss:$12 sps:$4 sm:$0xff]  }
  0x74   :  { %8335 = vmatpush1.bf16.msra.mxu0 %v12036_v1  ;;  %8090 = vmatprep.subr.bf16.mxu1 %v12041_v2  ;;  %v12116_v1 = vld [vmem:[%s17434_s1 + $0xcdc] ss:$12 sps:$4 sm:$0xff]   ;;  %v12111_v2 = vld [vmem:[%s17434_s1 + $0x3d8] ss:$12 sps:$4 sm:$0xff]  }
  0x75   :  { %8336 = vmatprep.subr.bf16.mxu0 %v12044_v3  ;;  %v12114_v3 = vld [vmem:[%s17434_s1 + $0xcd8] ss:$12 sps:$4 sm:$0xff]  }
  0x77   :  { %8091 = vmatpush1.bf16.msra.mxu1 %v12039_v4  ;;  %v12119_v4 = vld [vmem:[%s17434_s1 + $0x3f4] ss:$12 sps:$4 sm:$0xff]  }
  0x78   :  { %8337 = vmatpush1.bf16.msra.mxu0 %v12042_v5  ;;  %8092 = vmatprep.subr.bf16.mxu1 %v12047_v6  ;;  %v12122_v5 = vld [vmem:[%s17434_s1 + $0xcf4] ss:$12 sps:$4 sm:$0xff]   ;;  %v12117_v6 = vld [vmem:[%s17434_s1 + $0x3f0] ss:$12 sps:$4 sm:$0xff]  }
  0x79   :  { %8338 = vmatprep.subr.bf16.mxu0 %v12050_v7  ;;  %v12120_v7 = vld [vmem:[%s17434_s1 + $0xcf0] ss:$12 sps:$4 sm:$0xff]  }
  0x7b   :  { %8093 = vmatpush1.bf16.msra.mxu1 %v12045_v8  ;;  %v12125_v8 = vld [vmem:[%s17434_s1 + $0x40c] ss:$12 sps:$4 sm:$0xff]  }
  0x7c   :  { %8339 = vmatpush1.bf16.msra.mxu0 %v12048_v9  ;;  %8094 = vmatprep.subr.bf16.mxu1 %v12053_v12  ;;  %v12128_v9 = vld [vmem:[%s17434_s1 + $0xd0c] ss:$12 sps:$4 sm:$0xff]   ;;  %v12123_v12 = vld [vmem:[%s17434_s1 + $0x408] ss:$12 sps:$4 sm:$0xff]  }
  0x7d   :  { %8340 = vmatprep.subr.bf16.mxu0 %v12056_v13  ;;  %v12126_v13 = vld [vmem:[%s17434_s1 + $0xd08] ss:$12 sps:$4 sm:$0xff]  }
  0x7f   :  { %8095 = vmatpush1.bf16.msra.mxu1 %v12051_v14  ;;  %v12131_v14 = vld [vmem:[%s17434_s1 + $0x424] ss:$12 sps:$4 sm:$0xff]  }
  0x80   :  { %8341 = vmatpush1.bf16.msra.mxu0 %v12054_v15  ;;  %8105 = vmatprep.subr.bf16.mxu1 %v12059_v16  ;;  %v12134_v15 = vld [vmem:[%s17434_s1 + $0xd24] ss:$12 sps:$4 sm:$0xff]   ;;  %v12129_v16 = vld [vmem:[%s17434_s1 + $0x420] ss:$12 sps:$4 sm:$0xff]  }
  0x81   :  { %8351 = vmatprep.subr.bf16.mxu0 %v12062_v19  ;;  %v12140_v19 = vld [vmem:[%s17434_s1 + $0xd3c] ss:$12 sps:$4 sm:$0xff]  }
  0x82   :  { %8097 = vmatmul.mubr.bf16.vlgmr.msra.gmra.mrb[0].mxu1 %v13901_v22 }
  0x83   :  { %8343 = vmatmul.mubr.bf16.vlgmr.msra.gmra.mrb[0].mxu0 %v13903_v23  ;;  %8106 = vmatpush1.bf16.msra.mxu1 %v12057_v20  ;;  %v12135_v20 = vld [vmem:[%s17434_s1 + $0x438] ss:$12 sps:$4 sm:$0xff]  }
  0x84   :  { %8352 = vmatpush1.bf16.msra.mxu0 %v12060_v21  ;;  %8107 = vmatprep.subr.bf16.mxu1 %v12065_v24  ;;  %v12138_v21 = vld [vmem:[%s17434_s1 + $0xd38] ss:$12 sps:$4 sm:$0xff]   ;;  %v12143_v24 = vld [vmem:[%s17434_s1 + $0x454] ss:$12 sps:$4 sm:$0xff]  }
  0x85   :  { %8353 = vmatprep.subr.bf16.mxu0 %v12068_v25  ;;  %8137 = vmatprep.mubr.bf16.mxu1 %v13919_v28  ;;  %v12146_v25 = vld [vmem:[%s17434_s1 + $0xd54] ss:$12 sps:$4 sm:$0xff]  }
  0x86   :  { %8383 = vmatprep.mubr.bf16.mxu0 %v13933_v33 }
  0x87   :  { %8108 = vmatpush1.bf16.msra.mxu1 %v12063_v27  ;;  %v12144_v27 = vld [vmem:[%s17434_s1 + $0xd50] ss:$12 sps:$4 sm:$0xff]  }
  0x88   :  { %8354 = vmatpush1.bf16.msra.mxu0 %v12066_v29  ;;  %8109 = vmatprep.subr.bf16.mxu1 %v12071_v31  ;;  %v12149_v29 = vld [vmem:[%s17434_s1 + $0x46c] ss:$12 sps:$4 sm:$0xff]   ;;  %v12147_v31 = vld [vmem:[%s17434_s1 + $0x468] ss:$12 sps:$4 sm:$0xff]  }
  0x89   :  { %8355 = vmatprep.subr.bf16.mxu0 %v12074_v32  ;;  %v12150_v32 = vld [vmem:[%s17434_s1 + $0xd68] ss:$12 sps:$4 sm:$0xff]  }
  0x8b   :  { %8110 = vmatpush1.bf16.msra.mxu1 %v12069_v34  ;;  %v12155_v34 = vld [vmem:[%s17434_s1 + $0x484] ss:$12 sps:$4 sm:$0xff]  }
  0x8c   :  { %8356 = vmatpush1.bf16.msra.mxu0 %v12072_v35  ;;  %8111 = vmatprep.subr.bf16.mxu1 %v12077_v37  ;;  %v19_v35 = vld [vmem:[%s17435_s0 + $0x20] sm:$0xff] }
  0x8d   :  { %8357 = vmatprep.subr.bf16.mxu0 %v12080_v38  ;;  %v31_v37 = vld [vmem:[%s17435_s0 + $0x80] sm:$0xff] }
  0x8e   :  { %v12158_v38 = vld [vmem:[%s17434_s1 + $0xd84] ss:$12 sps:$4 sm:$0xff]  }
  0x8f   :  { %8112 = vmatpush1.bf16.msra.mxu1 %v12075_v39  ;;  %v12153_v39 = vld [vmem:[%s17434_s1 + $0x480] ss:$12 sps:$4 sm:$0xff]  }
  0x90   :  { %8358 = vmatpush1.bf16.msra.mxu0 %v12078_v40  ;;  %8113 = vmatprep.subr.bf16.mxu1 %v12083_v42  ;;  %v12156_v40 = vld [vmem:[%s17434_s1 + $0xd80] ss:$12 sps:$4 sm:$0xff]   ;;  %v14117_v42 = vpack.c.bf16 %v19_v35, %v19_v35  ;;  %v12222_v35 = vld [vmem:[%s17434_s1 + $0xe88] ss:$12 sps:$4 sm:$0xff]  }
  0x91   :  { %8359 = vmatprep.subr.bf16.mxu0 %v12086_v43  ;;  %v14119_v43 = vpack.c.bf16 %v31_v37, %v31_v37  ;;  %v12227_v37 = vld [vmem:[%s17434_s1 + $0x5a4] ss:$12 sps:$4 sm:$0xff]  }
  0x93   :  { %8114 = vmatpush1.bf16.msra.mxu1 %v12081_v44  ;;  %v22_v44 = vld [vmem:[%s17435_s0 + $0x38] sm:$0xff] }
  0x94   :  { %8360 = vmatpush1.bf16.msra.mxu0 %v12084_v45  ;;  %8115 = vmatprep.subr.bf16.mxu1 %v12089_v46  ;;  %v34_v45 = vld [vmem:[%s17435_s0 + $0x98] sm:$0xff] }
  0x95   :  { %8361 = vmatprep.subr.bf16.mxu0 %v12092_v47  ;;  %v12161_v46 = vld [vmem:[%s17434_s1 + $0x49c] ss:$12 sps:$4 sm:$0xff]  }
  0x96   :  { %v12164_v47 = vld [vmem:[%s17434_s1 + $0xd9c] ss:$12 sps:$4 sm:$0xff]  }
  0x97   :  { %8116 = vmatpush1.bf16.msra.mxu1 %v12087_v49  ;;  %v14133_v49 = vpack.c.bf16 %v22_v44, %v22_v44  ;;  %v12233_v44 = vld [vmem:[%s17434_s1 + $0x5bc] ss:$12 sps:$4 sm:$0xff]  }
  0x98   :  { %8362 = vmatpush1.bf16.msra.mxu0 %v12090_v50  ;;  %8117 = vmatprep.subr.bf16.mxu1 %v12095_v51  ;;  %v14135_v50 = vpack.c.bf16 %v34_v45, %v34_v45  ;;  %v12159_v51 = vld [vmem:[%s17434_s1 + $0x498] ss:$12 sps:$4 sm:$0xff]   ;;  %v12236_v45 = vld [vmem:[%s17434_s1 + $0xebc] ss:$12 sps:$4 sm:$0xff]  }
  0x99   :  { %8363 = vmatprep.subr.bf16.mxu0 %v12098_v52  ;;  %v12162_v52 = vld [vmem:[%s17434_s1 + $0xd98] ss:$12 sps:$4 sm:$0xff]  }
  0x9b   :  { %8118 = vmatpush1.bf16.msra.mxu1 %v12093_v54  ;;  %v12167_v54 = vld [vmem:[%s17434_s1 + $0x4b4] ss:$12 sps:$4 sm:$0xff]  }
  0x9c   :  { %8364 = vmatpush1.bf16.msra.mxu0 %v12096_v55  ;;  %8119 = vmatprep.subr.bf16.mxu1 %v12101_v56  ;;  %v12170_v55 = vld [vmem:[%s17434_s1 + $0xdb4] ss:$12 sps:$4 sm:$0xff]   ;;  %v12165_v56 = vld [vmem:[%s17434_s1 + $0x4b0] ss:$12 sps:$4 sm:$0xff]  }
  0x9d   :  { %8365 = vmatprep.subr.bf16.mxu0 %v12104_v57  ;;  %v12168_v57 = vld [vmem:[%s17434_s1 + $0xdb0] ss:$12 sps:$4 sm:$0xff]  }
  0x9f   :  { %8120 = vmatpush1.bf16.msra.mxu1 %v12099_v58  ;;  %v12173_v58 = vld [vmem:[%s17434_s1 + $0x4cc] ss:$12 sps:$4 sm:$0xff]  }
  0xa0   :  { %8366 = vmatpush1.bf16.msra.mxu0 %v12102_v59  ;;  %8121 = vmatprep.subr.bf16.mxu1 %v12107_v60  ;;  %v12176_v59 = vld [vmem:[%s17434_s1 + $0xdcc] ss:$12 sps:$4 sm:$0xff]   ;;  %v12171_v60 = vld [vmem:[%s17434_s1 + $0x4c8] ss:$12 sps:$4 sm:$0xff]  }
  0xa1   :  { %8367 = vmatprep.subr.bf16.mxu0 %v12110_v61  ;;  %v12174_v61 = vld [vmem:[%s17434_s1 + $0xdc8] ss:$12 sps:$4 sm:$0xff]  }
  0xa3   :  { %8122 = vmatpush1.bf16.msra.mxu1 %v12105_v62  ;;  %v12179_v62 = vld [vmem:[%s17434_s1 + $0x4e4] ss:$12 sps:$4 sm:$0xff]  }
  0xa4   :  { %8368 = vmatpush1.bf16.msra.mxu0 %v12108_v63  ;;  %8123 = vmatprep.subr.bf16.mxu1 %v12113_v0  ;;  %v12182_v63 = vld [vmem:[%s17434_s1 + $0xde4] ss:$12 sps:$4 sm:$0xff]   ;;  %v12177_v0 = vld [vmem:[%s17434_s1 + $0x4e0] ss:$12 sps:$4 sm:$0xff]  }
  0xa5   :  { %8369 = vmatprep.subr.bf16.mxu0 %v12116_v1  ;;  %v12180_v1 = vld [vmem:[%s17434_s1 + $0xde0] ss:$12 sps:$4 sm:$0xff]  }
  0xa7   :  { %8124 = vmatpush1.bf16.msra.mxu1 %v12111_v2  ;;  %v12185_v2 = vld [vmem:[%s17434_s1 + $0x4fc] ss:$12 sps:$4 sm:$0xff]  }
  0xa8   :  { %8370 = vmatpush1.bf16.msra.mxu0 %v12114_v3  ;;  %8125 = vmatprep.subr.bf16.mxu1 %v12119_v4  ;;  %v12188_v3 = vld [vmem:[%s17434_s1 + $0xdfc] ss:$12 sps:$4 sm:$0xff]   ;;  %v12183_v4 = vld [vmem:[%s17434_s1 + $0x4f8] ss:$12 sps:$4 sm:$0xff]  }
  0xa9   :  { %8371 = vmatprep.subr.bf16.mxu0 %v12122_v5  ;;  %v12186_v5 = vld [vmem:[%s17434_s1 + $0xdf8] ss:$12 sps:$4 sm:$0xff]  }
  0xab   :  { %8126 = vmatpush1.bf16.msra.mxu1 %v12117_v6  ;;  %v12191_v6 = vld [vmem:[%s17434_s1 + $0x514] ss:$12 sps:$4 sm:$0xff]  }
  0xac   :  { %8372 = vmatpush1.bf16.msra.mxu0 %v12120_v7  ;;  %8127 = vmatprep.subr.bf16.mxu1 %v12125_v8  ;;  %v12194_v7 = vld [vmem:[%s17434_s1 + $0xe14] ss:$12 sps:$4 sm:$0xff]   ;;  %v12189_v8 = vld [vmem:[%s17434_s1 + $0x510] ss:$12 sps:$4 sm:$0xff]  }
  0xad   :  { %8373 = vmatprep.subr.bf16.mxu0 %v12128_v9  ;;  %v12192_v9 = vld [vmem:[%s17434_s1 + $0xe10] ss:$12 sps:$4 sm:$0xff]  }
  0xaf   :  { %8128 = vmatpush1.bf16.msra.mxu1 %v12123_v12  ;;  %v12197_v12 = vld [vmem:[%s17434_s1 + $0x52c] ss:$12 sps:$4 sm:$0xff]  }
  0xb0   :  { %8374 = vmatpush1.bf16.msra.mxu0 %v12126_v13  ;;  %8129 = vmatprep.subr.bf16.mxu1 %v12131_v14  ;;  %v12200_v13 = vld [vmem:[%s17434_s1 + $0xe2c] ss:$12 sps:$4 sm:$0xff]   ;;  %v12195_v14 = vld [vmem:[%s17434_s1 + $0x528] ss:$12 sps:$4 sm:$0xff]  }
  0xb1   :  { %8375 = vmatprep.subr.bf16.mxu0 %v12134_v15  ;;  %v12198_v15 = vld [vmem:[%s17434_s1 + $0xe28] ss:$12 sps:$4 sm:$0xff]  }
  0xb3   :  { %8130 = vmatpush1.bf16.msra.mxu1 %v12129_v16  ;;  %v12203_v16 = vld [vmem:[%s17434_s1 + $0x544] ss:$12 sps:$4 sm:$0xff]  }
  0xb4   :  { %8376 = vmatpush1.bf16.msra.mxu0 %v12132_v17  ;;  %8131 = vmatprep.subr.bf16.mxu1 %v12137_v18  ;;  %v12206_v17 = vld [vmem:[%s17434_s1 + $0xe44] ss:$12 sps:$4 sm:$0xff]   ;;  %v12201_v18 = vld [vmem:[%s17434_s1 + $0x540] ss:$12 sps:$4 sm:$0xff]  }
  0xb5   :  { %8377 = vmatprep.subr.bf16.mxu0 %v12140_v19  ;;  %v12204_v19 = vld [vmem:[%s17434_s1 + $0xe40] ss:$12 sps:$4 sm:$0xff]  }
  0xb7   :  { %8132 = vmatpush1.bf16.msra.mxu1 %v12135_v20  ;;  %v12209_v20 = vld [vmem:[%s17434_s1 + $0x55c] ss:$12 sps:$4 sm:$0xff]  }
  0xb8   :  { %8378 = vmatpush1.bf16.msra.mxu0 %v12138_v21  ;;  %8133 = vmatprep.subr.bf16.mxu1 %v12143_v24  ;;  %v12212_v21 = vld [vmem:[%s17434_s1 + $0xe5c] ss:$12 sps:$4 sm:$0xff]   ;;  %v12207_v24 = vld [vmem:[%s17434_s1 + $0x558] ss:$12 sps:$4 sm:$0xff]  }
  0xb9   :  { %8379 = vmatprep.subr.bf16.mxu0 %v12146_v25  ;;  %v12210_v25 = vld [vmem:[%s17434_s1 + $0xe58] ss:$12 sps:$4 sm:$0xff]  }
  0xbb   :  { %8134 = vmatpush1.bf16.msra.mxu1 %v12141_v26  ;;  %v12215_v26 = vld [vmem:[%s17434_s1 + $0x574] ss:$12 sps:$4 sm:$0xff]  }
  0xbc   :  { %8380 = vmatpush1.bf16.msra.mxu0 %v12144_v27  ;;  %8135 = vmatprep.subr.bf16.mxu1 %v12149_v29  ;;  %v12218_v27 = vld [vmem:[%s17434_s1 + $0xe74] ss:$12 sps:$4 sm:$0xff]   ;;  %v12213_v29 = vld [vmem:[%s17434_s1 + $0x570] ss:$12 sps:$4 sm:$0xff]  }
  0xbd   :  { %8381 = vmatprep.subr.bf16.mxu0 %v12152_v30  ;;  %v12216_v30 = vld [vmem:[%s17434_s1 + $0xe70] ss:$12 sps:$4 sm:$0xff]  }
  0xbf   :  { %8136 = vmatpush1.bf16.msra.mxu1 %v12147_v31  ;;  %v12221_v31 = vld [vmem:[%s17434_s1 + $0x58c] ss:$12 sps:$4 sm:$0xff]  }
  0xc0   :  { %8382 = vmatpush1.bf16.msra.mxu0 %v12150_v32  ;;  %8146 = vmatprep.subr.bf16.mxu1 %v12155_v34  ;;  %v12224_v32 = vld [vmem:[%s17434_s1 + $0xe8c] ss:$12 sps:$4 sm:$0xff]   ;;  %v12219_v34 = vld [vmem:[%s17434_s1 + $0x588] ss:$12 sps:$4 sm:$0xff]  }
  0xc1   :  { %8392 = vmatprep.subr.bf16.mxu0 %v12158_v38  ;;  %v12230_v38 = vld [vmem:[%s17434_s1 + $0xea4] ss:$12 sps:$4 sm:$0xff]  }
  0xc2   :  { %8138 = vmatmul.mubr.bf16.vlgmr.msra.gmra.mrb[0].mxu1 %v14117_v42 }
  0xc3   :  { %8384 = vmatmul.mubr.bf16.vlgmr.msra.gmra.mrb[0].mxu0 %v14119_v43  ;;  %8147 = vmatpush1.bf16.msra.mxu1 %v12153_v39  ;;  %v12225_v39 = vld [vmem:[%s17434_s1 + $0x5a0] ss:$12 sps:$4 sm:$0xff]  }
  0xc4   :  { %8393 = vmatpush1.bf16.msra.mxu0 %v12156_v40  ;;  %8148 = vmatprep.subr.bf16.mxu1 %v12161_v46  ;;  %v12228_v40 = vld [vmem:[%s17434_s1 + $0xea0] ss:$12 sps:$4 sm:$0xff]   ;;  %v12231_v46 = vld [vmem:[%s17434_s1 + $0x5b8] ss:$12 sps:$4 sm:$0xff]  }
  0xc5   :  { %8394 = vmatprep.subr.bf16.mxu0 %v12164_v47  ;;  %8178 = vmatprep.mubr.bf16.mxu1 %v14133_v49  ;;  %v12234_v47 = vld [vmem:[%s17434_s1 + $0xeb8] ss:$12 sps:$4 sm:$0xff]  }
  0xc6   :  { %8424 = vmatprep.mubr.bf16.mxu0 %v14135_v50 }
  0xc7   :  { %8149 = vmatpush1.bf16.msra.mxu1 %v12159_v51  ;;  %v12239_v51 = vld [vmem:[%s17434_s1 + $0x5d4] ss:$12 sps:$4 sm:$0xff]  }
  0xc8   :  { %8395 = vmatpush1.bf16.msra.mxu0 %v12162_v52  ;;  %8150 = vmatprep.subr.bf16.mxu1 %v12167_v54  ;;  %v12242_v52 = vld [vmem:[%s17434_s1 + $0xed4] ss:$12 sps:$4 sm:$0xff]   ;;  %v12237_v54 = vld [vmem:[%s17434_s1 + $0x5d0] ss:$12 sps:$4 sm:$0xff]  }
  0xc9   :  { %8396 = vmatprep.subr.bf16.mxu0 %v12170_v55  ;;  %v12240_v55 = vld [vmem:[%s17434_s1 + $0xed0] ss:$12 sps:$4 sm:$0xff]  }
  0xcb   :  { %8151 = vmatpush1.bf16.msra.mxu1 %v12165_v56  ;;  %v12245_v56 = vld [vmem:[%s17434_s1 + $0x5ec] ss:$12 sps:$4 sm:$0xff]  }
  0xcc   :  { %8397 = vmatpush1.bf16.msra.mxu0 %v12168_v57  ;;  %8152 = vmatprep.subr.bf16.mxu1 %v12173_v58  ;;  %v12248_v57 = vld [vmem:[%s17434_s1 + $0xeec] ss:$12 sps:$4 sm:$0xff]   ;;  %v12243_v58 = vld [vmem:[%s17434_s1 + $0x5e8] ss:$12 sps:$4 sm:$0xff]  }
  0xcd   :  { %8398 = vmatprep.subr.bf16.mxu0 %v12176_v59  ;;  %v12246_v59 = vld [vmem:[%s17434_s1 + $0xee8] ss:$12 sps:$4 sm:$0xff]  }
  0xcf   :  { %8153 = vmatpush1.bf16.msra.mxu1 %v12171_v60  ;;  %v12251_v60 = vld [vmem:[%s17434_s1 + $0x604] ss:$12 sps:$4 sm:$0xff]  }
  0xd0   :  { %8399 = vmatpush1.bf16.msra.mxu0 %v12174_v61  ;;  %8154 = vmatprep.subr.bf16.mxu1 %v12179_v62  ;;  %v21_v61 = vld [vmem:[%s17435_s0 + $0x30] sm:$0xff] }
  0xd1   :  { %8400 = vmatprep.subr.bf16.mxu0 %v12182_v63  ;;  %v33_v62 = vld [vmem:[%s17435_s0 + $0x90] sm:$0xff] }
  0xd2   :  { %v12254_v63 = vld [vmem:[%s17434_s1 + $0xf04] ss:$12 sps:$4 sm:$0xff]  }
  0xd3   :  { %8155 = vmatpush1.bf16.msra.mxu1 %v12177_v0  ;;  %v12249_v0 = vld [vmem:[%s17434_s1 + $0x600] ss:$12 sps:$4 sm:$0xff]  }
  0xd4   :  { %8401 = vmatpush1.bf16.msra.mxu0 %v12180_v1  ;;  %8156 = vmatprep.subr.bf16.mxu1 %v12185_v2  ;;  %v12252_v1 = vld [vmem:[%s17434_s1 + $0xf00] ss:$12 sps:$4 sm:$0xff]   ;;  %v14333_v2 = vpack.c.bf16 %v21_v61, %v21_v61  ;;  %v12312_v61 = vld [vmem:[%s17434_s1 + $0xff0] ss:$12 sps:$4 sm:$0xff]  }
  0xd5   :  { %8402 = vmatprep.subr.bf16.mxu0 %v12188_v3  ;;  %v14335_v3 = vpack.c.bf16 %v33_v62, %v33_v62  ;;  %v12317_v62 = vld [vmem:[%s17434_s1 + $0x70c] ss:$12 sps:$4 sm:$0xff]  }
  0xd7   :  { %8157 = vmatpush1.bf16.msra.mxu1 %v12183_v4  ;;  %v24_v4 = vld [vmem:[%s17435_s0 + $0x48] sm:$0xff] }
  0xd8   :  { %8403 = vmatpush1.bf16.msra.mxu0 %v12186_v5  ;;  %8158 = vmatprep.subr.bf16.mxu1 %v12191_v6  ;;  %v36_v5 = vld [vmem:[%s17435_s0 + $0xa8] sm:$0xff] }
  0xd9   :  { %8404 = vmatprep.subr.bf16.mxu0 %v12194_v7  ;;  %v12257_v6 = vld [vmem:[%s17434_s1 + $0x61c] ss:$12 sps:$4 sm:$0xff]  }
  0xda   :  { %v12260_v7 = vld [vmem:[%s17434_s1 + $0xf1c] ss:$12 sps:$4 sm:$0xff]  }
  0xdb   :  { %8159 = vmatpush1.bf16.msra.mxu1 %v12189_v8  ;;  %v14349_v8 = vpack.c.bf16 %v24_v4, %v24_v4  ;;  %v12323_v4 = vld [vmem:[%s17434_s1 + $0x724] ss:$12 sps:$4 sm:$0xff]  }
  0xdc   :  { %8405 = vmatpush1.bf16.msra.mxu0 %v12192_v9  ;;  %8160 = vmatprep.subr.bf16.mxu1 %v12197_v12  ;;  %v14351_v9 = vpack.c.bf16 %v36_v5, %v36_v5  ;;  %v12255_v12 = vld [vmem:[%s17434_s1 + $0x618] ss:$12 sps:$4 sm:$0xff]  }
  0xdd   :  { %8406 = vmatprep.subr.bf16.mxu0 %v12200_v13  ;;  %v12258_v13 = vld [vmem:[%s17434_s1 + $0xf18] ss:$12 sps:$4 sm:$0xff]  }
  0xde   :  { %v12326_v5 = vld [vmem:[%s17434_s1 + $0x1024] ss:$12 sps:$4 sm:$0xff]  }
  0xdf   :  { %8161 = vmatpush1.bf16.msra.mxu1 %v12195_v14  ;;  %v12263_v14 = vld [vmem:[%s17434_s1 + $0x634] ss:$12 sps:$4 sm:$0xff]  }
  0xe0   :  { %8407 = vmatpush1.bf16.msra.mxu0 %v12198_v15  ;;  %8162 = vmatprep.subr.bf16.mxu1 %v12203_v16  ;;  %v12266_v15 = vld [vmem:[%s17434_s1 + $0xf34] ss:$12 sps:$4 sm:$0xff]   ;;  %v12261_v16 = vld [vmem:[%s17434_s1 + $0x630] ss:$12 sps:$4 sm:$0xff]  }
  0xe1   :  { %8408 = vmatprep.subr.bf16.mxu0 %v12206_v17  ;;  %v12264_v17 = vld [vmem:[%s17434_s1 + $0xf30] ss:$12 sps:$4 sm:$0xff]  }
  0xe3   :  { %8163 = vmatpush1.bf16.msra.mxu1 %v12201_v18  ;;  %v12269_v18 = vld [vmem:[%s17434_s1 + $0x64c] ss:$12 sps:$4 sm:$0xff]  }
  0xe4   :  { %8409 = vmatpush1.bf16.msra.mxu0 %v12204_v19  ;;  %8164 = vmatprep.subr.bf16.mxu1 %v12209_v20  ;;  %v12272_v19 = vld [vmem:[%s17434_s1 + $0xf4c] ss:$12 sps:$4 sm:$0xff]   ;;  %v12267_v20 = vld [vmem:[%s17434_s1 + $0x648] ss:$12 sps:$4 sm:$0xff]  }
  0xe5   :  { %8410 = vmatprep.subr.bf16.mxu0 %v12212_v21  ;;  %v12270_v21 = vld [vmem:[%s17434_s1 + $0xf48] ss:$12 sps:$4 sm:$0xff]  }
  0xe7   :  { %8165 = vmatpush1.bf16.msra.mxu1 %v12207_v24  ;;  %v12275_v24 = vld [vmem:[%s17434_s1 + $0x664] ss:$12 sps:$4 sm:$0xff]  }
  0xe8   :  { %8411 = vmatpush1.bf16.msra.mxu0 %v12210_v25  ;;  %8166 = vmatprep.subr.bf16.mxu1 %v12215_v26  ;;  %v12278_v25 = vld [vmem:[%s17434_s1 + $0xf64] ss:$12 sps:$4 sm:$0xff]   ;;  %v12273_v26 = vld [vmem:[%s17434_s1 + $0x660] ss:$12 sps:$4 sm:$0xff]  }
  0xe9   :  { %8412 = vmatprep.subr.bf16.mxu0 %v12218_v27  ;;  %v12276_v27 = vld [vmem:[%s17434_s1 + $0xf60] ss:$12 sps:$4 sm:$0xff]  }
  0xeb   :  { %8167 = vmatpush1.bf16.msra.mxu1 %v12213_v29  ;;  %v12281_v29 = vld [vmem:[%s17434_s1 + $0x67c] ss:$12 sps:$4 sm:$0xff]  }
  0xec   :  { %8413 = vmatpush1.bf16.msra.mxu0 %v12216_v30  ;;  %8168 = vmatprep.subr.bf16.mxu1 %v12221_v31  ;;  %v12284_v30 = vld [vmem:[%s17434_s1 + $0xf7c] ss:$12 sps:$4 sm:$0xff]   ;;  %v12279_v31 = vld [vmem:[%s17434_s1 + $0x678] ss:$12 sps:$4 sm:$0xff]  }
  0xed   :  { %8414 = vmatprep.subr.bf16.mxu0 %v12224_v32  ;;  %v12282_v32 = vld [vmem:[%s17434_s1 + $0xf78] ss:$12 sps:$4 sm:$0xff]  }
  0xef   :  { %8169 = vmatpush1.bf16.msra.mxu1 %v12219_v34  ;;  %v12287_v34 = vld [vmem:[%s17434_s1 + $0x694] ss:$12 sps:$4 sm:$0xff]  }
  0xf0   :  { %8415 = vmatpush1.bf16.msra.mxu0 %v12222_v35  ;;  %8170 = vmatprep.subr.bf16.mxu1 %v12227_v37  ;;  %v12290_v35 = vld [vmem:[%s17434_s1 + $0xf94] ss:$12 sps:$4 sm:$0xff]   ;;  %v12285_v37 = vld [vmem:[%s17434_s1 + $0x690] ss:$12 sps:$4 sm:$0xff]  }
  0xf1   :  { %8416 = vmatprep.subr.bf16.mxu0 %v12230_v38  ;;  %v12288_v38 = vld [vmem:[%s17434_s1 + $0xf90] ss:$12 sps:$4 sm:$0xff]  }
  0xf3   :  { %8171 = vmatpush1.bf16.msra.mxu1 %v12225_v39  ;;  %v12293_v39 = vld [vmem:[%s17434_s1 + $0x6ac] ss:$12 sps:$4 sm:$0xff]  }
  0xf4   :  { %8417 = vmatpush1.bf16.msra.mxu0 %v12228_v40  ;;  %8172 = vmatprep.subr.bf16.mxu1 %v12233_v44  ;;  %v12296_v40 = vld [vmem:[%s17434_s1 + $0xfac] ss:$12 sps:$4 sm:$0xff]   ;;  %v12291_v44 = vld [vmem:[%s17434_s1 + $0x6a8] ss:$12 sps:$4 sm:$0xff]  }
  0xf5   :  { %8418 = vmatprep.subr.bf16.mxu0 %v12236_v45  ;;  %v12294_v45 = vld [vmem:[%s17434_s1 + $0xfa8] ss:$12 sps:$4 sm:$0xff]  }
  0xf7   :  { %8173 = vmatpush1.bf16.msra.mxu1 %v12231_v46  ;;  %v12299_v46 = vld [vmem:[%s17434_s1 + $0x6c4] ss:$12 sps:$4 sm:$0xff]  }
  0xf8   :  { %8419 = vmatpush1.bf16.msra.mxu0 %v12234_v47  ;;  %8174 = vmatprep.subr.bf16.mxu1 %v12239_v51  ;;  %v12302_v47 = vld [vmem:[%s17434_s1 + $0xfc4] ss:$12 sps:$4 sm:$0xff]   ;;  %v12297_v51 = vld [vmem:[%s17434_s1 + $0x6c0] ss:$12 sps:$4 sm:$0xff]  }
  0xf9   :  { %8420 = vmatprep.subr.bf16.mxu0 %v12242_v52  ;;  %v12300_v52 = vld [vmem:[%s17434_s1 + $0xfc0] ss:$12 sps:$4 sm:$0xff]  }
  0xfb   :  { %8175 = vmatpush1.bf16.msra.mxu1 %v12237_v54  ;;  %v12305_v54 = vld [vmem:[%s17434_s1 + $0x6dc] ss:$12 sps:$4 sm:$0xff]  }
  0xfc   :  { %8421 = vmatpush1.bf16.msra.mxu0 %v12240_v55  ;;  %8176 = vmatprep.subr.bf16.mxu1 %v12245_v56  ;;  %v12308_v55 = vld [vmem:[%s17434_s1 + $0xfdc] ss:$12 sps:$4 sm:$0xff]   ;;  %v12303_v56 = vld [vmem:[%s17434_s1 + $0x6d8] ss:$12 sps:$4 sm:$0xff]  }
  0xfd   :  { %8422 = vmatprep.subr.bf16.mxu0 %v12248_v57  ;;  %v12306_v57 = vld [vmem:[%s17434_s1 + $0xfd8] ss:$12 sps:$4 sm:$0xff]  }
  0xff   :  { %8177 = vmatpush1.bf16.msra.mxu1 %v12243_v58  ;;  %v12311_v58 = vld [vmem:[%s17434_s1 + $0x6f4] ss:$12 sps:$4 sm:$0xff]  }
 0x100   :  { %8423 = vmatpush1.bf16.msra.mxu0 %v12246_v59  ;;  %8187 = vmatprep.subr.bf16.mxu1 %v12251_v60  ;;  %v12314_v59 = vld [vmem:[%s17434_s1 + $0xff4] ss:$12 sps:$4 sm:$0xff]   ;;  %v12309_v60 = vld [vmem:[%s17434_s1 + $0x6f0] ss:$12 sps:$4 sm:$0xff]  }
 0x101   :  { %8433 = vmatprep.subr.bf16.mxu0 %v12254_v63  ;;  %v12320_v63 = vld [vmem:[%s17434_s1 + $0x100c] ss:$12 sps:$4 sm:$0xff]  }
 0x102   :  { %8179 = vmatmul.mubr.bf16.vlgmr.msra.gmra.mrb[0].mxu1 %v14333_v2 }
 0x103   :  { %8425 = vmatmul.mubr.bf16.vlgmr.msra.gmra.mrb[0].mxu0 %v14335_v3  ;;  %8188 = vmatpush1.bf16.msra.mxu1 %v12249_v0  ;;  %v12315_v0 = vld [vmem:[%s17434_s1 + $0x708] ss:$12 sps:$4 sm:$0xff]  }
 0x104   :  { %8434 = vmatpush1.bf16.msra.mxu0 %v12252_v1  ;;  %8189 = vmatprep.subr.bf16.mxu1 %v12257_v6  ;;  %v12318_v1 = vld [vmem:[%s17434_s1 + $0x1008] ss:$12 sps:$4 sm:$0xff]   ;;  %v12321_v6 = vld [vmem:[%s17434_s1 + $0x720] ss:$12 sps:$4 sm:$0xff]  }
 0x105   :  { %8435 = vmatprep.subr.bf16.mxu0 %v12260_v7  ;;  %8219 = vmatprep.mubr.bf16.mxu1 %v14349_v8  ;;  %v12324_v7 = vld [vmem:[%s17434_s1 + $0x1020] ss:$12 sps:$4 sm:$0xff]  }
 0x106   :  { %8465 = vmatprep.mubr.bf16.mxu0 %v14351_v9 }
 0x107   :  { %8190 = vmatpush1.bf16.msra.mxu1 %v12255_v12  ;;  %v12329_v12 = vld [vmem:[%s17434_s1 + $0x73c] ss:$12 sps:$4 sm:$0xff]  }
 0x108   :  { %8436 = vmatpush1.bf16.msra.mxu0 %v12258_v13  ;;  %8191 = vmatprep.subr.bf16.mxu1 %v12263_v14  ;;  %v12332_v13 = vld [vmem:[%s17434_s1 + $0x103c] ss:$12 sps:$4 sm:$0xff]   ;;  %v12327_v14 = vld [vmem:[%s17434_s1 + $0x738] ss:$12 sps:$4 sm:$0xff]  }
 0x109   :  { %8437 = vmatprep.subr.bf16.mxu0 %v12266_v15  ;;  %v12330_v15 = vld [vmem:[%s17434_s1 + $0x1038] ss:$12 sps:$4 sm:$0xff]  }
 0x10b   :  { %8192 = vmatpush1.bf16.msra.mxu1 %v12261_v16  ;;  %v12335_v16 = vld [vmem:[%s17434_s1 + $0x754] ss:$12 sps:$4 sm:$0xff]  }
 0x10c   :  { %8438 = vmatpush1.bf16.msra.mxu0 %v12264_v17  ;;  %8193 = vmatprep.subr.bf16.mxu1 %v12269_v18  ;;  %v12338_v17 = vld [vmem:[%s17434_s1 + $0x1054] ss:$12 sps:$4 sm:$0xff]   ;;  %v12333_v18 = vld [vmem:[%s17434_s1 + $0x750] ss:$12 sps:$4 sm:$0xff]  }
 0x10d   :  { %8439 = vmatprep.subr.bf16.mxu0 %v12272_v19  ;;  %v12336_v19 = vld [vmem:[%s17434_s1 + $0x1050] ss:$12 sps:$4 sm:$0xff]  }
 0x10f   :  { %8194 = vmatpush1.bf16.msra.mxu1 %v12267_v20  ;;  %v12341_v20 = vld [vmem:[%s17434_s1 + $0x76c] ss:$12 sps:$4 sm:$0xff]  }
 0x110   :  { %8440 = vmatpush1.bf16.msra.mxu0 %v12270_v21  ;;  %8195 = vmatprep.subr.bf16.mxu1 %v12275_v24  ;;  %v12344_v21 = vld [vmem:[%s17434_s1 + $0x106c] ss:$12 sps:$4 sm:$0xff]   ;;  %v12339_v24 = vld [vmem:[%s17434_s1 + $0x768] ss:$12 sps:$4 sm:$0xff]  }
 0x111   :  { %8441 = vmatprep.subr.bf16.mxu0 %v12278_v25  ;;  %v12342_v25 = vld [vmem:[%s17434_s1 + $0x1068] ss:$12 sps:$4 sm:$0xff]  }
 0x113   :  { %8196 = vmatpush1.bf16.msra.mxu1 %v12273_v26  ;;  %v12347_v26 = vld [vmem:[%s17434_s1 + $0x784] ss:$12 sps:$4 sm:$0xff]  }
 0x114   :  { %8442 = vmatpush1.bf16.msra.mxu0 %v12276_v27  ;;  %8197 = vmatprep.subr.bf16.mxu1 %v12281_v29  ;;  %v12350_v27 = vld [vmem:[%s17434_s1 + $0x1084] ss:$12 sps:$4 sm:$0xff]  }
 0x115   :  { %8443 = vmatprep.subr.bf16.mxu0 %v12284_v30  ;;  %v23_v29 = vld [vmem:[%s17435_s0 + $0x40] sm:$0xff] }
 0x116   :  { %v35_v30 = vld [vmem:[%s17435_s0 + $0xa0] sm:$0xff] }
 0x117   :  { %8198 = vmatpush1.bf16.msra.mxu1 %v12279_v31  ;;  %v26_v31 = vld [vmem:[%s17435_s0 + $0x58] sm:$0xff] }
 0x118   :  { %8444 = vmatpush1.bf16.msra.mxu0 %v12282_v32  ;;  %8199 = vmatprep.subr.bf16.mxu1 %v12287_v34  ;;  %v38_v32 = vld [vmem:[%s17435_s0 + $0xb8] sm:$0xff]  ;;  %v14549_v34 = vpack.c.bf16 %v23_v29, %v23_v29  ;;  %v12407_v29 = vld [vmem:[%s17434_s1 + $0x874] ss:$12 sps:$4 sm:$0xff]  }
 0x119   :  { %8445 = vmatprep.subr.bf16.mxu0 %v12290_v35  ;;  %v14551_v35 = vpack.c.bf16 %v35_v30, %v35_v30  ;;  %v12410_v30 = vld [vmem:[%s17434_s1 + $0x1174] ss:$12 sps:$4 sm:$0xff]  }
 0x11b   :  { %8200 = vmatpush1.bf16.msra.mxu1 %v12285_v37  ;;  %v12345_v37 = vld [vmem:[%s17434_s1 + $0x780] ss:$12 sps:$4 sm:$0xff]  }
 0x11c   :  { %8446 = vmatpush1.bf16.msra.mxu0 %v12288_v38  ;;  %8201 = vmatprep.subr.bf16.mxu1 %v12293_v39  ;;  %v12348_v38 = vld [vmem:[%s17434_s1 + $0x1080] ss:$12 sps:$4 sm:$0xff]   ;;  %v12353_v39 = vld [vmem:[%s17434_s1 + $0x79c] ss:$12 sps:$4 sm:$0xff]  }
 0x11d   :  { %8447 = vmatprep.subr.bf16.mxu0 %v12296_v40  ;;  %v12356_v40 = vld [vmem:[%s17434_s1 + $0x109c] ss:$12 sps:$4 sm:$0xff]  }
 0x11f   :  { %8202 = vmatpush1.bf16.msra.mxu1 %v12291_v44  ;;  %v12351_v44 = vld [vmem:[%s17434_s1 + $0x798] ss:$12 sps:$4 sm:$0xff]  }
 0x120   :  { %8448 = vmatpush1.bf16.msra.mxu0 %v12294_v45  ;;  %8203 = vmatprep.subr.bf16.mxu1 %v12299_v46  ;;  %v14568_v45 = vpack.c.bf16 %v26_v31, %v26_v31  ;;  %v14570_v46 = vpack.c.bf16 %v38_v32, %v38_v32  ;;  %v12405_v31 = vld [vmem:[%s17434_s1 + $0x870] ss:$12 sps:$4 sm:$0xff]  }
 0x121   :  { %8449 = vmatprep.subr.bf16.mxu0 %v12302_v47  ;;  %v12354_v47 = vld [vmem:[%s17434_s1 + $0x1098] ss:$12 sps:$4 sm:$0xff]   ;;  %v12408_v32 = vld [vmem:[%s17434_s1 + $0x1170] ss:$12 sps:$4 sm:$0xff]  }
 0x123   :  { %8204 = vmatpush1.bf16.msra.mxu1 %v12297_v51  ;;  %v12359_v51 = vld [vmem:[%s17434_s1 + $0x7b4] ss:$12 sps:$4 sm:$0xff]  }
 0x124   :  { %8450 = vmatpush1.bf16.msra.mxu0 %v12300_v52  ;;  %8205 = vmatprep.subr.bf16.mxu1 %v12305_v54  ;;  %v12362_v52 = vld [vmem:[%s17434_s1 + $0x10b4] ss:$12 sps:$4 sm:$0xff]   ;;  %v12357_v54 = vld [vmem:[%s17434_s1 + $0x7b0] ss:$12 sps:$4 sm:$0xff]  }
 0x125   :  { %8451 = vmatprep.subr.bf16.mxu0 %v12308_v55  ;;  %v12360_v55 = vld [vmem:[%s17434_s1 + $0x10b0] ss:$12 sps:$4 sm:$0xff]  }
 0x127   :  { %8206 = vmatpush1.bf16.msra.mxu1 %v12303_v56  ;;  %v12365_v56 = vld [vmem:[%s17434_s1 + $0x7cc] ss:$12 sps:$4 sm:$0xff]  }
 0x128   :  { %8452 = vmatpush1.bf16.msra.mxu0 %v12306_v57  ;;  %8207 = vmatprep.subr.bf16.mxu1 %v12311_v58  ;;  %v12368_v57 = vld [vmem:[%s17434_s1 + $0x10cc] ss:$12 sps:$4 sm:$0xff]   ;;  %v12363_v58 = vld [vmem:[%s17434_s1 + $0x7c8] ss:$12 sps:$4 sm:$0xff]  }
 0x129   :  { %8453 = vmatprep.subr.bf16.mxu0 %v12314_v59  ;;  %v12366_v59 = vld [vmem:[%s17434_s1 + $0x10c8] ss:$12 sps:$4 sm:$0xff]  }
 0x12b   :  { %8208 = vmatpush1.bf16.msra.mxu1 %v12309_v60  ;;  %v12371_v60 = vld [vmem:[%s17434_s1 + $0x7e4] ss:$12 sps:$4 sm:$0xff]  }
 0x12c   :  { %8454 = vmatpush1.bf16.msra.mxu0 %v12312_v61  ;;  %8209 = vmatprep.subr.bf16.mxu1 %v12317_v62  ;;  %v12374_v61 = vld [vmem:[%s17434_s1 + $0x10e4] ss:$12 sps:$4 sm:$0xff]   ;;  %v12369_v62 = vld [vmem:[%s17434_s1 + $0x7e0] ss:$12 sps:$4 sm:$0xff]  }
 0x12d   :  { %8455 = vmatprep.subr.bf16.mxu0 %v12320_v63  ;;  %v12372_v63 = vld [vmem:[%s17434_s1 + $0x10e0] ss:$12 sps:$4 sm:$0xff]  }
 0x12f   :  { %8210 = vmatpush1.bf16.msra.mxu1 %v12315_v0  ;;  %v12377_v0 = vld [vmem:[%s17434_s1 + $0x7fc] ss:$12 sps:$4 sm:$0xff]  }
 0x130   :  { %8456 = vmatpush1.bf16.msra.mxu0 %v12318_v1  ;;  %8211 = vmatprep.subr.bf16.mxu1 %v12323_v4  ;;  %v12380_v1 = vld [vmem:[%s17434_s1 + $0x10fc] ss:$12 sps:$4 sm:$0xff]   ;;  %v12375_v4 = vld [vmem:[%s17434_s1 + $0x7f8] ss:$12 sps:$4 sm:$0xff]  }
 0x131   :  { %8457 = vmatprep.subr.bf16.mxu0 %v12326_v5  ;;  %v12378_v5 = vld [vmem:[%s17434_s1 + $0x10f8] ss:$12 sps:$4 sm:$0xff]  }
 0x133   :  { %8212 = vmatpush1.bf16.msra.mxu1 %v12321_v6  ;;  %v12383_v6 = vld [vmem:[%s17434_s1 + $0x814] ss:$12 sps:$4 sm:$0xff]  }
 0x134   :  { %8458 = vmatpush1.bf16.msra.mxu0 %v12324_v7  ;;  %8213 = vmatprep.subr.bf16.mxu1 %v12329_v12  ;;  %v12386_v7 = vld [vmem:[%s17434_s1 + $0x1114] ss:$12 sps:$4 sm:$0xff]   ;;  %v12381_v12 = vld [vmem:[%s17434_s1 + $0x810] ss:$12 sps:$4 sm:$0xff]  }
 0x135   :  { %8459 = vmatprep.subr.bf16.mxu0 %v12332_v13  ;;  %v12384_v13 = vld [vmem:[%s17434_s1 + $0x1110] ss:$12 sps:$4 sm:$0xff]  }
 0x137   :  { %8214 = vmatpush1.bf16.msra.mxu1 %v12327_v14  ;;  %v12389_v14 = vld [vmem:[%s17434_s1 + $0x82c] ss:$12 sps:$4 sm:$0xff]  }
 0x138   :  { %8460 = vmatpush1.bf16.msra.mxu0 %v12330_v15  ;;  %8215 = vmatprep.subr.bf16.mxu1 %v12335_v16  ;;  %v12392_v15 = vld [vmem:[%s17434_s1 + $0x112c] ss:$12 sps:$4 sm:$0xff]   ;;  %v12387_v16 = vld [vmem:[%s17434_s1 + $0x828] ss:$12 sps:$4 sm:$0xff]  }
 0x139   :  { %8461 = vmatprep.subr.bf16.mxu0 %v12338_v17  ;;  %v12390_v17 = vld [vmem:[%s17434_s1 + $0x1128] ss:$12 sps:$4 sm:$0xff]  }
 0x13b   :  { %8216 = vmatpush1.bf16.msra.mxu1 %v12333_v18  ;;  %v12395_v18 = vld [vmem:[%s17434_s1 + $0x844] ss:$12 sps:$4 sm:$0xff]  }
 0x13c   :  { %8462 = vmatpush1.bf16.msra.mxu0 %v12336_v19  ;;  %8217 = vmatprep.subr.bf16.mxu1 %v12341_v20  ;;  %v12398_v19 = vld [vmem:[%s17434_s1 + $0x1144] ss:$12 sps:$4 sm:$0xff]   ;;  %v12393_v20 = vld [vmem:[%s17434_s1 + $0x840] ss:$12 sps:$4 sm:$0xff]  }
 0x13d   :  { %8463 = vmatprep.subr.bf16.mxu0 %v12344_v21  ;;  %v12396_v21 = vld [vmem:[%s17434_s1 + $0x1140] ss:$12 sps:$4 sm:$0xff]  }
 0x13f   :  { %8218 = vmatpush1.bf16.msra.mxu1 %v12339_v24  ;;  %v12401_v24 = vld [vmem:[%s17434_s1 + $0x85c] ss:$12 sps:$4 sm:$0xff]  }
 0x140   :  { %8464 = vmatpush1.bf16.msra.mxu0 %v12342_v25  ;;  %8228 = vmatprep.subr.bf16.mxu1 %v12347_v26  ;;  %v12404_v25 = vld [vmem:[%s17434_s1 + $0x115c] ss:$12 sps:$4 sm:$0xff]   ;;  %v12399_v26 = vld [vmem:[%s17434_s1 + $0x858] ss:$12 sps:$4 sm:$0xff]  }
 0x141   :  { %8474 = vmatprep.subr.bf16.mxu0 %v12350_v27  ;;  %v12402_v27 = vld [vmem:[%s17434_s1 + $0x1158] ss:$12 sps:$4 sm:$0xff]  }
 0x142   :  { %8220 = vmatmul.mubr.bf16.vlgmr.msra.gmra.mrb[0].mxu1 %v14549_v34 }
 0x143   :  { %8466 = vmatmul.mubr.bf16.vlgmr.msra.gmra.mrb[0].mxu0 %v14551_v35  ;;  %8229 = vmatpush1.bf16.msra.mxu1 %v12345_v37  ;;  %v12413_v37 = vld [vmem:[%s17434_s1 + $0x88c] ss:$12 sps:$4 sm:$0xff]  }
 0x144   :  { %8475 = vmatpush1.bf16.msra.mxu0 %v12348_v38  ;;  %8230 = vmatprep.subr.bf16.mxu1 %v12353_v39  ;;  %v12416_v38 = vld [vmem:[%s17434_s1 + $0x118c] ss:$12 sps:$4 sm:$0xff]   ;;  %v12411_v39 = vld [vmem:[%s17434_s1 + $0x888] ss:$12 sps:$4 sm:$0xff]  }
 0x145   :  { %8476 = vmatprep.subr.bf16.mxu0 %v12356_v40  ;;  %8260 = vmatprep.mubr.bf16.mxu1 %v14568_v45  ;;  %v12414_v40 = vld [vmem:[%s17434_s1 + $0x1188] ss:$12 sps:$4 sm:$0xff]  }
 0x146   :  { %8506 = vmatprep.mubr.bf16.mxu0 %v14570_v46 }
 0x147   :  { %8231 = vmatpush1.bf16.msra.mxu1 %v12351_v44  ;;  %v12419_v44 = vld [vmem:[%s17434_s1 + $0x8a4] ss:$12 sps:$4 sm:$0xff]  }
 0x148   :  { %8477 = vmatpush1.bf16.msra.mxu0 %v12354_v47  ;;  %8232 = vmatprep.subr.bf16.mxu1 %v12359_v51  ;;  %v12422_v47 = vld [vmem:[%s17434_s1 + $0x11a4] ss:$12 sps:$4 sm:$0xff]   ;;  %v12417_v51 = vld [vmem:[%s17434_s1 + $0x8a0] ss:$12 sps:$4 sm:$0xff]  }
 0x149   :  { %8478 = vmatprep.subr.bf16.mxu0 %v12362_v52  ;;  %v12420_v52 = vld [vmem:[%s17434_s1 + $0x11a0] ss:$12 sps:$4 sm:$0xff]  }
 0x14b   :  { %8233 = vmatpush1.bf16.msra.mxu1 %v12357_v54  ;;  %v12425_v54 = vld [vmem:[%s17434_s1 + $0x8bc] ss:$12 sps:$4 sm:$0xff]  }
 0x14c   :  { %8479 = vmatpush1.bf16.msra.mxu0 %v12360_v55  ;;  %8234 = vmatprep.subr.bf16.mxu1 %v12365_v56  ;;  %v12428_v55 = vld [vmem:[%s17434_s1 + $0x11bc] ss:$12 sps:$4 sm:$0xff]   ;;  %v12423_v56 = vld [vmem:[%s17434_s1 + $0x8b8] ss:$12 sps:$4 sm:$0xff]  }
 0x14d   :  { %8480 = vmatprep.subr.bf16.mxu0 %v12368_v57  ;;  %v12426_v57 = vld [vmem:[%s17434_s1 + $0x11b8] ss:$12 sps:$4 sm:$0xff]  }
 0x14f   :  { %8235 = vmatpush1.bf16.msra.mxu1 %v12363_v58  ;;  %v12431_v58 = vld [vmem:[%s17434_s1 + $0x8d4] ss:$12 sps:$4 sm:$0xff]  }
 0x150   :  { %8481 = vmatpush1.bf16.msra.mxu0 %v12366_v59  ;;  %8236 = vmatprep.subr.bf16.mxu1 %v12371_v60  ;;  %v12434_v59 = vld [vmem:[%s17434_s1 + $0x11d4] ss:$12 sps:$4 sm:$0xff]   ;;  %v12429_v60 = vld [vmem:[%s17434_s1 + $0x8d0] ss:$12 sps:$4 sm:$0xff]  }
 0x151   :  { %8482 = vmatprep.subr.bf16.mxu0 %v12374_v61  ;;  %v12432_v61 = vld [vmem:[%s17434_s1 + $0x11d0] ss:$12 sps:$4 sm:$0xff]  }
 0x153   :  { %8237 = vmatpush1.bf16.msra.mxu1 %v12369_v62  ;;  %v12437_v62 = vld [vmem:[%s17434_s1 + $0x8ec] ss:$12 sps:$4 sm:$0xff]  }
 0x154   :  { %8483 = vmatpush1.bf16.msra.mxu0 %v12372_v63  ;;  %8238 = vmatprep.subr.bf16.mxu1 %v12377_v0  ;;  %v12440_v63 = vld [vmem:[%s17434_s1 + $0x11ec] ss:$12 sps:$4 sm:$0xff]   ;;  %v12435_v0 = vld [vmem:[%s17434_s1 + $0x8e8] ss:$12 sps:$4 sm:$0xff]  }
 0x155   :  { %8484 = vmatprep.subr.bf16.mxu0 %v12380_v1  ;;  %v12438_v1 = vld [vmem:[%s17434_s1 + $0x11e8] ss:$12 sps:$4 sm:$0xff]  }
 0x157   :  { %8239 = vmatpush1.bf16.msra.mxu1 %v12375_v4  ;;  %v25_v4 = vld [vmem:[%s17435_s0 + $0x50] sm:$0xff] }
 0x158   :  { %8485 = vmatpush1.bf16.msra.mxu0 %v12378_v5  ;;  %8240 = vmatprep.subr.bf16.mxu1 %v12383_v6  ;;  %v12443_v5 = vld [vmem:[%s17434_s1 + $0x1204] ss:$12 sps:$4 sm:$0xff]  }
 0x159   :  { %8486 = vmatprep.subr.bf16.mxu0 %v12386_v7  ;;  %v37_v6 = vld [vmem:[%s17435_s0 + $0xb0] sm:$0xff] }
 0x15a   :  { %v12444_v7 = vld [vmem:[%s17434_s1 + $0xc8] ss:$12 sps:$4 sm:$0xff]  }
 0x15b   :  { %8241 = vmatpush1.bf16.msra.mxu1 %v12381_v12  ;;  %v40_v12 = vld [vmem:[%s17435_s0 + $0xc8] sm:$0xff] }
 0x15c   :  { %8487 = vmatpush1.bf16.msra.mxu0 %v12384_v13  ;;  %8242 = vmatprep.subr.bf16.mxu1 %v12389_v14  ;;  %v14762_v13 = vpack.c.bf16 %v25_v4, %v25_v4  ;;  %v14764_v14 = vpack.c.bf16 %v37_v6, %v37_v6  ;;  %v12489_v4 = vld [vmem:[%s17434_s1 + $0x260] ss:$12 sps:$4 sm:$0xff]  }
 0x15d   :  { %8488 = vmatprep.subr.bf16.mxu0 %v12392_v15  ;;  %v12441_v15 = vld [vmem:[%s17434_s1 + $0x1200] ss:$12 sps:$4 sm:$0xff]  }
 0x15e   :  { %v12490_v6 = vld [vmem:[%s17434_s1 + $0x1a0] ss:$12 sps:$4 sm:$0xff]  }
 0x15f   :  { %8243 = vmatpush1.bf16.msra.mxu1 %v12387_v16  ;;  %v12445_v16 = vld [vmem:[%s17434_s1 + $0x8] ss:$12 sps:$4 sm:$0xff]  }
 0x160   :  { %8489 = vmatpush1.bf16.msra.mxu0 %v12390_v17  ;;  %8244 = vmatprep.subr.bf16.mxu1 %v12395_v18  ;;  %v12448_v17 = vld [vmem:[%s17434_s1 + $0x121c] ss:$12 sps:$4 sm:$0xff]   ;;  %v12449_v18 = vld [vmem:[%s17434_s1 + $0xe0] ss:$12 sps:$4 sm:$0xff]  }
 0x161   :  { %8490 = vmatprep.subr.bf16.mxu0 %v12398_v19  ;;  %v12446_v19 = vld [vmem:[%s17434_s1 + $0x1218] ss:$12 sps:$4 sm:$0xff]  }
 0x163   :  { %8245 = vmatpush1.bf16.msra.mxu1 %v12393_v20  ;;  %v14781_v20 = vpack.c.bf16 %v40_v12, %v40_v12  ;;  %v12494_v12 = vld [vmem:[%s17434_s1 + $0x278] ss:$12 sps:$4 sm:$0xff]  }
 0x164   :  { %8491 = vmatpush1.bf16.msra.mxu0 %v12396_v21  ;;  %8246 = vmatprep.subr.bf16.mxu1 %v12401_v24  ;;  %v12450_v21 = vld [vmem:[%s17434_s1 + $0x20] ss:$12 sps:$4 sm:$0xff]  }
 0x165   :  { %8492 = vmatprep.subr.bf16.mxu0 %v12404_v25  ;;  %v12453_v24 = vld [vmem:[%s17434_s1 + $0x1234] ss:$12 sps:$4 sm:$0xff]   ;;  %v12454_v25 = vld [vmem:[%s17434_s1 + $0xf8] ss:$12 sps:$4 sm:$0xff]  }
 0x167   :  { %8247 = vmatpush1.bf16.msra.mxu1 %v12399_v26  ;;  %v12451_v26 = vld [vmem:[%s17434_s1 + $0x1230] ss:$12 sps:$4 sm:$0xff]  }
 0x168   :  { %8493 = vmatpush1.bf16.msra.mxu0 %v12402_v27  ;;  %8248 = vmatprep.subr.bf16.mxu1 %v12407_v29  ;;  %v12455_v27 = vld [vmem:[%s17434_s1 + $0x38] ss:$12 sps:$4 sm:$0xff]  }
 0x169   :  { %8494 = vmatprep.subr.bf16.mxu0 %v12410_v30  ;;  %v12458_v29 = vld [vmem:[%s17434_s1 + $0x124c] ss:$12 sps:$4 sm:$0xff]   ;;  %v12459_v30 = vld [vmem:[%s17434_s1 + $0x110] ss:$12 sps:$4 sm:$0xff]  }
 0x16b   :  { %8249 = vmatpush1.bf16.msra.mxu1 %v12405_v31  ;;  %v12460_v31 = vld [vmem:[%s17434_s1 + $0x50] ss:$12 sps:$4 sm:$0xff]  }
 0x16c   :  { %8495 = vmatpush1.bf16.msra.mxu0 %v12408_v32  ;;  %8250 = vmatprep.subr.bf16.mxu1 %v12413_v37  ;;  %v12463_v32 = vld [vmem:[%s17434_s1 + $0x1264] ss:$12 sps:$4 sm:$0xff]   ;;  %v12464_v37 = vld [vmem:[%s17434_s1 + $0x128] ss:$12 sps:$4 sm:$0xff]  }
 0x16d   :  { %8496 = vmatprep.subr.bf16.mxu0 %v12416_v38  ;;  %v12461_v38 = vld [vmem:[%s17434_s1 + $0x1260] ss:$12 sps:$4 sm:$0xff]  }
 0x16f   :  { %8251 = vmatpush1.bf16.msra.mxu1 %v12411_v39  ;;  %v12465_v39 = vld [vmem:[%s17434_s1 + $0x68] ss:$12 sps:$4 sm:$0xff]  }
 0x170   :  { %8497 = vmatpush1.bf16.msra.mxu0 %v12414_v40  ;;  %8252 = vmatprep.subr.bf16.mxu1 %v12419_v44  ;;  %v12468_v40 = vld [vmem:[%s17434_s1 + $0x127c] ss:$12 sps:$4 sm:$0xff]   ;;  %v12469_v44 = vld [vmem:[%s17434_s1 + $0x140] ss:$12 sps:$4 sm:$0xff]  }
 0x171   :  { %8498 = vmatprep.subr.bf16.mxu0 %v12422_v47  ;;  %v12466_v47 = vld [vmem:[%s17434_s1 + $0x1278] ss:$12 sps:$4 sm:$0xff]  }
 0x173   :  { %8253 = vmatpush1.bf16.msra.mxu1 %v12417_v51  ;;  %v12470_v51 = vld [vmem:[%s17434_s1 + $0x80] ss:$12 sps:$4 sm:$0xff]  }
 0x174   :  { %8499 = vmatpush1.bf16.msra.mxu0 %v12420_v52  ;;  %8254 = vmatprep.subr.bf16.mxu1 %v12425_v54  ;;  %v12473_v52 = vld [vmem:[%s17434_s1 + $0x1294] ss:$12 sps:$4 sm:$0xff]   ;;  %v12474_v54 = vld [vmem:[%s17434_s1 + $0x158] ss:$12 sps:$4 sm:$0xff]  }
 0x175   :  { %8500 = vmatprep.subr.bf16.mxu0 %v12428_v55  ;;  %v12471_v55 = vld [vmem:[%s17434_s1 + $0x1290] ss:$12 sps:$4 sm:$0xff]  }
 0x177   :  { %8255 = vmatpush1.bf16.msra.mxu1 %v12423_v56  ;;  %v12475_v56 = vld [vmem:[%s17434_s1 + $0x98] ss:$12 sps:$4 sm:$0xff]  }
 0x178   :  { %8501 = vmatpush1.bf16.msra.mxu0 %v12426_v57  ;;  %8256 = vmatprep.subr.bf16.mxu1 %v12431_v58  ;;  %v12478_v57 = vld [vmem:[%s17434_s1 + $0x12ac] ss:$12 sps:$4 sm:$0xff]   ;;  %v12479_v58 = vld [vmem:[%s17434_s1 + $0x170] ss:$12 sps:$4 sm:$0xff]  }
 0x179   :  { %8502 = vmatprep.subr.bf16.mxu0 %v12434_v59  ;;  %v12476_v59 = vld [vmem:[%s17434_s1 + $0x12a8] ss:$12 sps:$4 sm:$0xff]  }
 0x17b   :  { %8257 = vmatpush1.bf16.msra.mxu1 %v12429_v60  ;;  %v12480_v60 = vld [vmem:[%s17434_s1 + $0xb0] ss:$12 sps:$4 sm:$0xff]  }
 0x17c   :  { %8503 = vmatpush1.bf16.msra.mxu0 %v12432_v61  ;;  %8258 = vmatprep.subr.bf16.mxu1 %v12437_v62  ;;  %v12483_v61 = vld [vmem:[%s17434_s1 + $0x12c4] ss:$12 sps:$4 sm:$0xff]   ;;  %v12484_v62 = vld [vmem:[%s17434_s1 + $0x248] ss:$12 sps:$4 sm:$0xff]  }
 0x17d   :  { %8504 = vmatprep.subr.bf16.mxu0 %v12440_v63  ;;  %v12481_v63 = vld [vmem:[%s17434_s1 + $0x12c0] ss:$12 sps:$4 sm:$0xff]  }
 0x17f   :  { %8259 = vmatpush1.bf16.msra.mxu1 %v12435_v0  ;;  %v12485_v0 = vld [vmem:[%s17434_s1 + $0x188] ss:$12 sps:$4 sm:$0xff]  }
 0x180   :  { %8505 = vmatpush1.bf16.msra.mxu0 %v12438_v1  ;;  %11240 = vmatprep.subr.bf16.mxu1 %v12444_v7  ;;  %v12488_v1 = vld [vmem:[%s17434_s1 + $0x12dc] ss:$12 sps:$4 sm:$0xff]   ;;  %v12493_v7 = vld [vmem:[%s17434_s1 + $0x12f4] ss:$12 sps:$4 sm:$0xff]  }
 0x181   :  { %8515 = vmatprep.subr.bf16.mxu0 %v12443_v5  ;;  %v12486_v5 = vld [vmem:[%s17434_s1 + $0x12d8] ss:$12 sps:$4 sm:$0xff]  }
 0x182   :  { %8261 = vmatmul.mubr.bf16.vlgmr.msra.gmra.mrb[0].mxu1 %v14762_v13 }
 0x183   :  { %8507 = vmatmul.mubr.bf16.vlgmr.msra.gmra.mrb[0].mxu0 %v14764_v14  ;;  %11241 = vmatpush3.bf16.msra.mxu1 %v12445_v16  ;;  %v12498_v16 = vld [vmem:[%s17434_s1 + $0x130c] ss:$12 sps:$4 sm:$0xff]  }
 0x184   :  { %8516 = vmatpush1.bf16.msra.mxu0 %v12441_v15  ;;  %11242 = vmatprep.subr.bf16.mxu1 %v12449_v18  ;;  %v12495_v15 = vld [vmem:[%s17434_s1 + $0x1b8] ss:$12 sps:$4 sm:$0xff]   ;;  %v12500_v18 = vld [vmem:[%s17434_s1 + $0x1d0] ss:$12 sps:$4 sm:$0xff]  }
 0x185   :  { %8517 = vmatprep.subr.bf16.mxu0 %v12448_v17  ;;  %9080 = vmatprep.mubr.bf16.mxu1 %v13607_v48  ;;  %v12456_v48 = vld [vmem:[%s17434_s1 + $0x1248] ss:$12 sps:$4 sm:$0xff]   ;;  %v12499_v17 = vld [vmem:[%s17434_s1 + $0x290] ss:$12 sps:$4 sm:$0xff]  }
 0x186   :  { %8547 = vmatprep.mubr.bf16.mxu0 %v14781_v20 }
 0x187   :  { %11243 = vmatpush3.bf16.msra.mxu1 %v12450_v21  ;;  %v12504_v21 = vld [vmem:[%s17434_s1 + $0x2a8] ss:$12 sps:$4 sm:$0xff]  }
 0x188   :  { %8518 = vmatpush1.bf16.msra.mxu0 %v12446_v19  ;;  %11244 = vmatprep.subr.bf16.mxu1 %v12454_v25  ;;  %v12503_v19 = vld [vmem:[%s17434_s1 + $0x1324] ss:$12 sps:$4 sm:$0xff]   ;;  %v12505_v25 = vld [vmem:[%s17434_s1 + $0x1e8] ss:$12 sps:$4 sm:$0xff]  }
 0x189   :  { %8519 = vmatprep.subr.bf16.mxu0 %v12453_v24  ;;  %v12501_v24 = vld [vmem:[%s17434_s1 + $0x1320] ss:$12 sps:$4 sm:$0xff]  }
 0x18b   :  { %11245 = vmatpush3.bf16.msra.mxu1 %v12455_v27  ;;  %v12509_v27 = vld [vmem:[%s17434_s1 + $0x2c0] ss:$12 sps:$4 sm:$0xff]  }
 0x18c   :  { %8520 = vmatpush1.bf16.msra.mxu0 %v12451_v26  ;;  %11246 = vmatprep.subr.bf16.mxu1 %v12459_v30  ;;  %v12508_v26 = vld [vmem:[%s17434_s1 + $0x133c] ss:$12 sps:$4 sm:$0xff]   ;;  %v12510_v30 = vld [vmem:[%s17434_s1 + $0x200] ss:$12 sps:$4 sm:$0xff]  }
 0x18d   :  { %8521 = vmatprep.subr.bf16.mxu0 %v12458_v29  ;;  %v12506_v29 = vld [vmem:[%s17434_s1 + $0x1338] ss:$12 sps:$4 sm:$0xff]  }
 0x18f   :  { %11247 = vmatpush3.bf16.msra.mxu1 %v12460_v31  ;;  %v12514_v31 = vld [vmem:[%s17434_s1 + $0x2d8] ss:$12 sps:$4 sm:$0xff]  }
 0x190   :  { %8522 = vmatpush1.bf16.msra.mxu0 %v12456_v48  ;;  %11248 = vmatprep.subr.bf16.mxu1 %v12464_v37  ;;  %v12513_v48 = vld [vmem:[%s17434_s1 + $0x1354] ss:$12 sps:$4 sm:$0xff]   ;;  %v12515_v37 = vld [vmem:[%s17434_s1 + $0x218] ss:$12 sps:$4 sm:$0xff]  }
 0x191   :  { %8523 = vmatprep.subr.bf16.mxu0 %v12463_v32  ;;  %v12511_v32 = vld [vmem:[%s17434_s1 + $0x1350] ss:$12 sps:$4 sm:$0xff]  }
 0x193   :  { %11249 = vmatpush3.bf16.msra.mxu1 %v12465_v39  ;;  %v12519_v39 = vld [vmem:[%s17434_s1 + $0x2f0] ss:$12 sps:$4 sm:$0xff]  }
 0x194   :  { %8524 = vmatpush1.bf16.msra.mxu0 %v12461_v38  ;;  %11250 = vmatprep.subr.bf16.mxu1 %v12469_v44  ;;  %v12518_v38 = vld [vmem:[%s17434_s1 + $0x136c] ss:$12 sps:$4 sm:$0xff]   ;;  %v12520_v44 = vld [vmem:[%s17434_s1 + $0x230] ss:$12 sps:$4 sm:$0xff]  }
 0x195   :  { %8525 = vmatprep.subr.bf16.mxu0 %v12468_v40  ;;  %v12516_v40 = vld [vmem:[%s17434_s1 + $0x1368] ss:$12 sps:$4 sm:$0xff]  }
 0x197   :  { %11251 = vmatpush3.bf16.msra.mxu1 %v12470_v51  ;;  %v39_v51 = vld [vmem:[%s17435_s0 + $0xc0] sm:$0xff] }
 0x198   :  { %8526 = vmatpush1.bf16.msra.mxu0 %v12466_v47  ;;  %11252 = vmatprep.subr.bf16.mxu1 %v12474_v54  ;;  %v12523_v47 = vld [vmem:[%s17434_s1 + $0x1384] ss:$12 sps:$4 sm:$0xff]   ;;  %v42_v54 = vld [vmem:[%s17435_s0 + $0xd8] sm:$0xff] }
 0x199   :  { %8527 = vmatprep.subr.bf16.mxu0 %v12473_v52  ;;  %v12524_v52 = vld [vmem:[%s17434_s1 + $0x3c8] ss:$12 sps:$4 sm:$0xff]  }
 0x19b   :  { %11253 = vmatpush3.bf16.msra.mxu1 %v12475_v56  ;;  %v12521_v56 = vld [vmem:[%s17434_s1 + $0x1380] ss:$12 sps:$4 sm:$0xff]  }
 0x19c   :  { %8528 = vmatpush1.bf16.msra.mxu0 %v12471_v55  ;;  %11254 = vmatprep.subr.bf16.mxu1 %v12479_v58  ;;  %v14972_v55 = vpack.c.bf16 %v39_v51, %v39_v51  ;;  %v12528_v58 = vld [vmem:[%s17434_s1 + $0x139c] ss:$12 sps:$4 sm:$0xff]   ;;  %v12574_v51 = vld [vmem:[%s17434_s1 + $0x578] ss:$12 sps:$4 sm:$0xff]  }
 0x19d   :  { %8529 = vmatprep.subr.bf16.mxu0 %v12478_v57  ;;  %v12525_v57 = vld [vmem:[%s17434_s1 + $0x308] ss:$12 sps:$4 sm:$0xff]  }
 0x19f   :  { %11255 = vmatpush3.bf16.msra.mxu1 %v12480_v60  ;;  %v12526_v60 = vld [vmem:[%s17434_s1 + $0x1398] ss:$12 sps:$4 sm:$0xff]  }
 0x1a0   :  { %8530 = vmatpush1.bf16.msra.mxu0 %v12476_v59  ;;  %11262 = vmatprep.subr.bf16.mxu1 %v12484_v62  ;;  %v12529_v59 = vld [vmem:[%s17434_s1 + $0x3e0] ss:$12 sps:$4 sm:$0xff]  }
 0x1a1   :  { %8531 = vmatprep.subr.bf16.mxu0 %v12483_v61  ;;  %v14989_v61 = vpack.c.bf16 %v42_v54, %v42_v54  ;;  %v12530_v62 = vld [vmem:[%s17434_s1 + $0x320] ss:$12 sps:$4 sm:$0xff]  }
 0x1a2   :  { %9081 = vmatmul.mubr.bf16.vlgmr.msra.gmra.mrb[4].mxu1 %v13685_v10  ;;  %v12491_v10 = vld [vmem:[%s17434_s1 + $0x12f0] ss:$12 sps:$4 sm:$0xff]   ;;  %v12578_v54 = vld [vmem:[%s17434_s1 + $0x148c] ss:$12 sps:$4 sm:$0xff]  }
 0x1a3   :  { %11263 = vmatpush3.bf16.msra.mxu1 %v12485_v0  ;;  %9120 = vmatprep.mubr.bf16.mxu1 %v13763_v36  ;;  %v12496_v36 = vld [vmem:[%s17434_s1 + $0x1308] ss:$12 sps:$4 sm:$0xff]   ;;  %v12534_v0 = vld [vmem:[%s17434_s1 + $0x3f8] ss:$12 sps:$4 sm:$0xff]  }
 0x1a4   :  { %8532 = vmatpush1.bf16.msra.mxu0 %v12481_v63  ;;  %11264 = vmatprep.subr.bf16.mxu1 %v12489_v4  ;;  %v12533_v63 = vld [vmem:[%s17434_s1 + $0x13b4] ss:$12 sps:$4 sm:$0xff]   ;;  %v12538_v4 = vld [vmem:[%s17434_s1 + $0x13cc] ss:$12 sps:$4 sm:$0xff]  }
 0x1a5   :  { %8533 = vmatprep.subr.bf16.mxu0 %v12488_v1  ;;  %v12535_v1 = vld [vmem:[%s17434_s1 + $0x338] ss:$12 sps:$4 sm:$0xff]  }
 0x1a7   :  { %11265 = vmatpush3.bf16.msra.mxu1 %v12490_v6  ;;  %v12540_v6 = vld [vmem:[%s17434_s1 + $0x350] ss:$12 sps:$4 sm:$0xff]  }
 0x1a8   :  { %8534 = vmatpush1.bf16.msra.mxu0 %v12486_v5  ;;  %11266 = vmatprep.subr.bf16.mxu1 %v12494_v12  ;;  %v12539_v5 = vld [vmem:[%s17434_s1 + $0x410] ss:$12 sps:$4 sm:$0xff]   ;;  %v12544_v12 = vld [vmem:[%s17434_s1 + $0x428] ss:$12 sps:$4 sm:$0xff]  }
 0x1a9   :  { %8535 = vmatprep.subr.bf16.mxu0 %v12493_v7  ;;  %v12543_v7 = vld [vmem:[%s17434_s1 + $0x13e4] ss:$12 sps:$4 sm:$0xff]  }
 0x1ab   :  { %11267 = vmatpush3.bf16.msra.mxu1 %v12495_v15  ;;  %v12545_v15 = vld [vmem:[%s17434_s1 + $0x368] ss:$12 sps:$4 sm:$0xff]  }
 0x1ac   :  { %8536 = vmatpush1.bf16.msra.mxu0 %v12491_v10  ;;  %11268 = vmatprep.subr.bf16.mxu1 %v12499_v17  ;;  %v12541_v10 = vld [vmem:[%s17434_s1 + $0x13e0] ss:$12 sps:$4 sm:$0xff]  }
 0x1ad   :  { %8537 = vmatprep.subr.bf16.mxu0 %v12498_v16  ;;  %v12548_v16 = vld [vmem:[%s17434_s1 + $0x13fc] ss:$12 sps:$4 sm:$0xff]   ;;  %v12549_v17 = vld [vmem:[%s17434_s1 + $0x440] ss:$12 sps:$4 sm:$0xff]  }
 0x1af   :  { %11269 = vmatpush3.bf16.msra.mxu1 %v12500_v18  ;;  %v12550_v18 = vld [vmem:[%s17434_s1 + $0x380] ss:$12 sps:$4 sm:$0xff]  }
 0x1b0   :  { %8538 = vmatpush1.bf16.msra.mxu0 %v12496_v36  ;;  %11270 = vmatprep.subr.bf16.mxu1 %v12504_v21  ;;  %v12546_v36 = vld [vmem:[%s17434_s1 + $0x13f8] ss:$12 sps:$4 sm:$0xff]  }
 0x1b1   :  { %8539 = vmatprep.subr.bf16.mxu0 %v12503_v19  ;;  %v12553_v19 = vld [vmem:[%s17434_s1 + $0x1414] ss:$12 sps:$4 sm:$0xff]   ;;  %v12554_v21 = vld [vmem:[%s17434_s1 + $0x458] ss:$12 sps:$4 sm:$0xff]  }
 0x1b3   :  { %11271 = vmatpush3.bf16.msra.mxu1 %v12505_v25  ;;  %v12555_v25 = vld [vmem:[%s17434_s1 + $0x398] ss:$12 sps:$4 sm:$0xff]  }
 0x1b4   :  { %8540 = vmatpush1.bf16.msra.mxu0 %v12501_v24  ;;  %11272 = vmatprep.subr.bf16.mxu1 %v12509_v27  ;;  %v12551_v24 = vld [vmem:[%s17434_s1 + $0x1410] ss:$12 sps:$4 sm:$0xff]  }
 0x1b5   :  { %8541 = vmatprep.subr.bf16.mxu0 %v12508_v26  ;;  %v12558_v26 = vld [vmem:[%s17434_s1 + $0x142c] ss:$12 sps:$4 sm:$0xff]   ;;  %v12559_v27 = vld [vmem:[%s17434_s1 + $0x470] ss:$12 sps:$4 sm:$0xff]  }
 0x1b7   :  { %11273 = vmatpush3.bf16.msra.mxu1 %v12510_v30  ;;  %v12560_v30 = vld [vmem:[%s17434_s1 + $0x3b0] ss:$12 sps:$4 sm:$0xff]  }
 0x1b8   :  { %8542 = vmatpush1.bf16.msra.mxu0 %v12506_v29  ;;  %11274 = vmatprep.subr.bf16.mxu1 %v12514_v31  ;;  %v12556_v29 = vld [vmem:[%s17434_s1 + $0x1428] ss:$12 sps:$4 sm:$0xff]  }
 0x1b9   :  { %8543 = vmatprep.subr.bf16.mxu0 %v12513_v48  ;;  %v12563_v48 = vld [vmem:[%s17434_s1 + $0x1444] ss:$12 sps:$4 sm:$0xff]   ;;  %v12564_v31 = vld [vmem:[%s17434_s1 + $0x548] ss:$12 sps:$4 sm:$0xff]  }
 0x1bb   :  { %11275 = vmatpush3.bf16.msra.mxu1 %v12515_v37  ;;  %v12565_v37 = vld [vmem:[%s17434_s1 + $0x488] ss:$12 sps:$4 sm:$0xff]  }
 0x1bc   :  { %8544 = vmatpush1.bf16.msra.mxu0 %v12511_v32  ;;  %11276 = vmatprep.subr.bf16.mxu1 %v12519_v39  ;;  %v12561_v32 = vld [vmem:[%s17434_s1 + $0x1440] ss:$12 sps:$4 sm:$0xff]  }
 0x1bd   :  { %8545 = vmatprep.subr.bf16.mxu0 %v12518_v38  ;;  %v12568_v38 = vld [vmem:[%s17434_s1 + $0x145c] ss:$12 sps:$4 sm:$0xff]   ;;  %v12569_v39 = vld [vmem:[%s17434_s1 + $0x560] ss:$12 sps:$4 sm:$0xff]  }
 0x1bf   :  { %11277 = vmatpush3.bf16.msra.mxu1 %v12520_v44  ;;  %v12570_v44 = vld [vmem:[%s17434_s1 + $0x4a0] ss:$12 sps:$4 sm:$0xff]  }
 0x1c0   :  { %8546 = vmatpush1.bf16.msra.mxu0 %v12516_v40  ;;  %11284 = vmatprep.subr.bf16.mxu1 %v12524_v52  ;;  %v12566_v40 = vld [vmem:[%s17434_s1 + $0x1458] ss:$12 sps:$4 sm:$0xff]  }
 0x1c1   :  { %8556 = vmatprep.subr.bf16.mxu0 %v12523_v47  ;;  %v12573_v47 = vld [vmem:[%s17434_s1 + $0x1474] ss:$12 sps:$4 sm:$0xff]   ;;  %v12575_v52 = vld [vmem:[%s17434_s1 + $0x4b8] ss:$12 sps:$4 sm:$0xff]  }
 0x1c2   :  { %9121 = vmatmul.mubr.bf16.vlgmr.msra.gmra.mrb[8].mxu1 %v13901_v22  ;;  %v12531_v22 = vld [vmem:[%s17434_s1 + $0x13b0] ss:$12 sps:$4 sm:$0xff]  }
 0x1c3   :  { %8548 = vmatmul.mubr.bf16.vlgmr.msra.gmra.mrb[0].mxu0 %v14972_v55  ;;  %11285 = vmatpush3.bf16.msra.mxu1 %v12525_v57  ;;  %v12580_v57 = vld [vmem:[%s17434_s1 + $0x4d0] ss:$12 sps:$4 sm:$0xff]  }
 0x1c4   :  { %8557 = vmatpush1.bf16.msra.mxu0 %v12521_v56  ;;  %11286 = vmatprep.subr.bf16.mxu1 %v12529_v59  ;;  %v12579_v56 = vld [vmem:[%s17434_s1 + $0x590] ss:$12 sps:$4 sm:$0xff]   ;;  %v12584_v59 = vld [vmem:[%s17434_s1 + $0x5a8] ss:$12 sps:$4 sm:$0xff]  }
 0x1c5   :  { %8558 = vmatprep.subr.bf16.mxu0 %v12528_v58  ;;  %9160 = vmatprep.mubr.bf16.mxu1 %v13919_v28  ;;  %v12536_v28 = vld [vmem:[%s17434_s1 + $0x13c8] ss:$12 sps:$4 sm:$0xff]   ;;  %v12583_v58 = vld [vmem:[%s17434_s1 + $0x14a4] ss:$12 sps:$4 sm:$0xff]  }
 0x1c6   :  { %8588 = vmatprep.mubr.bf16.mxu0 %v14989_v61 }
 0x1c7   :  { %11287 = vmatpush3.bf16.msra.mxu1 %v12530_v62  ;;  %v12585_v62 = vld [vmem:[%s17434_s1 + $0x4e8] ss:$12 sps:$4 sm:$0xff]  }
 0x1c8   :  { %8559 = vmatpush1.bf16.msra.mxu0 %v12526_v60  ;;  %11288 = vmatprep.subr.bf16.mxu1 %v12534_v0  ;;  %v12581_v60 = vld [vmem:[%s17434_s1 + $0x14a0] ss:$12 sps:$4 sm:$0xff]  }
 0x1c9   :  { %8560 = vmatprep.subr.bf16.mxu0 %v12533_v63  ;;  %v12588_v63 = vld [vmem:[%s17434_s1 + $0x14bc] ss:$12 sps:$4 sm:$0xff]   ;;  %v12589_v0 = vld [vmem:[%s17434_s1 + $0x5c0] ss:$12 sps:$4 sm:$0xff]  }
 0x1cb   :  { %11289 = vmatpush3.bf16.msra.mxu1 %v12535_v1  ;;  %v12590_v1 = vld [vmem:[%s17434_s1 + $0x500] ss:$12 sps:$4 sm:$0xff]  }
 0x1cc   :  { %8561 = vmatpush1.bf16.msra.mxu0 %v12531_v22  ;;  %11290 = vmatprep.subr.bf16.mxu1 %v12539_v5  ;;  %v12586_v22 = vld [vmem:[%s17434_s1 + $0x14b8] ss:$12 sps:$4 sm:$0xff]  }
 0x1cd   :  { %8562 = vmatprep.subr.bf16.mxu0 %v12538_v4  ;;  %v12593_v4 = vld [vmem:[%s17434_s1 + $0x14d4] ss:$12 sps:$4 sm:$0xff]   ;;  %v12594_v5 = vld [vmem:[%s17434_s1 + $0x5d8] ss:$12 sps:$4 sm:$0xff]  }
 0x1cf   :  { %11291 = vmatpush3.bf16.msra.mxu1 %v12540_v6  ;;  %v12595_v6 = vld [vmem:[%s17434_s1 + $0x518] ss:$12 sps:$4 sm:$0xff]  }
 0x1d0   :  { %8563 = vmatpush1.bf16.msra.mxu0 %v12536_v28  ;;  %11292 = vmatprep.subr.bf16.mxu1 %v12544_v12  ;;  %v12591_v28 = vld [vmem:[%s17434_s1 + $0x14d0] ss:$12 sps:$4 sm:$0xff]  }
 0x1d1   :  { %8564 = vmatprep.subr.bf16.mxu0 %v12543_v7  ;;  %v12598_v7 = vld [vmem:[%s17434_s1 + $0x14ec] ss:$12 sps:$4 sm:$0xff]   ;;  %v12599_v12 = vld [vmem:[%s17434_s1 + $0x5f0] ss:$12 sps:$4 sm:$0xff]  }
 0x1d3   :  { %11293 = vmatpush3.bf16.msra.mxu1 %v12545_v15  ;;  %v12600_v15 = vld [vmem:[%s17434_s1 + $0x530] ss:$12 sps:$4 sm:$0xff]  }
 0x1d4   :  { %8565 = vmatpush1.bf16.msra.mxu0 %v12541_v10  ;;  %11294 = vmatprep.subr.bf16.mxu1 %v12549_v17  ;;  %v12596_v10 = vld [vmem:[%s17434_s1 + $0x14e8] ss:$12 sps:$4 sm:$0xff]  }
 0x1d5   :  { %8566 = vmatprep.subr.bf16.mxu0 %v12548_v16  ;;  %v12603_v16 = vld [vmem:[%s17434_s1 + $0x1504] ss:$12 sps:$4 sm:$0xff]  }
 0x1d6   :  { %v41_v17 = vld [vmem:[%s17435_s0 + $0xd0] sm:$0xff] }
 0x1d7   :  { %11295 = vmatpush3.bf16.msra.mxu1 %v12550_v18  ;;  %v44_v18 = vld [vmem:[%s17435_s0 + $0xe8] sm:$0xff] }
 0x1d8   :  { %8567 = vmatpush1.bf16.msra.mxu0 %v12546_v36  ;;  %11296 = vmatprep.subr.bf16.mxu1 %v12554_v21  ;;  %v12604_v36 = vld [vmem:[%s17434_s1 + $0x6c8] ss:$12 sps:$4 sm:$0xff]   ;;  %v12601_v21 = vld [vmem:[%s17434_s1 + $0x1500] ss:$12 sps:$4 sm:$0xff]  }
 0x1d9   :  { %8568 = vmatprep.subr.bf16.mxu0 %v12553_v19  ;;  %v15180_v19 = vpack.c.bf16 %v41_v17, %v41_v17  ;;  %v12658_v17 = vld [vmem:[%s17434_s1 + $0x160c] ss:$12 sps:$4 sm:$0xff]  }
 0x1db   :  { %11297 = vmatpush3.bf16.msra.mxu1 %v12555_v25  ;;  %v12608_v25 = vld [vmem:[%s17434_s1 + $0x151c] ss:$12 sps:$4 sm:$0xff]  }
 0x1dc   :  { %8569 = vmatpush1.bf16.msra.mxu0 %v12551_v24  ;;  %11298 = vmatprep.subr.bf16.mxu1 %v12559_v27  ;;  %v12605_v24 = vld [vmem:[%s17434_s1 + $0x608] ss:$12 sps:$4 sm:$0xff]   ;;  %v12606_v27 = vld [vmem:[%s17434_s1 + $0x1518] ss:$12 sps:$4 sm:$0xff]  }
 0x1dd   :  { %8570 = vmatprep.subr.bf16.mxu0 %v12558_v26  ;;  %v12609_v26 = vld [vmem:[%s17434_s1 + $0x6e0] ss:$12 sps:$4 sm:$0xff]  }
 0x1df   :  { %11299 = vmatpush3.bf16.msra.mxu1 %v12560_v30  ;;  %v12610_v30 = vld [vmem:[%s17434_s1 + $0x620] ss:$12 sps:$4 sm:$0xff]  }
 0x1e0   :  { %8571 = vmatpush1.bf16.msra.mxu0 %v12556_v29  ;;  %11306 = vmatprep.subr.bf16.mxu1 %v12564_v31  ;;  %v15197_v29 = vpack.c.bf16 %v44_v18, %v44_v18  ;;  %v12614_v31 = vld [vmem:[%s17434_s1 + $0x6f8] ss:$12 sps:$4 sm:$0xff]   ;;  %v12660_v18 = vld [vmem:[%s17434_s1 + $0x7d0] ss:$12 sps:$4 sm:$0xff]  }
 0x1e1   :  { %8572 = vmatprep.subr.bf16.mxu0 %v12563_v48  ;;  %v12613_v48 = vld [vmem:[%s17434_s1 + $0x1534] ss:$12 sps:$4 sm:$0xff]  }
 0x1e2   :  { %9161 = vmatmul.mubr.bf16.vlgmr.msra.gmra.mrb[12].mxu1 %v14117_v42  ;;  %v12571_v42 = vld [vmem:[%s17434_s1 + $0x1470] ss:$12 sps:$4 sm:$0xff]  }
 0x1e3   :  { %11307 = vmatpush3.bf16.msra.mxu1 %v12565_v37  ;;  %9200 = vmatprep.mubr.bf16.mxu1 %v14133_v49  ;;  %v12576_v49 = vld [vmem:[%s17434_s1 + $0x1488] ss:$12 sps:$4 sm:$0xff]   ;;  %v12618_v37 = vld [vmem:[%s17434_s1 + $0x154c] ss:$12 sps:$4 sm:$0xff]  }
 0x1e4   :  { %8573 = vmatpush1.bf16.msra.mxu0 %v12561_v32  ;;  %11308 = vmatprep.subr.bf16.mxu1 %v12569_v39  ;;  %v12615_v32 = vld [vmem:[%s17434_s1 + $0x638] ss:$12 sps:$4 sm:$0xff]   ;;  %v12620_v39 = vld [vmem:[%s17434_s1 + $0x650] ss:$12 sps:$4 sm:$0xff]  }
 0x1e5   :  { %8574 = vmatprep.subr.bf16.mxu0 %v12568_v38  ;;  %v12619_v38 = vld [vmem:[%s17434_s1 + $0x710] ss:$12 sps:$4 sm:$0xff]  }
 0x1e7   :  { %11309 = vmatpush3.bf16.msra.mxu1 %v12570_v44  ;;  %v12624_v44 = vld [vmem:[%s17434_s1 + $0x728] ss:$12 sps:$4 sm:$0xff]  }
 0x1e8   :  { %8575 = vmatpush1.bf16.msra.mxu0 %v12566_v40  ;;  %11310 = vmatprep.subr.bf16.mxu1 %v12574_v51  ;;  %v12623_v40 = vld [vmem:[%s17434_s1 + $0x1564] ss:$12 sps:$4 sm:$0xff]   ;;  %v12625_v51 = vld [vmem:[%s17434_s1 + $0x668] ss:$12 sps:$4 sm:$0xff]  }
 0x1e9   :  { %8576 = vmatprep.subr.bf16.mxu0 %v12573_v47  ;;  %v12621_v47 = vld [vmem:[%s17434_s1 + $0x1560] ss:$12 sps:$4 sm:$0xff]  }
 0x1eb   :  { %11311 = vmatpush3.bf16.msra.mxu1 %v12575_v52  ;;  %v12629_v52 = vld [vmem:[%s17434_s1 + $0x740] ss:$12 sps:$4 sm:$0xff]  }
 0x1ec   :  { %8577 = vmatpush1.bf16.msra.mxu0 %v12571_v42  ;;  %11312 = vmatprep.subr.bf16.mxu1 %v12579_v56  ;;  %v12628_v42 = vld [vmem:[%s17434_s1 + $0x157c] ss:$12 sps:$4 sm:$0xff]   ;;  %v12630_v56 = vld [vmem:[%s17434_s1 + $0x680] ss:$12 sps:$4 sm:$0xff]  }
 0x1ed   :  { %8578 = vmatprep.subr.bf16.mxu0 %v12578_v54  ;;  %v12626_v54 = vld [vmem:[%s17434_s1 + $0x1578] ss:$12 sps:$4 sm:$0xff]  }
 0x1ef   :  { %11313 = vmatpush3.bf16.msra.mxu1 %v12580_v57  ;;  %v12634_v57 = vld [vmem:[%s17434_s1 + $0x758] ss:$12 sps:$4 sm:$0xff]  }
 0x1f0   :  { %8579 = vmatpush1.bf16.msra.mxu0 %v12576_v49  ;;  %11314 = vmatprep.subr.bf16.mxu1 %v12584_v59  ;;  %v12633_v49 = vld [vmem:[%s17434_s1 + $0x1594] ss:$12 sps:$4 sm:$0xff]   ;;  %v12635_v59 = vld [vmem:[%s17434_s1 + $0x698] ss:$12 sps:$4 sm:$0xff]  }
 0x1f1   :  { %8580 = vmatprep.subr.bf16.mxu0 %v12583_v58  ;;  %v12631_v58 = vld [vmem:[%s17434_s1 + $0x1590] ss:$12 sps:$4 sm:$0xff]  }
 0x1f3   :  { %11315 = vmatpush3.bf16.msra.mxu1 %v12585_v62  ;;  %v12639_v62 = vld [vmem:[%s17434_s1 + $0x770] ss:$12 sps:$4 sm:$0xff]  }
 0x1f4   :  { %8581 = vmatpush1.bf16.msra.mxu0 %v12581_v60  ;;  %11316 = vmatprep.subr.bf16.mxu1 %v12589_v0  ;;  %v12638_v60 = vld [vmem:[%s17434_s1 + $0x15ac] ss:$12 sps:$4 sm:$0xff]   ;;  %v12640_v0 = vld [vmem:[%s17434_s1 + $0x6b0] ss:$12 sps:$4 sm:$0xff]  }
 0x1f5   :  { %8582 = vmatprep.subr.bf16.mxu0 %v12588_v63  ;;  %v12636_v63 = vld [vmem:[%s17434_s1 + $0x15a8] ss:$12 sps:$4 sm:$0xff]  }
 0x1f7   :  { %11317 = vmatpush3.bf16.msra.mxu1 %v12590_v1  ;;  %v12644_v1 = vld [vmem:[%s17434_s1 + $0x848] ss:$12 sps:$4 sm:$0xff]  }
 0x1f8   :  { %8583 = vmatpush1.bf16.msra.mxu0 %v12586_v22  ;;  %11318 = vmatprep.subr.bf16.mxu1 %v12594_v5  ;;  %v12643_v22 = vld [vmem:[%s17434_s1 + $0x15c4] ss:$12 sps:$4 sm:$0xff]   ;;  %v12645_v5 = vld [vmem:[%s17434_s1 + $0x788] ss:$12 sps:$4 sm:$0xff]  }
 0x1f9   :  { %8584 = vmatprep.subr.bf16.mxu0 %v12593_v4  ;;  %v12641_v4 = vld [vmem:[%s17434_s1 + $0x15c0] ss:$12 sps:$4 sm:$0xff]  }
 0x1fb   :  { %11319 = vmatpush3.bf16.msra.mxu1 %v12595_v6  ;;  %v12649_v6 = vld [vmem:[%s17434_s1 + $0x860] ss:$12 sps:$4 sm:$0xff]  }
 0x1fc   :  { %8585 = vmatpush1.bf16.msra.mxu0 %v12591_v28  ;;  %11320 = vmatprep.subr.bf16.mxu1 %v12599_v12  ;;  %v12648_v28 = vld [vmem:[%s17434_s1 + $0x15dc] ss:$12 sps:$4 sm:$0xff]   ;;  %v12650_v12 = vld [vmem:[%s17434_s1 + $0x7a0] ss:$12 sps:$4 sm:$0xff]  }
 0x1fd   :  { %8586 = vmatprep.subr.bf16.mxu0 %v12598_v7  ;;  %v12646_v7 = vld [vmem:[%s17434_s1 + $0x15d8] ss:$12 sps:$4 sm:$0xff]  }
 0x1ff   :  { %11321 = vmatpush3.bf16.msra.mxu1 %v12600_v15  ;;  %v12654_v15 = vld [vmem:[%s17434_s1 + $0x878] ss:$12 sps:$4 sm:$0xff]  }
 0x200   :  { %8587 = vmatpush1.bf16.msra.mxu0 %v12596_v10  ;;  %11328 = vmatprep.subr.bf16.mxu1 %v12604_v36  ;;  %v12653_v10 = vld [vmem:[%s17434_s1 + $0x15f4] ss:$12 sps:$4 sm:$0xff]   ;;  %v12659_v36 = vld [vmem:[%s17434_s1 + $0x890] ss:$12 sps:$4 sm:$0xff]  }
 0x201   :  { %8597 = vmatprep.subr.bf16.mxu0 %v12603_v16  ;;  %v12655_v16 = vld [vmem:[%s17434_s1 + $0x7b8] ss:$12 sps:$4 sm:$0xff]  }
 0x202   :  { %9201 = vmatmul.mubr.bf16.vlgmr.msra.gmra.mrb[16].mxu1 %v14333_v2  ;;  %v12611_v2 = vld [vmem:[%s17434_s1 + $0x1530] ss:$12 sps:$4 sm:$0xff]  }
 0x203   :  { %8589 = vmatmul.mubr.bf16.vlgmr.msra.gmra.mrb[0].mxu0 %v15180_v19  ;;  %11329 = vmatpush3.bf16.msra.mxu1 %v12605_v24  ;;  %v12664_v24 = vld [vmem:[%s17434_s1 + $0x8a8] ss:$12 sps:$4 sm:$0xff]  }
 0x204   :  { %8598 = vmatpush1.bf16.msra.mxu0 %v12601_v21  ;;  %11330 = vmatprep.subr.bf16.mxu1 %v12609_v26  ;;  %v12663_v21 = vld [vmem:[%s17434_s1 + $0x1624] ss:$12 sps:$4 sm:$0xff]   ;;  %v12665_v26 = vld [vmem:[%s17434_s1 + $0x7e8] ss:$12 sps:$4 sm:$0xff]  }
 0x205   :  { %8599 = vmatprep.subr.bf16.mxu0 %v12608_v25  ;;  %9240 = vmatprep.mubr.bf16.mxu1 %v14349_v8  ;;  %v12616_v8 = vld [vmem:[%s17434_s1 + $0x1548] ss:$12 sps:$4 sm:$0xff]   ;;  %v12661_v25 = vld [vmem:[%s17434_s1 + $0x1620] ss:$12 sps:$4 sm:$0xff]  }
 0x206   :  { %8629 = vmatprep.mubr.bf16.mxu0 %v15197_v29 }
 0x207   :  { %11331 = vmatpush3.bf16.msra.mxu1 %v12610_v30  ;;  %v12669_v30 = vld [vmem:[%s17434_s1 + $0x8c0] ss:$12 sps:$4 sm:$0xff]  }
 0x208   :  { %8600 = vmatpush1.bf16.msra.mxu0 %v12606_v27  ;;  %11332 = vmatprep.subr.bf16.mxu1 %v12614_v31  ;;  %v12668_v27 = vld [vmem:[%s17434_s1 + $0x163c] ss:$12 sps:$4 sm:$0xff]   ;;  %v12670_v31 = vld [vmem:[%s17434_s1 + $0x800] ss:$12 sps:$4 sm:$0xff]  }
 0x209   :  { %8601 = vmatprep.subr.bf16.mxu0 %v12613_v48  ;;  %v12666_v48 = vld [vmem:[%s17434_s1 + $0x1638] ss:$12 sps:$4 sm:$0xff]  }
 0x20b   :  { %11333 = vmatpush3.bf16.msra.mxu1 %v12615_v32  ;;  %v12674_v32 = vld [vmem:[%s17434_s1 + $0x8d8] ss:$12 sps:$4 sm:$0xff]  }
 0x20c   :  { %8602 = vmatpush1.bf16.msra.mxu0 %v12611_v2  ;;  %11334 = vmatprep.subr.bf16.mxu1 %v12619_v38  ;;  %v12673_v2 = vld [vmem:[%s17434_s1 + $0x1654] ss:$12 sps:$4 sm:$0xff]   ;;  %v12675_v38 = vld [vmem:[%s17434_s1 + $0x818] ss:$12 sps:$4 sm:$0xff]  }
 0x20d   :  { %8603 = vmatprep.subr.bf16.mxu0 %v12618_v37  ;;  %v12671_v37 = vld [vmem:[%s17434_s1 + $0x1650] ss:$12 sps:$4 sm:$0xff]  }
 0x20f   :  { %11335 = vmatpush3.bf16.msra.mxu1 %v12620_v39  ;;  %v12679_v39 = vld [vmem:[%s17434_s1 + $0x8f0] ss:$12 sps:$4 sm:$0xff]  }
 0x210   :  { %8604 = vmatpush1.bf16.msra.mxu0 %v12616_v8  ;;  %11336 = vmatprep.subr.bf16.mxu1 %v12624_v44  ;;  %v12678_v8 = vld [vmem:[%s17434_s1 + $0x166c] ss:$12 sps:$4 sm:$0xff]   ;;  %v12680_v44 = vld [vmem:[%s17434_s1 + $0x830] ss:$12 sps:$4 sm:$0xff]  }
 0x211   :  { %8605 = vmatprep.subr.bf16.mxu0 %v12623_v40  ;;  %v12676_v40 = vld [vmem:[%s17434_s1 + $0x1668] ss:$12 sps:$4 sm:$0xff]  }
 0x213   :  { %11337 = vmatpush3.bf16.msra.mxu1 %v12625_v51  ;;  %v43_v51 = vld [vmem:[%s17435_s0 + $0xe0] sm:$0xff] }
 0x214   :  { %8606 = vmatpush1.bf16.msra.mxu0 %v12621_v47  ;;  %11338 = vmatprep.subr.bf16.mxu1 %v12629_v52  ;;  %v12683_v47 = vld [vmem:[%s17434_s1 + $0x1684] ss:$12 sps:$4 sm:$0xff]   ;;  %v46_v52 = vld [vmem:[%s17435_s0 + $0xf8] sm:$0xff] }
 0x215   :  { %8607 = vmatprep.subr.bf16.mxu0 %v12628_v42  ;;  %v12684_v42 = vld [vmem:[%s17434_s1 + $0x9c8] ss:$12 sps:$4 sm:$0xff]  }
 0x217   :  { %11339 = vmatpush3.bf16.msra.mxu1 %v12630_v56  ;;  %v12681_v56 = vld [vmem:[%s17434_s1 + $0x1680] ss:$12 sps:$4 sm:$0xff]  }
 0x218   :  { %8608 = vmatpush1.bf16.msra.mxu0 %v12626_v54  ;;  %11340 = vmatprep.subr.bf16.mxu1 %v12634_v57  ;;  %v15388_v54 = vpack.c.bf16 %v43_v51, %v43_v51  ;;  %v12688_v57 = vld [vmem:[%s17434_s1 + $0x169c] ss:$12 sps:$4 sm:$0xff]   ;;  %v12734_v51 = vld [vmem:[%s17434_s1 + $0xb78] ss:$12 sps:$4 sm:$0xff]  }
 0x219   :  { %8609 = vmatprep.subr.bf16.mxu0 %v12633_v49  ;;  %v12685_v49 = vld [vmem:[%s17434_s1 + $0x908] ss:$12 sps:$4 sm:$0xff]  }
 0x21b   :  { %11341 = vmatpush3.bf16.msra.mxu1 %v12635_v59  ;;  %v12686_v59 = vld [vmem:[%s17434_s1 + $0x1698] ss:$12 sps:$4 sm:$0xff]  }
 0x21c   :  { %8610 = vmatpush1.bf16.msra.mxu0 %v12631_v58  ;;  %11342 = vmatprep.subr.bf16.mxu1 %v12639_v62  ;;  %v12689_v58 = vld [vmem:[%s17434_s1 + $0x9e0] ss:$12 sps:$4 sm:$0xff]  }
 0x21d   :  { %8611 = vmatprep.subr.bf16.mxu0 %v12638_v60  ;;  %v15405_v60 = vpack.c.bf16 %v46_v52, %v46_v52  ;;  %v12690_v62 = vld [vmem:[%s17434_s1 + $0x920] ss:$12 sps:$4 sm:$0xff]  }
 0x21e   :  { %v12738_v52 = vld [vmem:[%s17434_s1 + $0x178c] ss:$12 sps:$4 sm:$0xff]  }
 0x21f   :  { %11343 = vmatpush3.bf16.msra.mxu1 %v12640_v0  ;;  %v12694_v0 = vld [vmem:[%s17434_s1 + $0x9f8] ss:$12 sps:$4 sm:$0xff]  }
 0x220   :  { %8612 = vmatpush1.bf16.msra.mxu0 %v12636_v63  ;;  %11350 = vmatprep.subr.bf16.mxu1 %v12644_v1  ;;  %v12693_v63 = vld [vmem:[%s17434_s1 + $0x16b4] ss:$12 sps:$4 sm:$0xff]   ;;  %v12698_v1 = vld [vmem:[%s17434_s1 + $0x16cc] ss:$12 sps:$4 sm:$0xff]  }
 0x221   :  { %8613 = vmatprep.subr.bf16.mxu0 %v12643_v22  ;;  %v12695_v22 = vld [vmem:[%s17434_s1 + $0x938] ss:$12 sps:$4 sm:$0xff]  }
 0x222   :  { %9241 = vmatmul.mubr.bf16.vlgmr.msra.gmra.mrb[20].mxu1 %v14549_v34  ;;  %v12651_v34 = vld [vmem:[%s17434_s1 + $0x15f0] ss:$12 sps:$4 sm:$0xff]  }
 0x223   :  { %11351 = vmatpush3.bf16.msra.mxu1 %v12645_v5  ;;  %9280 = vmatprep.mubr.bf16.mxu1 %v14568_v45  ;;  %v12656_v45 = vld [vmem:[%s17434_s1 + $0x1608] ss:$12 sps:$4 sm:$0xff]   ;;  %v12700_v5 = vld [vmem:[%s17434_s1 + $0x950] ss:$12 sps:$4 sm:$0xff]  }
 0x224   :  { %8614 = vmatpush1.bf16.msra.mxu0 %v12641_v4  ;;  %11352 = vmatprep.subr.bf16.mxu1 %v12649_v6  ;;  %v12699_v4 = vld [vmem:[%s17434_s1 + $0xa10] ss:$12 sps:$4 sm:$0xff]   ;;  %v12704_v6 = vld [vmem:[%s17434_s1 + $0xa28] ss:$12 sps:$4 sm:$0xff]  }
 0x225   :  { %8615 = vmatprep.subr.bf16.mxu0 %v12648_v28  ;;  %v12703_v28 = vld [vmem:[%s17434_s1 + $0x16e4] ss:$12 sps:$4 sm:$0xff]  }
 0x227   :  { %11353 = vmatpush3.bf16.msra.mxu1 %v12650_v12  ;;  %v12705_v12 = vld [vmem:[%s17434_s1 + $0x968] ss:$12 sps:$4 sm:$0xff]  }
 0x228   :  { %8616 = vmatpush1.bf16.msra.mxu0 %v12646_v7  ;;  %11354 = vmatprep.subr.bf16.mxu1 %v12654_v15  ;;  %v12701_v7 = vld [vmem:[%s17434_s1 + $0x16e0] ss:$12 sps:$4 sm:$0xff]  }
 0x229   :  { %8617 = vmatprep.subr.bf16.mxu0 %v12653_v10  ;;  %v12708_v10 = vld [vmem:[%s17434_s1 + $0x16fc] ss:$12 sps:$4 sm:$0xff]   ;;  %v12709_v15 = vld [vmem:[%s17434_s1 + $0xa40] ss:$12 sps:$4 sm:$0xff]  }
 0x22b   :  { %11355 = vmatpush3.bf16.msra.mxu1 %v12655_v16  ;;  %v12710_v16 = vld [vmem:[%s17434_s1 + $0x980] ss:$12 sps:$4 sm:$0xff]  }
 0x22c   :  { %8618 = vmatpush1.bf16.msra.mxu0 %v12651_v34  ;;  %11356 = vmatprep.subr.bf16.mxu1 %v12659_v36  ;;  %v12706_v34 = vld [vmem:[%s17434_s1 + $0x16f8] ss:$12 sps:$4 sm:$0xff]  }
 0x22d   :  { %8619 = vmatprep.subr.bf16.mxu0 %v12658_v17  ;;  %v12713_v17 = vld [vmem:[%s17434_s1 + $0x1714] ss:$12 sps:$4 sm:$0xff]   ;;  %v12714_v36 = vld [vmem:[%s17434_s1 + $0xa58] ss:$12 sps:$4 sm:$0xff]  }
 0x22f   :  { %11357 = vmatpush3.bf16.msra.mxu1 %v12660_v18  ;;  %v12711_v18 = vld [vmem:[%s17434_s1 + $0x1710] ss:$12 sps:$4 sm:$0xff]  }
 0x230   :  { %8620 = vmatpush1.bf16.msra.mxu0 %v12656_v45  ;;  %11358 = vmatprep.subr.bf16.mxu1 %v12664_v24 }
 0x231   :  { %8621 = vmatprep.subr.bf16.mxu0 %v12663_v21  ;;  %v12715_v21 = vld [vmem:[%s17434_s1 + $0x998] ss:$12 sps:$4 sm:$0xff]  }
 0x233   :  { %11359 = vmatpush3.bf16.msra.mxu1 %v12665_v26 }
 0x234   :  { %8622 = vmatpush1.bf16.msra.mxu0 %v12661_v25  ;;  %11360 = vmatprep.subr.bf16.mxu1 %v12669_v30  ;;  %v12719_v30 = vld [vmem:[%s17434_s1 + $0xa70] ss:$12 sps:$4 sm:$0xff]  }
 0x235   :  { %8623 = vmatprep.subr.bf16.mxu0 %v12668_v27  ;;  %v12718_v27 = vld [vmem:[%s17434_s1 + $0x172c] ss:$12 sps:$4 sm:$0xff]  }
 0x237   :  { %11361 = vmatpush3.bf16.msra.mxu1 %v12670_v31  ;;  %v12720_v31 = vld [vmem:[%s17434_s1 + $0x9b0] ss:$12 sps:$4 sm:$0xff]  }
 0x238   :  { %8624 = vmatpush1.bf16.msra.mxu0 %v12666_v48  ;;  %11362 = vmatprep.subr.bf16.mxu1 %v12674_v32  ;;  %v12716_v48 = vld [vmem:[%s17434_s1 + $0x1728] ss:$12 sps:$4 sm:$0xff]  }
 0x239   :  { %8625 = vmatprep.subr.bf16.mxu0 %v12673_v2  ;;  %v12723_v2 = vld [vmem:[%s17434_s1 + $0x1744] ss:$12 sps:$4 sm:$0xff]   ;;  %v12724_v32 = vld [vmem:[%s17434_s1 + $0xb48] ss:$12 sps:$4 sm:$0xff]  }
 0x23b   :  { %11363 = vmatpush3.bf16.msra.mxu1 %v12675_v38  ;;  %v12725_v38 = vld [vmem:[%s17434_s1 + $0xa88] ss:$12 sps:$4 sm:$0xff]  }
 0x23c   :  { %8626 = vmatpush1.bf16.msra.mxu0 %v12671_v37  ;;  %11364 = vmatprep.subr.bf16.mxu1 %v12679_v39  ;;  %v12721_v37 = vld [vmem:[%s17434_s1 + $0x1740] ss:$12 sps:$4 sm:$0xff]  }
 0x23d   :  { %8627 = vmatprep.subr.bf16.mxu0 %v12678_v8  ;;  %v12728_v8 = vld [vmem:[%s17434_s1 + $0x175c] ss:$12 sps:$4 sm:$0xff]   ;;  %v12729_v39 = vld [vmem:[%s17434_s1 + $0xb60] ss:$12 sps:$4 sm:$0xff]  }
 0x23f   :  { %11365 = vmatpush3.bf16.msra.mxu1 %v12680_v44  ;;  %v12730_v44 = vld [vmem:[%s17434_s1 + $0xaa0] ss:$12 sps:$4 sm:$0xff]  }
 0x240   :  { %8628 = vmatpush1.bf16.msra.mxu0 %v12676_v40  ;;  %11372 = vmatprep.subr.bf16.mxu1 %v12684_v42  ;;  %v12726_v40 = vld [vmem:[%s17434_s1 + $0x1758] ss:$12 sps:$4 sm:$0xff]  }
 0x241   :  { %8638 = vmatprep.subr.bf16.mxu0 %v12683_v47  ;;  %v12733_v47 = vld [vmem:[%s17434_s1 + $0x1774] ss:$12 sps:$4 sm:$0xff]   ;;  %v12735_v42 = vld [vmem:[%s17434_s1 + $0xab8] ss:$12 sps:$4 sm:$0xff]  }
 0x242   :  { %9281 = vmatmul.mubr.bf16.vlgmr.msra.gmra.mrb[24].mxu1 %v14762_v13  ;;  %v12691_v13 = vld [vmem:[%s17434_s1 + $0x16b0] ss:$12 sps:$4 sm:$0xff]  }
 0x243   :  { %8630 = vmatmul.mubr.bf16.vlgmr.msra.gmra.mrb[0].mxu0 %v15388_v54  ;;  %11373 = vmatpush3.bf16.msra.mxu1 %v12685_v49  ;;  %v12740_v49 = vld [vmem:[%s17434_s1 + $0xad0] ss:$12 sps:$4 sm:$0xff]  }
 0x244   :  { %8639 = vmatpush1.bf16.msra.mxu0 %v12681_v56  ;;  %11374 = vmatprep.subr.bf16.mxu1 %v12689_v58  ;;  %v12739_v56 = vld [vmem:[%s17434_s1 + $0xb90] ss:$12 sps:$4 sm:$0xff]   ;;  %v12744_v58 = vld [vmem:[%s17434_s1 + $0xba8] ss:$12 sps:$4 sm:$0xff]  }
 0x245   :  { %8640 = vmatprep.subr.bf16.mxu0 %v12688_v57  ;;  %9320 = vmatprep.mubr.bf16.mxu1 %v13621_v53  ;;  %v12696_v53 = vld [vmem:[%s17434_s1 + $0x16c8] ss:$12 sps:$4 sm:$0xff]   ;;  %v12743_v57 = vld [vmem:[%s17434_s1 + $0x17a4] ss:$12 sps:$4 sm:$0xff]  }
 0x246   :  { %8670 = vmatprep.mubr.bf16.mxu0 %v15405_v60 }
 0x247   :  { %11375 = vmatpush3.bf16.msra.mxu1 %v12690_v62  ;;  %v12745_v62 = vld [vmem:[%s17434_s1 + $0xae8] ss:$12 sps:$4 sm:$0xff]  }
 0x248   :  { %8641 = vmatpush1.bf16.msra.mxu0 %v12686_v59  ;;  %11376 = vmatprep.subr.bf16.mxu1 %v12694_v0  ;;  %v12741_v59 = vld [vmem:[%s17434_s1 + $0x17a0] ss:$12 sps:$4 sm:$0xff]  }
 0x249   :  { %8642 = vmatprep.subr.bf16.mxu0 %v12693_v63  ;;  %v12748_v63 = vld [vmem:[%s17434_s1 + $0x17bc] ss:$12 sps:$4 sm:$0xff]   ;;  %v12749_v0 = vld [vmem:[%s17434_s1 + $0xbc0] ss:$12 sps:$4 sm:$0xff]  }
 0x24b   :  { %11377 = vmatpush3.bf16.msra.mxu1 %v12695_v22  ;;  %v12750_v22 = vld [vmem:[%s17434_s1 + $0xb00] ss:$12 sps:$4 sm:$0xff]  }
 0x24c   :  { %8643 = vmatpush1.bf16.msra.mxu0 %v12691_v13  ;;  %11378 = vmatprep.subr.bf16.mxu1 %v12699_v4  ;;  %v12746_v13 = vld [vmem:[%s17434_s1 + $0x17b8] ss:$12 sps:$4 sm:$0xff]  }
 0x24d   :  { %8644 = vmatprep.subr.bf16.mxu0 %v12698_v1  ;;  %v12753_v1 = vld [vmem:[%s17434_s1 + $0x17d4] ss:$12 sps:$4 sm:$0xff]   ;;  %v12754_v4 = vld [vmem:[%s17434_s1 + $0xbd8] ss:$12 sps:$4 sm:$0xff]  }
 0x24f   :  { %11379 = vmatpush3.bf16.msra.mxu1 %v12700_v5  ;;  %v12751_v5 = vld [vmem:[%s17434_s1 + $0x17d0] ss:$12 sps:$4 sm:$0xff]  }
 0x250   :  { %8645 = vmatpush1.bf16.msra.mxu0 %v12696_v53  ;;  %11380 = vmatprep.subr.bf16.mxu1 %v12704_v6 }
 0x251   :  { %8646 = vmatprep.subr.bf16.mxu0 %v12703_v28  ;;  %v12755_v28 = vld [vmem:[%s17434_s1 + $0xb18] ss:$12 sps:$4 sm:$0xff]  }
 0x253   :  { %11381 = vmatpush3.bf16.msra.mxu1 %v12705_v12 }
 0x254   :  { %8647 = vmatpush1.bf16.msra.mxu0 %v12701_v7  ;;  %11382 = vmatprep.subr.bf16.mxu1 %v12709_v15  ;;  %v12758_v15 = vld [vmem:[%s17434_s1 + $0x17ec] ss:$12 sps:$4 sm:$0xff]  }
 0x255   :  { %8648 = vmatprep.subr.bf16.mxu0 %v12708_v10  ;;  %v15468_v45 = vpop.f32.mrb[0].mxu1 }
 0x256   :  { %v15476_v24 = vpop.f32.mrb[1].mxu1 }
 0x257   :  { %v8266_v25 = vpop.f32.mrb[2].mxu1  ;;  %11383 = vmatpush3.bf16.msra.mxu1 %v12710_v16  ;;  %v12756_v16 = vld [vmem:[%s17434_s1 + $0x17e8] ss:$12 sps:$4 sm:$0xff]  }
 0x258   :  { %8649 = vmatpush1.bf16.msra.mxu0 %v12706_v34  ;;  %v8267_v26 = vpop.f32.mrb[3].mxu1  ;;  %11384 = vmatprep.subr.bf16.mxu1 %v12714_v36  ;;  %v12759_v34 = vld [vmem:[%s17434_s1 + $0xbf0] ss:$12 sps:$4 sm:$0xff]   ;;  %v48_v25 = vld [vmem:[%s17435_s0 + $0x108] sm:$0xff] }
 0x259   :  { %8650 = vmatprep.subr.bf16.mxu0 %v12713_v17  ;;  %v12760_v17 = vld [vmem:[%s17434_s1 + $0xb30] ss:$12 sps:$4 sm:$0xff]  }
 0x25a   :  { %v12763_v36 = vld [vmem:[%s17434_s1 + $0x1804] ss:$12 sps:$4 sm:$0xff]  }
 0x25b   :  { %11385 = vmatpush3.bf16.msra.mxu1 %v12715_v21  ;;  %v12764_v21 = vld [vmem:[%s17434_s1 + $0xcc8] ss:$12 sps:$4 sm:$0xff]  }
 0x25c   :  { %8651 = vmatpush1.bf16.msra.mxu0 %v12711_v18  ;;  %11386 = vmatprep.subr.bf16.mxu1 %v12719_v30  ;;  %v45_v18 = vld [vmem:[%s17435_s0 + $0xf0] sm:$0xff] }
 0x25d   :  { %8652 = vmatprep.subr.bf16.mxu0 %v12718_v27  ;;  %v15602_v26 = vpack.c.bf16 %v45_v18, %v45_v18  ;;  %v12761_v27 = vld [vmem:[%s17434_s1 + $0x1800] ss:$12 sps:$4 sm:$0xff]   ;;  %v12765_v30 = vld [vmem:[%s17434_s1 + $0xc08] ss:$12 sps:$4 sm:$0xff]  }
 0x25e   :  { %v12804_v18 = vld [vmem:[%s17434_s1 + $0xe48] ss:$12 sps:$4 sm:$0xff]  }
 0x25f   :  { %11387 = vmatpush3.bf16.msra.mxu1 %v12720_v31  ;;  %v12769_v31 = vld [vmem:[%s17434_s1 + $0xce0] ss:$12 sps:$4 sm:$0xff]  }
 0x260   :  { %8653 = vmatpush1.bf16.msra.mxu0 %v12716_v48  ;;  %11394 = vmatprep.subr.bf16.mxu1 %v12724_v32  ;;  %v12768_v48 = vld [vmem:[%s17434_s1 + $0x181c] ss:$12 sps:$4 sm:$0xff]   ;;  %v15619_v32 = vpack.c.bf16 %v48_v25, %v48_v25 }
 0x261   :  { %8654 = vmatprep.subr.bf16.mxu0 %v12723_v2  ;;  %v12766_v2 = vld [vmem:[%s17434_s1 + $0x1818] ss:$12 sps:$4 sm:$0xff]   ;;  %v12805_v25 = vld [vmem:[%s17434_s1 + $0xd88] ss:$12 sps:$4 sm:$0xff]  }
 0x262   :  { %9321 = vmatmul.mubr.bf16.vlgmr.msra.gmra.mrb[28].mxu1 %v13687_v11  ;;  %v12731_v11 = vld [vmem:[%s17434_s1 + $0x1770] ss:$12 sps:$4 sm:$0xff]  }
 0x263   :  { %11395 = vmatpush3.bf16.msra.mxu1 %v12725_v38  ;;  %9360 = vmatprep.mubr.bf16.mxu1 %v13777_v41  ;;  %v12736_v41 = vld [vmem:[%s17434_s1 + $0x1788] ss:$12 sps:$4 sm:$0xff]  }
 0x264   :  { %8655 = vmatpush1.bf16.msra.mxu0 %v12721_v37  ;;  %11396 = vmatprep.subr.bf16.mxu1 %v12729_v39  ;;  %v12770_v37 = vld [vmem:[%s17434_s1 + $0xc20] ss:$12 sps:$4 sm:$0xff]   ;;  %v12775_v39 = vld [vmem:[%s17434_s1 + $0xc38] ss:$12 sps:$4 sm:$0xff]  }
 0x265   :  { %8656 = vmatprep.subr.bf16.mxu0 %v12728_v8  ;;  %v12773_v38 = vld [vmem:[%s17434_s1 + $0x1834] ss:$12 sps:$4 sm:$0xff]   ;;  %v12774_v8 = vld [vmem:[%s17434_s1 + $0xcf8] ss:$12 sps:$4 sm:$0xff]  }
 0x267   :  { %11397 = vmatpush3.bf16.msra.mxu1 %v12730_v44  ;;  %v1693_v44 = vlaneseq }
 0x268   :  { %8657 = vmatpush1.bf16.msra.mxu0 %v12726_v40  ;;  %11398 = vmatprep.subr.bf16.mxu1 %v12734_v51  ;;  %v12778_v40 = vld [vmem:[%s17434_s1 + $0x184c] ss:$12 sps:$4 sm:$0xff]   ;;  %v12780_v51 = vld [vmem:[%s17434_s1 + $0xc50] ss:$12 sps:$4 sm:$0xff]  }
 0x269   :  { %8658 = vmatprep.subr.bf16.mxu0 %v12733_v47  ;;  %v12779_v47 = vld [vmem:[%s17434_s1 + $0xd10] ss:$12 sps:$4 sm:$0xff]  }
 0x26b   :  { %11399 = vmatpush3.bf16.msra.mxu1 %v12735_v42  ;;  %v15655_v42 = vshrl.u32 %v1693_v44, 7  ;;  %v12824_v44 = vld [vmem:[%s17434_s1 + $0xea8] ss:$12 sps:$4 sm:$0xff]  }
 0x26c   :  { %8659 = vmatpush1.bf16.msra.mxu0 %v12731_v11  ;;  %11400 = vmatprep.subr.bf16.mxu1 %v12739_v56  ;;  %v12783_v11 = vld [vmem:[%s17434_s1 + $0x1864] ss:$12 sps:$4 sm:$0xff]   ;;  %v12781_v56 = vld [vmem:[%s17434_s1 + $0x1860] ss:$12 sps:$4 sm:$0xff]  }
 0x26d   :  { %8660 = vmatprep.subr.bf16.mxu0 %v12738_v52  ;;  %v12784_v52 = vld [vmem:[%s17434_s1 + $0xd28] ss:$12 sps:$4 sm:$0xff]  }
 0x26f   :  { %11401 = vmatpush3.bf16.msra.mxu1 %v12740_v49  ;;  %v12785_v49 = vld [vmem:[%s17434_s1 + $0xc68] ss:$12 sps:$4 sm:$0xff]  }
 0x270   :  { %8661 = vmatpush1.bf16.msra.mxu0 %v12736_v41  ;;  %11402 = vmatprep.subr.bf16.mxu1 %v12744_v58  ;;  %v1703_v41 = vsub.s32 2, %v15655_v42  ;;  %v1691_v58 = vld [vmem:[%s17436_s2] sm:$0x7] }
 0x271   :  { %8662 = vmatprep.subr.bf16.mxu0 %v12743_v57  ;;  %v12788_v57 = vld [vmem:[%s17434_s1 + $0x187c] ss:$12 sps:$4 sm:$0xff]  }
 0x273   :  { %11403 = vmatpush3.bf16.msra.mxu1 %v12745_v62  ;;  %v12786_v62 = vld [vmem:[%s17434_s1 + $0x1878] ss:$12 sps:$4 sm:$0xff]  }
 0x274   :  { %8663 = vmatpush1.bf16.msra.mxu0 %v12741_v59  ;;  %11404 = vmatprep.subr.bf16.mxu1 %v12749_v0  ;;  %v12789_v59 = vld [vmem:[%s17434_s1 + $0xd40] ss:$12 sps:$4 sm:$0xff]   ;;  %v1704_v0 = vrot.slane %v1691_v58, %v1703_v41  ;;  %v12831_v58 = vld [vmem:[%s17434_s1 + $0x1950] ss:$12 sps:$4 sm:$0xff]  }
 0x275   :  { %8664 = vmatprep.subr.bf16.mxu0 %v12748_v63  ;;  %v11256_v53 = vpop.f32.mrb[4].mxu1  ;;  %v12790_v63 = vld [vmem:[%s17434_s1 + $0xc80] ss:$12 sps:$4 sm:$0xff]  }
 0x276   :  { %v11257_v6 = vpop.f32.mrb[5].mxu1  ;;  %v12833_v41 = vld [vmem:[%s17434_s1 + $0x1954] ss:$12 sps:$4 sm:$0xff]  }
 0x277   :  { %v15576_v7 = vadd.f32 %v11257_v6, %v11256_v53  ;;  %v11259_v12 = vpop.f32.mrb[6].mxu1  ;;  %11405 = vmatpush3.bf16.msra.mxu1 %v12750_v22  ;;  %v12794_v22 = vld [vmem:[%s17434_s1 + $0xd58] ss:$12 sps:$4 sm:$0xff]  }
 0x278   :  { %8665 = vmatpush1.bf16.msra.mxu0 %v12746_v13  ;;  %v11260_v10 = vpop.f32.mrb[7].mxu1  ;;  %11406 = vmatprep.subr.bf16.mxu1 %v12754_v4  ;;  %v12793_v13 = vld [vmem:[%s17434_s1 + $0x1894] ss:$12 sps:$4 sm:$0xff]   ;;  %v12791_v4 = vld [vmem:[%s17434_s1 + $0x1890] ss:$12 sps:$4 sm:$0xff]  }
 0x279   :  { %8666 = vmatprep.subr.bf16.mxu0 %v12753_v1  ;;  %v12795_v53 = vld [vmem:[%s17434_s1 + $0xc98] ss:$12 sps:$4 sm:$0xff]  }
 0x27b   :  { %11407 = vmatpush3.bf16.msra.mxu1 %v12755_v28  ;;  %v9083_v28 = vadd.f32 %v15576_v7, %v1704_v0  ;;  %v12796_v7 = vld [vmem:[%s17434_s1 + $0x18a8] ss:$12 sps:$4 sm:$0xff]  }
 0x27c   :  { %8667 = vmatpush1.bf16.msra.mxu0 %v12751_v5  ;;  %11408 = vmatprep.subr.bf16.mxu1 %v12759_v34  ;;  %v12799_v34 = vld [vmem:[%s17434_s1 + $0xd70] ss:$12 sps:$4 sm:$0xff]  }
 0x27d   :  { %8668 = vmatprep.subr.bf16.mxu0 %v12758_v15  ;;  %v12798_v15 = vld [vmem:[%s17434_s1 + $0x18ac] ss:$12 sps:$4 sm:$0xff]  }
 0x27f   :  { %11409 = vmatpush3.bf16.msra.mxu1 %v12760_v17  ;;  %v12800_v17 = vld [vmem:[%s17434_s1 + $0xcb0] ss:$12 sps:$4 sm:$0xff]  }
 0x280   :  { %8669 = vmatpush1.bf16.msra.mxu0 %v12756_v16  ;;  %11416 = vmatprep.subr.bf16.mxu1 %v12764_v21  ;;  %v12801_v21 = vld [vmem:[%s17434_s1 + $0x18c0] ss:$12 sps:$4 sm:$0xff]  }
 0x281   :  { %8679 = vmatprep.subr.bf16.mxu0 %v12763_v36  ;;  %v12803_v36 = vld [vmem:[%s17434_s1 + $0x18c4] ss:$12 sps:$4 sm:$0xff]  }
 0x282   :  { %9361 = vmatmul.mubr.bf16.vlgmr.msra.gmra.mrb[32].mxu1 %v13903_v23  ;;  %v12771_v23 = vld [vmem:[%s17434_s1 + $0x1830] ss:$12 sps:$4 sm:$0xff]  }
 0x283   :  { %8671 = vmatmul.mubr.bf16.vlgmr.msra.gmra.mrb[0].mxu0 %v15602_v26  ;;  %11417 = vmatpush3.bf16.msra.mxu1 %v12765_v30  ;;  %v12809_v30 = vld [vmem:[%s17434_s1 + $0xe60] ss:$12 sps:$4 sm:$0xff]  }
 0x284   :  { %8680 = vmatpush1.bf16.msra.mxu0 %v12761_v27  ;;  %11418 = vmatprep.subr.bf16.mxu1 %v12769_v31  ;;  %v12808_v27 = vld [vmem:[%s17434_s1 + $0x18dc] ss:$12 sps:$4 sm:$0xff]   ;;  %v12810_v31 = vld [vmem:[%s17434_s1 + $0xda0] ss:$12 sps:$4 sm:$0xff]  }
 0x285   :  { %8681 = vmatprep.subr.bf16.mxu0 %v12768_v48  ;;  %9400 = vmatprep.mubr.bf16.mxu1 %v13933_v33  ;;  %v12776_v33 = vld [vmem:[%s17434_s1 + $0x1848] ss:$12 sps:$4 sm:$0xff]   ;;  %v12806_v48 = vld [vmem:[%s17434_s1 + $0x18d8] ss:$12 sps:$4 sm:$0xff]  }
 0x286   :  { %8711 = vmatprep.mubr.bf16.mxu0 %v15619_v32 }
 0x287   :  { %11419 = vmatpush3.bf16.msra.mxu1 %v12770_v37  ;;  %v12814_v37 = vld [vmem:[%s17434_s1 + $0xe78] ss:$12 sps:$4 sm:$0xff]  }
 0x288   :  { %8682 = vmatpush1.bf16.msra.mxu0 %v12766_v2  ;;  %11420 = vmatprep.subr.bf16.mxu1 %v12774_v8  ;;  %v12813_v2 = vld [vmem:[%s17434_s1 + $0x18f4] ss:$12 sps:$4 sm:$0xff]   ;;  %v12818_v8 = vld [vmem:[%s17434_s1 + $0x190c] ss:$12 sps:$4 sm:$0xff]  }
 0x289   :  { %8683 = vmatprep.subr.bf16.mxu0 %v12773_v38  ;;  %v12815_v38 = vld [vmem:[%s17434_s1 + $0xdb8] ss:$12 sps:$4 sm:$0xff]  }
 0x28b   :  { %11421 = vmatpush3.bf16.msra.mxu1 %v12775_v39  ;;  %v12820_v39 = vld [vmem:[%s17434_s1 + $0xdd0] ss:$12 sps:$4 sm:$0xff]  }
 0x28c   :  { %8684 = vmatpush1.bf16.msra.mxu0 %v12771_v23  ;;  %11422 = vmatprep.subr.bf16.mxu1 %v12779_v47  ;;  %v12819_v23 = vld [vmem:[%s17434_s1 + $0xe90] ss:$12 sps:$4 sm:$0xff]   ;;  %v12821_v47 = vld [vmem:[%s17434_s1 + $0x1920] ss:$12 sps:$4 sm:$0xff]  }
 0x28d   :  { %8685 = vmatprep.subr.bf16.mxu0 %v12778_v40  ;;  %v12823_v40 = vld [vmem:[%s17434_s1 + $0x1924] ss:$12 sps:$4 sm:$0xff]  }
 0x28f   :  { %11423 = vmatpush3.bf16.msra.mxu1 %v12780_v51  ;;  %v12828_v51 = vld [vmem:[%s17434_s1 + $0x193c] ss:$12 sps:$4 sm:$0xff]  }
 0x290   :  { %8686 = vmatpush1.bf16.msra.mxu0 %v12776_v33  ;;  %11424 = vmatprep.subr.bf16.mxu1 %v12784_v52  ;;  %v12825_v33 = vld [vmem:[%s17434_s1 + $0xde8] ss:$12 sps:$4 sm:$0xff]   ;;  %v12826_v52 = vld [vmem:[%s17434_s1 + $0x1938] ss:$12 sps:$4 sm:$0xff]  }
 0x291   :  { %8687 = vmatprep.subr.bf16.mxu0 %v12783_v11  ;;  %v12829_v11 = vld [vmem:[%s17434_s1 + $0xec0] ss:$12 sps:$4 sm:$0xff]  }
 0x293   :  { %11425 = vmatpush3.bf16.msra.mxu1 %v12785_v49  ;;  %v12834_v49 = vld [vmem:[%s17434_s1 + $0xed8] ss:$12 sps:$4 sm:$0xff]  }
 0x294   :  { %8688 = vmatpush1.bf16.msra.mxu0 %v12781_v56  ;;  %11426 = vmatprep.subr.bf16.mxu1 %v12789_v59  ;;  %v12830_v56 = vld [vmem:[%s17434_s1 + $0xe00] ss:$12 sps:$4 sm:$0xff]   ;;  %v12835_v59 = vld [vmem:[%s17434_s1 + $0xe18] ss:$12 sps:$4 sm:$0xff]  }
 0x295   :  { %8689 = vmatprep.subr.bf16.mxu0 %v12788_v57  ;;  %v11278_v1 = vpop.f32.mrb[8].mxu1 }
 0x296   :  { %v11279_v5 = vpop.f32.mrb[9].mxu1 }
 0x297   :  { %v11280_v6 = vadd.f32 %v11279_v5, %v11278_v1  ;;  %v11281_v12 = vpop.f32.mrb[10].mxu1  ;;  %11427 = vmatpush3.bf16.msra.mxu1 %v12790_v63  ;;  %v12839_v1 = vld [vmem:[%s17434_s1 + $0xef0] ss:$12 sps:$4 sm:$0xff]  }
 0x298   :  { %8690 = vmatpush1.bf16.msra.mxu0 %v12786_v62  ;;  %v11282_v10 = vpop.f32.mrb[11].mxu1  ;;  %11428 = vmatprep.subr.bf16.mxu1 %v12794_v22  ;;  %v12838_v22 = vld [vmem:[%s17434_s1 + $0x196c] ss:$12 sps:$4 sm:$0xff]   ;;  %v12840_v5 = vld [vmem:[%s17434_s1 + $0xe30] ss:$12 sps:$4 sm:$0xff]  }
 0x299   :  { %8691 = vmatprep.subr.bf16.mxu0 %v12793_v13  ;;  %v15701_v16 = vadd.f32 %v11280_v6, %v9083_v28  ;;  %v12843_v28 = vld [vmem:[%s17434_s1 + $0x1984] ss:$12 sps:$4 sm:$0xff]   ;;  %v12844_v12 = vld [vmem:[%s17434_s1 + $0xfc8] ss:$12 sps:$4 sm:$0xff]   ;;  %v50_v10 = vld [vmem:[%s17435_s0 + $0x118] sm:$0xff] }
 0x29a   :  { %v47_v6 = vld [vmem:[%s17435_s0 + $0x100] sm:$0xff] }
 0x29b   :  { %11429 = vmatpush3.bf16.msra.mxu1 %v12795_v53  ;;  %v12836_v53 = vld [vmem:[%s17434_s1 + $0x1968] ss:$12 sps:$4 sm:$0xff]  }
 0x29c   :  { %8692 = vmatpush1.bf16.msra.mxu0 %v12791_v4  ;;  %11430 = vmatprep.subr.bf16.mxu1 %v12799_v34  ;;  %v12841_v34 = vld [vmem:[%s17434_s1 + $0x1980] ss:$12 sps:$4 sm:$0xff]  }
 0x29d   :  { %8693 = vmatprep.subr.bf16.mxu0 %v12798_v15  ;;  %v15822_v15 = vpack.c.bf16 %v47_v6, %v47_v6  ;;  %v12893_v6 = vld [vmem:[%s17434_s1 + $0x1a74] ss:$12 sps:$4 sm:$0xff]  }
 0x29f   :  { %11431 = vmatpush3.bf16.msra.mxu1 %v12800_v17  ;;  %v12849_v17 = vld [vmem:[%s17434_s1 + $0xfe0] ss:$12 sps:$4 sm:$0xff]  }
 0x2a0   :  { %8694 = vmatpush1.bf16.msra.mxu0 %v12796_v7  ;;  %11438 = vmatprep.subr.bf16.mxu1 %v12804_v18  ;;  %v12848_v7 = vld [vmem:[%s17434_s1 + $0x199c] ss:$12 sps:$4 sm:$0xff]   ;;  %v15839_v18 = vpack.c.bf16 %v50_v10, %v50_v10  ;;  %v12895_v10 = vld [vmem:[%s17434_s1 + $0x10b8] ss:$12 sps:$4 sm:$0xff]  }
 0x2a1   :  { %8695 = vmatprep.subr.bf16.mxu0 %v12803_v36  ;;  %v12846_v36 = vld [vmem:[%s17434_s1 + $0x1998] ss:$12 sps:$4 sm:$0xff]  }
 0x2a2   :  { %9401 = vmatmul.mubr.bf16.vlgmr.msra.gmra.mrb[36].mxu1 %v14119_v43  ;;  %v12811_v43 = vld [vmem:[%s17434_s1 + $0x18f0] ss:$12 sps:$4 sm:$0xff]  }
 0x2a3   :  { %11439 = vmatpush3.bf16.msra.mxu1 %v12805_v25  ;;  %9440 = vmatprep.mubr.bf16.mxu1 %v14135_v50  ;;  %v12816_v50 = vld [vmem:[%s17434_s1 + $0x1908] ss:$12 sps:$4 sm:$0xff]  }
 0x2a4   :  { %8696 = vmatpush1.bf16.msra.mxu0 %v12801_v21  ;;  %11440 = vmatprep.subr.bf16.mxu1 %v12809_v30  ;;  %v12850_v21 = vld [vmem:[%s17434_s1 + $0xf20] ss:$12 sps:$4 sm:$0xff]   ;;  %v12855_v30 = vld [vmem:[%s17434_s1 + $0xf38] ss:$12 sps:$4 sm:$0xff]  }
 0x2a5   :  { %8697 = vmatprep.subr.bf16.mxu0 %v12808_v27  ;;  %v12853_v25 = vld [vmem:[%s17434_s1 + $0x19b4] ss:$12 sps:$4 sm:$0xff]   ;;  %v12854_v27 = vld [vmem:[%s17434_s1 + $0xff8] ss:$12 sps:$4 sm:$0xff]  }
 0x2a7   :  { %11441 = vmatpush3.bf16.msra.mxu1 %v12810_v31  ;;  %v12859_v31 = vld [vmem:[%s17434_s1 + $0x1010] ss:$12 sps:$4 sm:$0xff]  }
 0x2a8   :  { %8698 = vmatpush1.bf16.msra.mxu0 %v12806_v48  ;;  %11442 = vmatprep.subr.bf16.mxu1 %v12814_v37  ;;  %v12858_v48 = vld [vmem:[%s17434_s1 + $0x19cc] ss:$12 sps:$4 sm:$0xff]   ;;  %v12863_v37 = vld [vmem:[%s17434_s1 + $0x19e4] ss:$12 sps:$4 sm:$0xff]  }
 0x2a9   :  { %8699 = vmatprep.subr.bf16.mxu0 %v12813_v2  ;;  %v12860_v2 = vld [vmem:[%s17434_s1 + $0xf50] ss:$12 sps:$4 sm:$0xff]  }
 0x2ab   :  { %11443 = vmatpush3.bf16.msra.mxu1 %v12815_v38  ;;  %v12861_v38 = vld [vmem:[%s17434_s1 + $0x19e0] ss:$12 sps:$4 sm:$0xff]  }
 0x2ac   :  { %8700 = vmatpush1.bf16.msra.mxu0 %v12811_v43  ;;  %11444 = vmatprep.subr.bf16.mxu1 %v12819_v23  ;;  %v12864_v43 = vld [vmem:[%s17434_s1 + $0x1028] ss:$12 sps:$4 sm:$0xff]  }
 0x2ad   :  { %8701 = vmatprep.subr.bf16.mxu0 %v12818_v8  ;;  %v12865_v8 = vld [vmem:[%s17434_s1 + $0xf68] ss:$12 sps:$4 sm:$0xff]  }
 0x2ae   :  { %v12868_v23 = vld [vmem:[%s17434_s1 + $0x19fc] ss:$12 sps:$4 sm:$0xff]  }
 0x2af   :  { %11445 = vmatpush3.bf16.msra.mxu1 %v12820_v39  ;;  %v12866_v39 = vld [vmem:[%s17434_s1 + $0x19f8] ss:$12 sps:$4 sm:$0xff]  }
 0x2b0   :  { %8702 = vmatpush1.bf16.msra.mxu0 %v12816_v50  ;;  %11446 = vmatprep.subr.bf16.mxu1 %v12824_v44  ;;  %v12869_v50 = vld [vmem:[%s17434_s1 + $0x1040] ss:$12 sps:$4 sm:$0xff]  }
 0x2b1   :  { %8703 = vmatprep.subr.bf16.mxu0 %v12823_v40  ;;  %v12870_v40 = vld [vmem:[%s17434_s1 + $0xf80] ss:$12 sps:$4 sm:$0xff]  }
 0x2b2   :  { %v12873_v44 = vld [vmem:[%s17434_s1 + $0x1a14] ss:$12 sps:$4 sm:$0xff]  }
 0x2b3   :  { %11447 = vmatpush3.bf16.msra.mxu1 %v12825_v33 }
 0x2b4   :  { %8704 = vmatpush1.bf16.msra.mxu0 %v12821_v47  ;;  %11448 = vmatprep.subr.bf16.mxu1 %v12829_v11  ;;  %v12874_v47 = vld [vmem:[%s17434_s1 + $0x1058] ss:$12 sps:$4 sm:$0xff]  }
 0x2b5   :  { %8705 = vmatprep.subr.bf16.mxu0 %v12828_v51  ;;  %v11300_v57 = vpop.f32.mrb[12].mxu1  ;;  %v12871_v51 = vld [vmem:[%s17434_s1 + $0x1a10] ss:$12 sps:$4 sm:$0xff]   ;;  %v12875_v11 = vld [vmem:[%s17434_s1 + $0xf98] ss:$12 sps:$4 sm:$0xff]  }
 0x2b6   :  { %v11301_v62 = vpop.f32.mrb[13].mxu1 }
 0x2b7   :  { %v11302_v63 = vadd.f32 %v11301_v62, %v11300_v57  ;;  %v11303_v0 = vpop.f32.mrb[14].mxu1  ;;  %11449 = vmatpush3.bf16.msra.mxu1 %v12830_v56  ;;  %v12878_v57 = vld [vmem:[%s17434_s1 + $0x1a2c] ss:$12 sps:$4 sm:$0xff]   ;;  %v12876_v62 = vld [vmem:[%s17434_s1 + $0x1a28] ss:$12 sps:$4 sm:$0xff]  }
 0x2b8   :  { %8706 = vmatpush1.bf16.msra.mxu0 %v12826_v52  ;;  %v11304_v13 = vpop.f32.mrb[15].mxu1  ;;  %11450 = vmatprep.subr.bf16.mxu1 %v12834_v49  ;;  %v12883_v0 = vld [vmem:[%s17434_s1 + $0x1a44] ss:$12 sps:$4 sm:$0xff]  }
 0x2b9   :  { %8707 = vmatprep.subr.bf16.mxu0 %v12833_v41  ;;  %v15802_v4 = vadd.f32 %v11302_v63, %v15701_v16  ;;  %v12845_v16 = vld [vmem:[%s17434_s1 + $0xf08] ss:$12 sps:$4 sm:$0xff]   ;;  %v12880_v63 = vld [vmem:[%s17434_s1 + $0xfb0] ss:$12 sps:$4 sm:$0xff]  }
 0x2ba   :  { %v12884_v13 = vld [vmem:[%s17434_s1 + $0x1148] ss:$12 sps:$4 sm:$0xff]  }
 0x2bb   :  { %11451 = vmatpush3.bf16.msra.mxu1 %v12835_v59 }
 0x2bc   :  { %8708 = vmatpush1.bf16.msra.mxu0 %v12831_v58  ;;  %11452 = vmatprep.subr.bf16.mxu1 %v12839_v1  ;;  %v12879_v58 = vld [vmem:[%s17434_s1 + $0x1070] ss:$12 sps:$4 sm:$0xff]   ;;  %v12885_v1 = vld [vmem:[%s17434_s1 + $0x1088] ss:$12 sps:$4 sm:$0xff]  }
 0x2bd   :  { %8709 = vmatprep.subr.bf16.mxu0 %v12838_v22  ;;  %v12881_v22 = vld [vmem:[%s17434_s1 + $0x1a40] ss:$12 sps:$4 sm:$0xff]  }
 0x2bf   :  { %11453 = vmatpush3.bf16.msra.mxu1 %v12840_v5  ;;  %v12886_v5 = vld [vmem:[%s17434_s1 + $0x1a58] ss:$12 sps:$4 sm:$0xff]  }
 0x2c0   :  { %8710 = vmatpush1.bf16.msra.mxu0 %v12836_v53  ;;  %11460 = vmatprep.subr.bf16.mxu1 %v12844_v12  ;;  %v12889_v53 = vld [vmem:[%s17434_s1 + $0x1160] ss:$12 sps:$4 sm:$0xff]   ;;  %v12894_v12 = vld [vmem:[%s17434_s1 + $0x1178] ss:$12 sps:$4 sm:$0xff]  }
 0x2c1   :  { %8720 = vmatprep.subr.bf16.mxu0 %v12843_v28  ;;  %v12890_v28 = vld [vmem:[%s17434_s1 + $0x10a0] ss:$12 sps:$4 sm:$0xff]  }
 0x2c2   :  { %9441 = vmatmul.mubr.bf16.vlgmr.msra.gmra.mrb[40].mxu1 %v14335_v3  ;;  %v12851_v3 = vld [vmem:[%s17434_s1 + $0x19b0] ss:$12 sps:$4 sm:$0xff]  }
 0x2c3   :  { %8712 = vmatmul.mubr.bf16.vlgmr.msra.gmra.mrb[0].mxu0 %v15822_v15  ;;  %11461 = vmatpush3.bf16.msra.mxu1 %v12845_v16  ;;  %v12899_v16 = vld [vmem:[%s17434_s1 + $0x1190] ss:$12 sps:$4 sm:$0xff]  }
 0x2c4   :  { %8721 = vmatpush1.bf16.msra.mxu0 %v12841_v34  ;;  %11462 = vmatprep.subr.bf16.mxu1 %v12849_v17  ;;  %v12898_v34 = vld [vmem:[%s17434_s1 + $0x1a8c] ss:$12 sps:$4 sm:$0xff]   ;;  %v12903_v17 = vld [vmem:[%s17434_s1 + $0x1aa4] ss:$12 sps:$4 sm:$0xff]  }
 0x2c5   :  { %8722 = vmatprep.subr.bf16.mxu0 %v12848_v7  ;;  %9480 = vmatprep.mubr.bf16.mxu1 %v14351_v9  ;;  %v12856_v9 = vld [vmem:[%s17434_s1 + $0x19c8] ss:$12 sps:$4 sm:$0xff]   ;;  %v12900_v7 = vld [vmem:[%s17434_s1 + $0x10d0] ss:$12 sps:$4 sm:$0xff]  }
 0x2c6   :  { %8752 = vmatprep.mubr.bf16.mxu0 %v15839_v18 }
 0x2c7   :  { %11463 = vmatpush3.bf16.msra.mxu1 %v12850_v21  ;;  %v12901_v21 = vld [vmem:[%s17434_s1 + $0x1aa0] ss:$12 sps:$4 sm:$0xff]  }
 0x2c8   :  { %8723 = vmatpush1.bf16.msra.mxu0 %v12846_v36  ;;  %11464 = vmatprep.subr.bf16.mxu1 %v12854_v27  ;;  %v12904_v36 = vld [vmem:[%s17434_s1 + $0x11a8] ss:$12 sps:$4 sm:$0xff]  }
 0x2c9   :  { %8724 = vmatprep.subr.bf16.mxu0 %v12853_v25  ;;  %v12905_v25 = vld [vmem:[%s17434_s1 + $0x10e8] ss:$12 sps:$4 sm:$0xff]  }
 0x2ca   :  { %v12908_v27 = vld [vmem:[%s17434_s1 + $0x1abc] ss:$12 sps:$4 sm:$0xff]  }
 0x2cb   :  { %11465 = vmatpush3.bf16.msra.mxu1 %v12855_v30  ;;  %v12906_v30 = vld [vmem:[%s17434_s1 + $0x1ab8] ss:$12 sps:$4 sm:$0xff]  }
 0x2cc   :  { %8725 = vmatpush1.bf16.msra.mxu0 %v12851_v3  ;;  %11466 = vmatprep.subr.bf16.mxu1 %v12859_v31  ;;  %v12909_v3 = vld [vmem:[%s17434_s1 + $0x11c0] ss:$12 sps:$4 sm:$0xff]  }
 0x2cd   :  { %8726 = vmatprep.subr.bf16.mxu0 %v12858_v48  ;;  %v12910_v48 = vld [vmem:[%s17434_s1 + $0x1100] ss:$12 sps:$4 sm:$0xff]  }
 0x2ce   :  { %v12913_v31 = vld [vmem:[%s17434_s1 + $0x1ad4] ss:$12 sps:$4 sm:$0xff]  }
 0x2cf   :  { %11467 = vmatpush3.bf16.msra.mxu1 %v12860_v2 }
 0x2d0   :  { %8727 = vmatpush1.bf16.msra.mxu0 %v12856_v9  ;;  %11468 = vmatprep.subr.bf16.mxu1 %v12864_v43  ;;  %v12914_v9 = vld [vmem:[%s17434_s1 + $0x11d8] ss:$12 sps:$4 sm:$0xff]  }
 0x2d1   :  { %8728 = vmatprep.subr.bf16.mxu0 %v12863_v37  ;;  %v12911_v37 = vld [vmem:[%s17434_s1 + $0x1ad0] ss:$12 sps:$4 sm:$0xff]   ;;  %v12915_v43 = vld [vmem:[%s17434_s1 + $0x1118] ss:$12 sps:$4 sm:$0xff]  }
 0x2d3   :  { %11469 = vmatpush3.bf16.msra.mxu1 %v12865_v8 }
 0x2d4   :  { %8729 = vmatpush1.bf16.msra.mxu0 %v12861_v38  ;;  %11470 = vmatprep.subr.bf16.mxu1 %v12869_v50 }
 0x2d5   :  { %8730 = vmatprep.subr.bf16.mxu0 %v12868_v23  ;;  %v11322_v33 = vpop.f32.mrb[16].mxu1 }
 0x2d6   :  { %v11323_v52 = vpop.f32.mrb[17].mxu1 }
 0x2d7   :  { %v11324_v56 = vadd.f32 %v11323_v52, %v11322_v33  ;;  %v11325_v41 = vpop.f32.mrb[18].mxu1  ;;  %11471 = vmatpush3.bf16.msra.mxu1 %v12870_v40  ;;  %v12919_v40 = vld [vmem:[%s17434_s1 + $0x11f0] ss:$12 sps:$4 sm:$0xff]   ;;  %v12924_v52 = vld [vmem:[%s17434_s1 + $0x12c8] ss:$12 sps:$4 sm:$0xff]  }
 0x2d8   :  { %8731 = vmatpush1.bf16.msra.mxu0 %v12866_v39  ;;  %v11326_v49 = vpop.f32.mrb[19].mxu1  ;;  %11472 = vmatprep.subr.bf16.mxu1 %v12874_v47  ;;  %v12918_v39 = vld [vmem:[%s17434_s1 + $0x1aec] ss:$12 sps:$4 sm:$0xff]   ;;  %v12916_v47 = vld [vmem:[%s17434_s1 + $0x1ae8] ss:$12 sps:$4 sm:$0xff]  }
 0x2d9   :  { %8732 = vmatprep.subr.bf16.mxu0 %v12873_v44  ;;  %v15915_v59 = vadd.f32 %v11324_v56, %v15802_v4  ;;  %v12888_v4 = vld [vmem:[%s17434_s1 + $0x1a5c] ss:$12 sps:$4 sm:$0xff]   ;;  %v12921_v49 = vld [vmem:[%s17434_s1 + $0x1b00] ss:$12 sps:$4 sm:$0xff]  }
 0x2da   :  { %v12920_v33 = vld [vmem:[%s17434_s1 + $0x1130] ss:$12 sps:$4 sm:$0xff]   ;;  %v52_v56 = vld [vmem:[%s17435_s0 + $0x128] sm:$0xff] }
 0x2db   :  { %11473 = vmatpush3.bf16.msra.mxu1 %v12875_v11  ;;  %v49_v11 = vld [vmem:[%s17435_s0 + $0x110] sm:$0xff] }
 0x2dc   :  { %8733 = vmatpush1.bf16.msra.mxu0 %v12871_v51  ;;  %11474 = vmatprep.subr.bf16.mxu1 %v12879_v58  ;;  %v12923_v51 = vld [vmem:[%s17434_s1 + $0x1b04] ss:$12 sps:$4 sm:$0xff]   ;;  %v16036_v41 = vpack.c.bf16 %v49_v11, %v49_v11  ;;  %v12928_v58 = vld [vmem:[%s17434_s1 + $0x1b1c] ss:$12 sps:$4 sm:$0xff]  }
 0x2dd   :  { %8734 = vmatprep.subr.bf16.mxu0 %v12878_v57  ;;  %v12925_v57 = vld [vmem:[%s17434_s1 + $0x1208] ss:$12 sps:$4 sm:$0xff]   ;;  %v12975_v11 = vld [vmem:[%s17434_s1 + $0x13b8] ss:$12 sps:$4 sm:$0xff]  }
 0x2df   :  { %11475 = vmatpush3.bf16.msra.mxu1 %v12880_v63  ;;  %v16053_v63 = vpack.c.bf16 %v52_v56, %v52_v56  ;;  %v12979_v56 = vld [vmem:[%s17434_s1 + $0x1490] ss:$12 sps:$4 sm:$0xff]  }
 0x2e0   :  { %8735 = vmatpush1.bf16.msra.mxu0 %v12876_v62  ;;  %11482 = vmatprep.subr.bf16.mxu1 %v12884_v13  ;;  %v12926_v62 = vld [vmem:[%s17434_s1 + $0x1b18] ss:$12 sps:$4 sm:$0xff]   ;;  %v12933_v13 = vld [vmem:[%s17434_s1 + $0x1b34] ss:$12 sps:$4 sm:$0xff]  }
 0x2e1   :  { %8736 = vmatprep.subr.bf16.mxu0 %v12883_v0  ;;  %v12930_v0 = vld [vmem:[%s17434_s1 + $0x1220] ss:$12 sps:$4 sm:$0xff]  }
 0x2e2   :  { %9481 = vmatmul.mubr.bf16.vlgmr.msra.gmra.mrb[44].mxu1 %v14551_v35  ;;  %v12891_v35 = vld [vmem:[%s17434_s1 + $0x1a70] ss:$12 sps:$4 sm:$0xff]  }
 0x2e3   :  { %11483 = vmatpush3.bf16.msra.mxu1 %v12885_v1  ;;  %9520 = vmatprep.mubr.bf16.mxu1 %v14570_v46  ;;  %v12896_v46 = vld [vmem:[%s17434_s1 + $0x1a88] ss:$12 sps:$4 sm:$0xff]   ;;  %v12935_v1 = vld [vmem:[%s17434_s1 + $0x1238] ss:$12 sps:$4 sm:$0xff]  }
 0x2e4   :  { %8737 = vmatpush1.bf16.msra.mxu0 %v12881_v22  ;;  %11484 = vmatprep.subr.bf16.mxu1 %v12889_v53  ;;  %v12934_v22 = vld [vmem:[%s17434_s1 + $0x12f8] ss:$12 sps:$4 sm:$0xff]   ;;  %v12939_v53 = vld [vmem:[%s17434_s1 + $0x1310] ss:$12 sps:$4 sm:$0xff]  }
 0x2e5   :  { %8738 = vmatprep.subr.bf16.mxu0 %v12888_v4  ;;  %v12938_v4 = vld [vmem:[%s17434_s1 + $0x1b4c] ss:$12 sps:$4 sm:$0xff]  }
 0x2e7   :  { %11485 = vmatpush3.bf16.msra.mxu1 %v12890_v28  ;;  %v12943_v28 = vld [vmem:[%s17434_s1 + $0x1b64] ss:$12 sps:$4 sm:$0xff]  }
 0x2e8   :  { %8739 = vmatpush1.bf16.msra.mxu0 %v12886_v5  ;;  %11486 = vmatprep.subr.bf16.mxu1 %v12894_v12  ;;  %v12940_v5 = vld [vmem:[%s17434_s1 + $0x1250] ss:$12 sps:$4 sm:$0xff]   ;;  %v12941_v12 = vld [vmem:[%s17434_s1 + $0x1b60] ss:$12 sps:$4 sm:$0xff]  }
 0x2e9   :  { %8740 = vmatprep.subr.bf16.mxu0 %v12893_v6  ;;  %v12944_v6 = vld [vmem:[%s17434_s1 + $0x1328] ss:$12 sps:$4 sm:$0xff]  }
 0x2eb   :  { %11487 = vmatpush3.bf16.msra.mxu1 %v12895_v10  ;;  %v12948_v10 = vld [vmem:[%s17434_s1 + $0x1b7c] ss:$12 sps:$4 sm:$0xff]  }
 0x2ec   :  { %8741 = vmatpush1.bf16.msra.mxu0 %v12891_v35  ;;  %11488 = vmatprep.subr.bf16.mxu1 %v12899_v16  ;;  %v12945_v35 = vld [vmem:[%s17434_s1 + $0x1268] ss:$12 sps:$4 sm:$0xff]   ;;  %v12946_v16 = vld [vmem:[%s17434_s1 + $0x1b78] ss:$12 sps:$4 sm:$0xff]  }
 0x2ed   :  { %8742 = vmatprep.subr.bf16.mxu0 %v12898_v34  ;;  %v12949_v34 = vld [vmem:[%s17434_s1 + $0x1340] ss:$12 sps:$4 sm:$0xff]  }
 0x2ef   :  { %11489 = vmatpush3.bf16.msra.mxu1 %v12900_v7  ;;  %v12953_v7 = vld [vmem:[%s17434_s1 + $0x1b94] ss:$12 sps:$4 sm:$0xff]  }
 0x2f0   :  { %8743 = vmatpush1.bf16.msra.mxu0 %v12896_v46  ;;  %11490 = vmatprep.subr.bf16.mxu1 %v12904_v36  ;;  %v12950_v46 = vld [vmem:[%s17434_s1 + $0x1280] ss:$12 sps:$4 sm:$0xff]  }
 0x2f1   :  { %8744 = vmatprep.subr.bf16.mxu0 %v12903_v17  ;;  %v12954_v17 = vld [vmem:[%s17434_s1 + $0x1358] ss:$12 sps:$4 sm:$0xff]  }
 0x2f3   :  { %11491 = vmatpush3.bf16.msra.mxu1 %v12905_v25  ;;  %v12955_v25 = vld [vmem:[%s17434_s1 + $0x1298] ss:$12 sps:$4 sm:$0xff]  }
 0x2f4   :  { %8745 = vmatpush1.bf16.msra.mxu0 %v12901_v21  ;;  %11492 = vmatprep.subr.bf16.mxu1 %v12909_v3  ;;  %v12951_v21 = vld [vmem:[%s17434_s1 + $0x1b90] ss:$12 sps:$4 sm:$0xff]  }
 0x2f5   :  { %8746 = vmatprep.subr.bf16.mxu0 %v12908_v27  ;;  %v11344_v2 = vpop.f32.mrb[20].mxu1 }
 0x2f6   :  { %v11345_v38 = vpop.f32.mrb[21].mxu1 }
 0x2f7   :  { %v11346_v8 = vadd.f32 %v11345_v38, %v11344_v2  ;;  %v11347_v23 = vpop.f32.mrb[22].mxu1  ;;  %11493 = vmatpush3.bf16.msra.mxu1 %v12910_v48  ;;  %v12963_v38 = vld [vmem:[%s17434_s1 + $0x1bc4] ss:$12 sps:$4 sm:$0xff]  }
 0x2f8   :  { %8747 = vmatpush1.bf16.msra.mxu0 %v12906_v30  ;;  %v11348_v50 = vpop.f32.mrb[23].mxu1  ;;  %11494 = vmatprep.subr.bf16.mxu1 %v12914_v9  ;;  %v12959_v9 = vld [vmem:[%s17434_s1 + $0x1370] ss:$12 sps:$4 sm:$0xff]   ;;  %v12961_v23 = vld [vmem:[%s17434_s1 + $0x1bc0] ss:$12 sps:$4 sm:$0xff]  }
 0x2f9   :  { %8748 = vmatprep.subr.bf16.mxu0 %v12913_v31  ;;  %v16016_v44 = vadd.f32 %v11346_v8, %v15915_v59  ;;  %v12929_v59 = vld [vmem:[%s17434_s1 + $0x12e0] ss:$12 sps:$4 sm:$0xff]   ;;  %v12964_v8 = vld [vmem:[%s17434_s1 + $0x1448] ss:$12 sps:$4 sm:$0xff]  }
 0x2fa   :  { %v12958_v31 = vld [vmem:[%s17434_s1 + $0x1bac] ss:$12 sps:$4 sm:$0xff]   ;;  %v12965_v50 = vld [vmem:[%s17434_s1 + $0x1388] ss:$12 sps:$4 sm:$0xff]  }
 0x2fb   :  { %11495 = vmatpush3.bf16.msra.mxu1 %v12915_v43  ;;  %v12960_v43 = vld [vmem:[%s17434_s1 + $0x12b0] ss:$12 sps:$4 sm:$0xff]  }
 0x2fc   :  { %8749 = vmatpush1.bf16.msra.mxu0 %v12911_v37  ;;  %11496 = vmatprep.subr.bf16.mxu1 %v12919_v40  ;;  %v12956_v37 = vld [vmem:[%s17434_s1 + $0x1ba8] ss:$12 sps:$4 sm:$0xff]   ;;  %v12969_v40 = vld [vmem:[%s17434_s1 + $0x1460] ss:$12 sps:$4 sm:$0xff]  }
 0x2fd   :  { %8750 = vmatprep.subr.bf16.mxu0 %v12918_v39  ;;  %v12968_v39 = vld [vmem:[%s17434_s1 + $0x1bdc] ss:$12 sps:$4 sm:$0xff]  }
 0x2ff   :  { %11497 = vmatpush3.bf16.msra.mxu1 %v12920_v33  ;;  %v12973_v33 = vld [vmem:[%s17434_s1 + $0x1bf4] ss:$12 sps:$4 sm:$0xff]  }
 0x300   :  { %8751 = vmatpush1.bf16.msra.mxu0 %v12916_v47  ;;  %11504 = vmatprep.subr.bf16.mxu1 %v12924_v52  ;;  %v12970_v47 = vld [vmem:[%s17434_s1 + $0x13a0] ss:$12 sps:$4 sm:$0xff]  }
 0x301   :  { %8761 = vmatprep.subr.bf16.mxu0 %v12923_v51  ;;  %v12974_v51 = vld [vmem:[%s17434_s1 + $0x1478] ss:$12 sps:$4 sm:$0xff]  }
 0x302   :  { %9521 = vmatmul.mubr.bf16.vlgmr.msra.gmra.mrb[48].mxu1 %v14764_v14  ;;  %v12931_v14 = vld [vmem:[%s17434_s1 + $0x1b30] ss:$12 sps:$4 sm:$0xff]   ;;  %v12978_v52 = vld [vmem:[%s17434_s1 + $0x1c0c] ss:$12 sps:$4 sm:$0xff]  }
 0x303   :  { %8753 = vmatmul.mubr.bf16.vlgmr.msra.gmra.mrb[0].mxu0 %v16036_v41  ;;  %11505 = vmatpush3.bf16.msra.mxu1 %v12925_v57  ;;  %v12983_v57 = vld [vmem:[%s17434_s1 + $0x1c24] ss:$12 sps:$4 sm:$0xff]  }
 0x304   :  { %8762 = vmatpush1.bf16.msra.mxu0 %v12921_v49  ;;  %11506 = vmatprep.subr.bf16.mxu1 %v12929_v59  ;;  %v12980_v49 = vld [vmem:[%s17434_s1 + $0x13d0] ss:$12 sps:$4 sm:$0xff]   ;;  %v12981_v59 = vld [vmem:[%s17434_s1 + $0x1c20] ss:$12 sps:$4 sm:$0xff]  }
 0x305   :  { %8763 = vmatprep.subr.bf16.mxu0 %v12928_v58  ;;  %9560 = vmatprep.mubr.bf16.mxu1 %v14781_v20  ;;  %v12936_v20 = vld [vmem:[%s17434_s1 + $0x1b48] ss:$12 sps:$4 sm:$0xff]  }
 0x306   :  { %8793 = vmatprep.mubr.bf16.mxu0 %v16053_v63  ;;  %v12984_v58 = vld [vmem:[%s17434_s1 + $0x14a8] ss:$12 sps:$4 sm:$0xff]  }
 0x307   :  { %11507 = vmatpush3.bf16.msra.mxu1 %v12930_v0  ;;  %v12988_v0 = vld [vmem:[%s17434_s1 + $0x1c3c] ss:$12 sps:$4 sm:$0xff]  }
 0x308   :  { %8764 = vmatpush1.bf16.msra.mxu0 %v12926_v62  ;;  %11508 = vmatprep.subr.bf16.mxu1 %v12934_v22  ;;  %v12985_v62 = vld [vmem:[%s17434_s1 + $0x13e8] ss:$12 sps:$4 sm:$0xff]   ;;  %v12986_v22 = vld [vmem:[%s17434_s1 + $0x1c38] ss:$12 sps:$4 sm:$0xff]  }
 0x309   :  { %8765 = vmatprep.subr.bf16.mxu0 %v12933_v13  ;;  %v12989_v13 = vld [vmem:[%s17434_s1 + $0x14c0] ss:$12 sps:$4 sm:$0xff]  }
 0x30b   :  { %11509 = vmatpush3.bf16.msra.mxu1 %v12935_v1  ;;  %v12993_v1 = vld [vmem:[%s17434_s1 + $0x1c54] ss:$12 sps:$4 sm:$0xff]  }
 0x30c   :  { %8766 = vmatpush1.bf16.msra.mxu0 %v12931_v14  ;;  %11510 = vmatprep.subr.bf16.mxu1 %v12939_v53  ;;  %v12990_v14 = vld [vmem:[%s17434_s1 + $0x1400] ss:$12 sps:$4 sm:$0xff]  }
 0x30d   :  { %8767 = vmatprep.subr.bf16.mxu0 %v12938_v4  ;;  %v12994_v4 = vld [vmem:[%s17434_s1 + $0x14d8] ss:$12 sps:$4 sm:$0xff]  }
 0x30f   :  { %11511 = vmatpush3.bf16.msra.mxu1 %v12940_v5  ;;  %v12995_v5 = vld [vmem:[%s17434_s1 + $0x1418] ss:$12 sps:$4 sm:$0xff]  }
 0x310   :  { %8768 = vmatpush1.bf16.msra.mxu0 %v12936_v20  ;;  %11512 = vmatprep.subr.bf16.mxu1 %v12944_v6  ;;  %v12991_v20 = vld [vmem:[%s17434_s1 + $0x1c50] ss:$12 sps:$4 sm:$0xff]  }
 0x311   :  { %8769 = vmatprep.subr.bf16.mxu0 %v12943_v28 }
 0x313   :  { %11513 = vmatpush3.bf16.msra.mxu1 %v12945_v35 }
 0x314   :  { %8770 = vmatpush1.bf16.msra.mxu0 %v12941_v12  ;;  %11514 = vmatprep.subr.bf16.mxu1 %v12949_v34  ;;  %v12999_v34 = vld [vmem:[%s17434_s1 + $0x14f0] ss:$12 sps:$4 sm:$0xff]  }
 0x315   :  { %8771 = vmatprep.subr.bf16.mxu0 %v12948_v10  ;;  %v11366_v36 = vpop.f32.mrb[24].mxu1  ;;  %v12998_v10 = vld [vmem:[%s17434_s1 + $0x1c6c] ss:$12 sps:$4 sm:$0xff]  }
 0x316   :  { %v11367_v27 = vpop.f32.mrb[25].mxu1 }
 0x317   :  { %v11368_v3 = vadd.f32 %v11367_v27, %v11366_v36  ;;  %v11369_v30 = vpop.f32.mrb[26].mxu1  ;;  %11515 = vmatpush3.bf16.msra.mxu1 %v12950_v46  ;;  %v12996_v46 = vld [vmem:[%s17434_s1 + $0x1c68] ss:$12 sps:$4 sm:$0xff]   ;;  %v51_v36 = vld [vmem:[%s17435_s0 + $0x120] sm:$0xff] }
 0x318   :  { %8772 = vmatpush1.bf16.msra.mxu0 %v12946_v16  ;;  %v11370_v48 = vpop.f32.mrb[27].mxu1  ;;  %11516 = vmatprep.subr.bf16.mxu1 %v12954_v17  ;;  %v13003_v17 = vld [vmem:[%s17434_s1 + $0x1c84] ss:$12 sps:$4 sm:$0xff]   ;;  %v16250_v27 = vpack.c.bf16 %v51_v36, %v51_v36  ;;  %v13005_v30 = vld [vmem:[%s17434_s1 + $0x1508] ss:$12 sps:$4 sm:$0xff]  }
 0x319   :  { %8773 = vmatprep.subr.bf16.mxu0 %v12953_v7  ;;  %v16129_v2 = vadd.f32 %v11368_v3, %v16016_v44  ;;  %v12966_v44 = vld [vmem:[%s17434_s1 + $0x1bd8] ss:$12 sps:$4 sm:$0xff]   ;;  %v13000_v7 = vld [vmem:[%s17434_s1 + $0x1430] ss:$12 sps:$4 sm:$0xff]   ;;  %v13001_v3 = vld [vmem:[%s17434_s1 + $0x1c80] ss:$12 sps:$4 sm:$0xff]  }
 0x31a   :  { %v13008_v48 = vld [vmem:[%s17434_s1 + $0x1c9c] ss:$12 sps:$4 sm:$0xff]  }
 0x31b   :  { %11517 = vmatpush3.bf16.msra.mxu1 %v12955_v25  ;;  %v54_v25 = vld [vmem:[%s17435_s0 + $0x138] sm:$0xff] }
 0x31c   :  { %8774 = vmatpush1.bf16.msra.mxu0 %v12951_v21  ;;  %11518 = vmatprep.subr.bf16.mxu1 %v12959_v9  ;;  %v13004_v21 = vld [vmem:[%s17434_s1 + $0x15c8] ss:$12 sps:$4 sm:$0xff]   ;;  %v13006_v9 = vld [vmem:[%s17434_s1 + $0x1c98] ss:$12 sps:$4 sm:$0xff]   ;;  %v13059_v36 = vld [vmem:[%s17434_s1 + $0x1790] ss:$12 sps:$4 sm:$0xff]  }
 0x31d   :  { %8775 = vmatprep.subr.bf16.mxu0 %v12958_v31  ;;  %v13009_v31 = vld [vmem:[%s17434_s1 + $0x15e0] ss:$12 sps:$4 sm:$0xff]  }
 0x31f   :  { %11519 = vmatpush3.bf16.msra.mxu1 %v12960_v43  ;;  %v13013_v43 = vld [vmem:[%s17434_s1 + $0x1cb4] ss:$12 sps:$4 sm:$0xff]  }
 0x320   :  { %8776 = vmatpush1.bf16.msra.mxu0 %v12956_v37  ;;  %11526 = vmatprep.subr.bf16.mxu1 %v12964_v8  ;;  %v13010_v37 = vld [vmem:[%s17434_s1 + $0x1520] ss:$12 sps:$4 sm:$0xff]   ;;  %v13015_v8 = vld [vmem:[%s17434_s1 + $0x1538] ss:$12 sps:$4 sm:$0xff]  }
 0x321   :  { %8777 = vmatprep.subr.bf16.mxu0 %v12963_v38  ;;  %v13014_v38 = vld [vmem:[%s17434_s1 + $0x15f8] ss:$12 sps:$4 sm:$0xff]  }
 0x322   :  { %9561 = vmatmul.mubr.bf16.vlgmr.msra.gmra.mrb[52].mxu1 %v14972_v55  ;;  %v12971_v55 = vld [vmem:[%s17434_s1 + $0x1bf0] ss:$12 sps:$4 sm:$0xff]  }
 0x323   :  { %11527 = vmatpush3.bf16.msra.mxu1 %v12965_v50  ;;  %9600 = vmatprep.mubr.bf16.mxu1 %v14989_v61  ;;  %v12976_v61 = vld [vmem:[%s17434_s1 + $0x1c08] ss:$12 sps:$4 sm:$0xff]   ;;  %v13019_v50 = vld [vmem:[%s17434_s1 + $0x1610] ss:$12 sps:$4 sm:$0xff]  }
 0x324   :  { %8778 = vmatpush1.bf16.msra.mxu0 %v12961_v23  ;;  %11528 = vmatprep.subr.bf16.mxu1 %v12969_v40  ;;  %v13018_v23 = vld [vmem:[%s17434_s1 + $0x1ccc] ss:$12 sps:$4 sm:$0xff]   ;;  %v13023_v40 = vld [vmem:[%s17434_s1 + $0x1ce4] ss:$12 sps:$4 sm:$0xff]  }
 0x325   :  { %8779 = vmatprep.subr.bf16.mxu0 %v12968_v39  ;;  %v13020_v39 = vld [vmem:[%s17434_s1 + $0x1550] ss:$12 sps:$4 sm:$0xff]  }
 0x327   :  { %11529 = vmatpush3.bf16.msra.mxu1 %v12970_v47  ;;  %v13021_v47 = vld [vmem:[%s17434_s1 + $0x1ce0] ss:$12 sps:$4 sm:$0xff]  }
 0x328   :  { %8780 = vmatpush1.bf16.msra.mxu0 %v12966_v44  ;;  %11530 = vmatprep.subr.bf16.mxu1 %v12974_v51  ;;  %v13024_v44 = vld [vmem:[%s17434_s1 + $0x1628] ss:$12 sps:$4 sm:$0xff]  }
 0x329   :  { %8781 = vmatprep.subr.bf16.mxu0 %v12973_v33  ;;  %v13025_v33 = vld [vmem:[%s17434_s1 + $0x1568] ss:$12 sps:$4 sm:$0xff]  }
 0x32a   :  { %v13028_v51 = vld [vmem:[%s17434_s1 + $0x1cfc] ss:$12 sps:$4 sm:$0xff]  }
 0x32b   :  { %11531 = vmatpush3.bf16.msra.mxu1 %v12975_v11  ;;  %v13026_v11 = vld [vmem:[%s17434_s1 + $0x1cf8] ss:$12 sps:$4 sm:$0xff]  }
 0x32c   :  { %8782 = vmatpush1.bf16.msra.mxu0 %v12971_v55  ;;  %11532 = vmatprep.subr.bf16.mxu1 %v12979_v56  ;;  %v13029_v55 = vld [vmem:[%s17434_s1 + $0x1640] ss:$12 sps:$4 sm:$0xff]  }
 0x32d   :  { %8783 = vmatprep.subr.bf16.mxu0 %v12978_v52  ;;  %v13030_v52 = vld [vmem:[%s17434_s1 + $0x1580] ss:$12 sps:$4 sm:$0xff]  }
 0x32e   :  { %v13033_v56 = vld [vmem:[%s17434_s1 + $0x1d14] ss:$12 sps:$4 sm:$0xff]  }
 0x32f   :  { %11533 = vmatpush3.bf16.msra.mxu1 %v12980_v49 }
 0x330   :  { %8784 = vmatpush1.bf16.msra.mxu0 %v12976_v61  ;;  %11534 = vmatprep.subr.bf16.mxu1 %v12984_v58  ;;  %v13034_v61 = vld [vmem:[%s17434_s1 + $0x1658] ss:$12 sps:$4 sm:$0xff]  }
 0x331   :  { %8785 = vmatprep.subr.bf16.mxu0 %v12983_v57  ;;  %v13031_v57 = vld [vmem:[%s17434_s1 + $0x1d10] ss:$12 sps:$4 sm:$0xff]   ;;  %v13035_v58 = vld [vmem:[%s17434_s1 + $0x1598] ss:$12 sps:$4 sm:$0xff]  }
 0x333   :  { %11535 = vmatpush3.bf16.msra.mxu1 %v12985_v62 }
 0x334   :  { %8786 = vmatpush1.bf16.msra.mxu0 %v12981_v59  ;;  %11536 = vmatprep.subr.bf16.mxu1 %v12989_v13 }
 0x335   :  { %8787 = vmatprep.subr.bf16.mxu0 %v12988_v0  ;;  %v11388_v53 = vpop.f32.mrb[28].mxu1 }
 0x336   :  { %v11389_v28 = vpop.f32.mrb[29].mxu1 }
 0x337   :  { %v11390_v6 = vadd.f32 %v11389_v28, %v11388_v53  ;;  %v11391_v12 = vpop.f32.mrb[30].mxu1  ;;  %11537 = vmatpush3.bf16.msra.mxu1 %v12990_v14  ;;  %v13039_v14 = vld [vmem:[%s17434_s1 + $0x1670] ss:$12 sps:$4 sm:$0xff]   ;;  %v13041_v28 = vld [vmem:[%s17434_s1 + $0x1d40] ss:$12 sps:$4 sm:$0xff]  }
 0x338   :  { %8788 = vmatpush1.bf16.msra.mxu0 %v12986_v22  ;;  %v11392_v35 = vpop.f32.mrb[31].mxu1  ;;  %11538 = vmatprep.subr.bf16.mxu1 %v12994_v4  ;;  %v13038_v22 = vld [vmem:[%s17434_s1 + $0x1d2c] ss:$12 sps:$4 sm:$0xff]   ;;  %v13036_v4 = vld [vmem:[%s17434_s1 + $0x1d28] ss:$12 sps:$4 sm:$0xff]  }
 0x339   :  { %8789 = vmatprep.subr.bf16.mxu0 %v12993_v1  ;;  %v16230_v16 = vadd.f32 %v11390_v6, %v16129_v2  ;;  %v16267_v2 = vpack.c.bf16 %v54_v25, %v54_v25  ;;  %v13040_v53 = vld [vmem:[%s17434_s1 + $0x15b0] ss:$12 sps:$4 sm:$0xff]   ;;  %v13045_v6 = vld [vmem:[%s17434_s1 + $0x1688] ss:$12 sps:$4 sm:$0xff]   ;;  %v13049_v35 = vld [vmem:[%s17434_s1 + $0x1760] ss:$12 sps:$4 sm:$0xff]  }
 0x33a   :  { %v13048_v12 = vld [vmem:[%s17434_s1 + $0x1d5c] ss:$12 sps:$4 sm:$0xff]   ;;  %v13063_v25 = vld [vmem:[%s17434_s1 + $0x1da4] ss:$12 sps:$4 sm:$0xff]  }
 0x33b   :  { %11539 = vmatpush3.bf16.msra.mxu1 %v12995_v5  ;;  %v13044_v5 = vld [vmem:[%s17434_s1 + $0x1748] ss:$12 sps:$4 sm:$0xff]  }
 0x33c   :  { %8790 = vmatpush1.bf16.msra.mxu0 %v12991_v20  ;;  %11540 = vmatprep.subr.bf16.mxu1 %v12999_v34  ;;  %v13043_v20 = vld [vmem:[%s17434_s1 + $0x1d44] ss:$12 sps:$4 sm:$0xff]   ;;  %v13050_v34 = vld [vmem:[%s17434_s1 + $0x16a0] ss:$12 sps:$4 sm:$0xff]  }
 0x33d   :  { %8791 = vmatprep.subr.bf16.mxu0 %v12998_v10  ;;  %v13046_v10 = vld [vmem:[%s17434_s1 + $0x1d58] ss:$12 sps:$4 sm:$0xff]  }
 0x33f   :  { %11541 = vmatpush3.bf16.msra.mxu1 %v13000_v7  ;;  %v13055_v7 = vld [vmem:[%s17434_s1 + $0x16b8] ss:$12 sps:$4 sm:$0xff]  }
 0x340   :  { %8792 = vmatpush1.bf16.msra.mxu0 %v12996_v46  ;;  %11548 = vmatprep.subr.bf16.mxu1 %v13004_v21  ;;  %v13054_v46 = vld [vmem:[%s17434_s1 + $0x1778] ss:$12 sps:$4 sm:$0xff]   ;;  %v13060_v21 = vld [vmem:[%s17434_s1 + $0x16d0] ss:$12 sps:$4 sm:$0xff]  }
 0x341   :  { %8802 = vmatprep.subr.bf16.mxu0 %v13003_v17  ;;  %v13058_v17 = vld [vmem:[%s17434_s1 + $0x1d8c] ss:$12 sps:$4 sm:$0xff]  }
 0x342   :  { %9601 = vmatmul.mubr.bf16.vlgmr.msra.gmra.mrb[56].mxu1 %v15180_v19  ;;  %v13011_v19 = vld [vmem:[%s17434_s1 + $0x1cb0] ss:$12 sps:$4 sm:$0xff]  }
 0x343   :  { %8794 = vmatmul.mubr.bf16.vlgmr.msra.gmra.mrb[0].mxu0 %v16250_v27  ;;  %11549 = vmatpush3.bf16.msra.mxu1 %v13005_v30  ;;  %v13061_v30 = vld [vmem:[%s17434_s1 + $0x1da0] ss:$12 sps:$4 sm:$0xff]  }
 0x344   :  { %8803 = vmatpush1.bf16.msra.mxu0 %v13001_v3  ;;  %11550 = vmatprep.subr.bf16.mxu1 %v13009_v31  ;;  %v13064_v3 = vld [vmem:[%s17434_s1 + $0x17a8] ss:$12 sps:$4 sm:$0xff]  }
 0x345   :  { %8804 = vmatprep.subr.bf16.mxu0 %v13008_v48  ;;  %9640 = vmatprep.mubr.bf16.mxu1 %v15197_v29  ;;  %v13016_v29 = vld [vmem:[%s17434_s1 + $0x1cc8] ss:$12 sps:$4 sm:$0xff]  }
 0x346   :  { %8834 = vmatprep.mubr.bf16.mxu0 %v16267_v2  ;;  %v13065_v48 = vld [vmem:[%s17434_s1 + $0x16e8] ss:$12 sps:$4 sm:$0xff]  }
 0x347   :  { %11551 = vmatpush3.bf16.msra.mxu1 %v13010_v37  ;;  %v13068_v31 = vld [vmem:[%s17434_s1 + $0x1dbc] ss:$12 sps:$4 sm:$0xff]   ;;  %v13066_v37 = vld [vmem:[%s17434_s1 + $0x1db8] ss:$12 sps:$4 sm:$0xff]  }
 0x348   :  { %8805 = vmatpush1.bf16.msra.mxu0 %v13006_v9  ;;  %11552 = vmatprep.subr.bf16.mxu1 %v13014_v38  ;;  %v13069_v9 = vld [vmem:[%s17434_s1 + $0x17c0] ss:$12 sps:$4 sm:$0xff]  }
 0x349   :  { %8806 = vmatprep.subr.bf16.mxu0 %v13013_v43  ;;  %v13070_v43 = vld [vmem:[%s17434_s1 + $0x1700] ss:$12 sps:$4 sm:$0xff]  }
 0x34a   :  { %v13073_v38 = vld [vmem:[%s17434_s1 + $0x1dd4] ss:$12 sps:$4 sm:$0xff]  }
 0x34b   :  { %11553 = vmatpush3.bf16.msra.mxu1 %v13015_v8 }
 0x34c   :  { %8807 = vmatpush1.bf16.msra.mxu0 %v13011_v19  ;;  %11554 = vmatprep.subr.bf16.mxu1 %v13019_v50  ;;  %v13074_v19 = vld [vmem:[%s17434_s1 + $0x17d8] ss:$12 sps:$4 sm:$0xff]  }
 0x34d   :  { %8808 = vmatprep.subr.bf16.mxu0 %v13018_v23 }
 0x34f   :  { %11555 = vmatpush3.bf16.msra.mxu1 %v13020_v39  ;;  %v13071_v39 = vld [vmem:[%s17434_s1 + $0x1dd0] ss:$12 sps:$4 sm:$0xff]  }
 0x350   :  { %8809 = vmatpush1.bf16.msra.mxu0 %v13016_v29  ;;  %11556 = vmatprep.subr.bf16.mxu1 %v13024_v44 }
 0x351   :  { %8810 = vmatprep.subr.bf16.mxu0 %v13023_v40  ;;  %v13075_v40 = vld [vmem:[%s17434_s1 + $0x1718] ss:$12 sps:$4 sm:$0xff]  }
 0x353   :  { %11557 = vmatpush3.bf16.msra.mxu1 %v13025_v33  ;;  %v13079_v33 = vld [vmem:[%s17434_s1 + $0x17f0] ss:$12 sps:$4 sm:$0xff]  }
 0x354   :  { %8811 = vmatpush1.bf16.msra.mxu0 %v13021_v47  ;;  %11558 = vmatprep.subr.bf16.mxu1 %v13029_v55  ;;  %v13078_v47 = vld [vmem:[%s17434_s1 + $0x1dec] ss:$12 sps:$4 sm:$0xff]   ;;  %v13076_v55 = vld [vmem:[%s17434_s1 + $0x1de8] ss:$12 sps:$4 sm:$0xff]  }
 0x355   :  { %8812 = vmatprep.subr.bf16.mxu0 %v13028_v51  ;;  %v11410_v49 = vpop.f32.mrb[32].mxu1 }
 0x356   :  { %v11411_v59 = vpop.f32.mrb[33].mxu1 }
 0x357   :  { %v11412_v62 = vadd.f32 %v11411_v59, %v11410_v49  ;;  %v11413_v0 = vpop.f32.mrb[34].mxu1  ;;  %11559 = vmatpush3.bf16.msra.mxu1 %v13030_v52  ;;  %v53_v52 = vld [vmem:[%s17435_s0 + $0x130] sm:$0xff] }
 0x358   :  { %8813 = vmatpush1.bf16.msra.mxu0 %v13026_v11  ;;  %v11414_v13 = vpop.f32.mrb[35].mxu1  ;;  %11560 = vmatprep.subr.bf16.mxu1 %v13034_v61  ;;  %v13080_v11 = vld [vmem:[%s17434_s1 + $0x1730] ss:$12 sps:$4 sm:$0xff]   ;;  %v13084_v61 = vld [vmem:[%s17434_s1 + $0x18c8] ss:$12 sps:$4 sm:$0xff]   ;;  %v16461_v49 = vpack.c.bf16 %v53_v52, %v53_v52 }
 0x359   :  { %8814 = vmatprep.subr.bf16.mxu0 %v13033_v56  ;;  %v16343_v1 = vadd.f32 %v11412_v62, %v16230_v16  ;;  %v13053_v16 = vld [vmem:[%s17434_s1 + $0x1d74] ss:$12 sps:$4 sm:$0xff]   ;;  %v13083_v56 = vld [vmem:[%s17434_s1 + $0x1e04] ss:$12 sps:$4 sm:$0xff]   ;;  %v13088_v62 = vld [vmem:[%s17434_s1 + $0x1e1c] ss:$12 sps:$4 sm:$0xff]  }
 0x35a   :  { %v13085_v59 = vld [vmem:[%s17434_s1 + $0x1808] ss:$12 sps:$4 sm:$0xff]   ;;  %v13089_v0 = vld [vmem:[%s17434_s1 + $0x18e0] ss:$12 sps:$4 sm:$0xff]   ;;  %v13140_v52 = vld [vmem:[%s17434_s1 + $0x19d0] ss:$12 sps:$4 sm:$0xff]  }
 0x35b   :  { %11561 = vmatpush3.bf16.msra.mxu1 %v13035_v58  ;;  %v13081_v58 = vld [vmem:[%s17434_s1 + $0x1e00] ss:$12 sps:$4 sm:$0xff]  }
 0x35c   :  { %8815 = vmatpush1.bf16.msra.mxu0 %v13031_v57  ;;  %11562 = vmatprep.subr.bf16.mxu1 %v13039_v14  ;;  %v56_v57 = vld [vmem:[%s17435_s0 + $0x148] sm:$0xff] }
 0x35d   :  { %8816 = vmatprep.subr.bf16.mxu0 %v13038_v22  ;;  %v16478_v13 = vpack.c.bf16 %v56_v57, %v56_v57  ;;  %v13086_v22 = vld [vmem:[%s17434_s1 + $0x1e18] ss:$12 sps:$4 sm:$0xff]   ;;  %v13090_v14 = vld [vmem:[%s17434_s1 + $0x1820] ss:$12 sps:$4 sm:$0xff]  }
 0x35e   :  { %v13141_v57 = vld [vmem:[%s17434_s1 + $0x1f20] ss:$12 sps:$4 sm:$0xff]  }
 0x35f   :  { %11563 = vmatpush3.bf16.msra.mxu1 %v13040_v53  ;;  %v13095_v53 = vld [vmem:[%s17434_s1 + $0x1838] ss:$12 sps:$4 sm:$0xff]  }
 0x360   :  { %8817 = vmatpush1.bf16.msra.mxu0 %v13036_v4  ;;  %11570 = vmatprep.subr.bf16.mxu1 %v13044_v5  ;;  %v13091_v4 = vld [vmem:[%s17434_s1 + $0x1e30] ss:$12 sps:$4 sm:$0xff]   ;;  %v13096_v5 = vld [vmem:[%s17434_s1 + $0x1e48] ss:$12 sps:$4 sm:$0xff]  }
 0x361   :  { %8818 = vmatprep.subr.bf16.mxu0 %v13043_v20  ;;  %v13098_v20 = vld [vmem:[%s17434_s1 + $0x1e4c] ss:$12 sps:$4 sm:$0xff]  }
 0x362   :  { %9641 = vmatmul.mubr.bf16.vlgmr.msra.gmra.mrb[60].mxu1 %v15388_v54  ;;  %v13051_v54 = vld [vmem:[%s17434_s1 + $0x1d70] ss:$12 sps:$4 sm:$0xff]  }
 0x363   :  { %11571 = vmatpush3.bf16.msra.mxu1 %v13045_v6  ;;  %9680 = vmatprep.mubr.bf16.mxu1 %v15405_v60  ;;  %v13056_v60 = vld [vmem:[%s17434_s1 + $0x1d88] ss:$12 sps:$4 sm:$0xff]   ;;  %v13103_v6 = vld [vmem:[%s17434_s1 + $0x1e64] ss:$12 sps:$4 sm:$0xff]  }
 0x364   :  { %8819 = vmatpush1.bf16.msra.mxu0 %v13041_v28  ;;  %11572 = vmatprep.subr.bf16.mxu1 %v13049_v35  ;;  %v13100_v28 = vld [vmem:[%s17434_s1 + $0x1850] ss:$12 sps:$4 sm:$0xff]   ;;  %v13101_v35 = vld [vmem:[%s17434_s1 + $0x1e60] ss:$12 sps:$4 sm:$0xff]  }
 0x365   :  { %8820 = vmatprep.subr.bf16.mxu0 %v13048_v12  ;;  %v13104_v12 = vld [vmem:[%s17434_s1 + $0x1928] ss:$12 sps:$4 sm:$0xff]  }
 0x367   :  { %11573 = vmatpush3.bf16.msra.mxu1 %v13050_v34  ;;  %v13108_v34 = vld [vmem:[%s17434_s1 + $0x1e7c] ss:$12 sps:$4 sm:$0xff]  }
 0x368   :  { %8821 = vmatpush1.bf16.msra.mxu0 %v13046_v10  ;;  %11574 = vmatprep.subr.bf16.mxu1 %v13054_v46  ;;  %v13105_v10 = vld [vmem:[%s17434_s1 + $0x1868] ss:$12 sps:$4 sm:$0xff]   ;;  %v13106_v46 = vld [vmem:[%s17434_s1 + $0x1e78] ss:$12 sps:$4 sm:$0xff]  }
 0x369   :  { %8822 = vmatprep.subr.bf16.mxu0 %v13053_v16  ;;  %v13109_v16 = vld [vmem:[%s17434_s1 + $0x1940] ss:$12 sps:$4 sm:$0xff]  }
 0x36b   :  { %11575 = vmatpush3.bf16.msra.mxu1 %v13055_v7  ;;  %v13113_v7 = vld [vmem:[%s17434_s1 + $0x1e94] ss:$12 sps:$4 sm:$0xff]  }
 0x36c   :  { %8823 = vmatpush1.bf16.msra.mxu0 %v13051_v54  ;;  %11576 = vmatprep.subr.bf16.mxu1 %v13059_v36  ;;  %v13110_v54 = vld [vmem:[%s17434_s1 + $0x1880] ss:$12 sps:$4 sm:$0xff]  }
 0x36d   :  { %8824 = vmatprep.subr.bf16.mxu0 %v13058_v17  ;;  %v13114_v17 = vld [vmem:[%s17434_s1 + $0x1958] ss:$12 sps:$4 sm:$0xff]  }
 0x36f   :  { %11577 = vmatpush3.bf16.msra.mxu1 %v13060_v21 }
 0x370   :  { %8825 = vmatpush1.bf16.msra.mxu0 %v13056_v60  ;;  %11578 = vmatprep.subr.bf16.mxu1 %v13064_v3  ;;  %v13111_v3 = vld [vmem:[%s17434_s1 + $0x1e90] ss:$12 sps:$4 sm:$0xff]  }
 0x371   :  { %8826 = vmatprep.subr.bf16.mxu0 %v13063_v25 }
 0x373   :  { %11579 = vmatpush3.bf16.msra.mxu1 %v13065_v48 }
 0x374   :  { %8827 = vmatpush1.bf16.msra.mxu0 %v13061_v30  ;;  %11580 = vmatprep.subr.bf16.mxu1 %v13069_v9  ;;  %v13115_v30 = vld [vmem:[%s17434_s1 + $0x1898] ss:$12 sps:$4 sm:$0xff]   ;;  %v13119_v9 = vld [vmem:[%s17434_s1 + $0x1970] ss:$12 sps:$4 sm:$0xff]  }
 0x375   :  { %8828 = vmatprep.subr.bf16.mxu0 %v13068_v31  ;;  %v11432_v8 = vpop.f32.mrb[36].mxu1  ;;  %v13118_v31 = vld [vmem:[%s17434_s1 + $0x1eac] ss:$12 sps:$4 sm:$0xff]  }
 0x376   :  { %v11433_v23 = vpop.f32.mrb[37].mxu1 }
 0x377   :  { %v11434_v50 = vadd.f32 %v11433_v23, %v11432_v8  ;;  %v11435_v29 = vpop.f32.mrb[38].mxu1  ;;  %11581 = vmatpush3.bf16.msra.mxu1 %v13070_v43  ;;  %v13116_v43 = vld [vmem:[%s17434_s1 + $0x1ea8] ss:$12 sps:$4 sm:$0xff]   ;;  %v13121_v23 = vld [vmem:[%s17434_s1 + $0x1ec0] ss:$12 sps:$4 sm:$0xff]  }
 0x378   :  { %8829 = vmatpush1.bf16.msra.mxu0 %v13066_v37  ;;  %v11436_v44 = vpop.f32.mrb[39].mxu1  ;;  %11582 = vmatprep.subr.bf16.mxu1 %v13074_v19  ;;  %v13123_v19 = vld [vmem:[%s17434_s1 + $0x1ec4] ss:$12 sps:$4 sm:$0xff]   ;;  %v13124_v8 = vld [vmem:[%s17434_s1 + $0x1a48] ss:$12 sps:$4 sm:$0xff]  }
 0x379   :  { %8830 = vmatprep.subr.bf16.mxu0 %v13073_v38  ;;  %v16444_v51 = vadd.f32 %v11434_v50, %v16343_v1  ;;  %v13093_v1 = vld [vmem:[%s17434_s1 + $0x1e34] ss:$12 sps:$4 sm:$0xff]   ;;  %v13120_v38 = vld [vmem:[%s17434_s1 + $0x18b0] ss:$12 sps:$4 sm:$0xff]  }
 0x37a   :  { %v13125_v50 = vld [vmem:[%s17434_s1 + $0x1988] ss:$12 sps:$4 sm:$0xff]   ;;  %v13130_v44 = vld [vmem:[%s17434_s1 + $0x19a0] ss:$12 sps:$4 sm:$0xff]  }
 0x37b   :  { %11583 = vmatpush3.bf16.msra.mxu1 %v13075_v40  ;;  %v13128_v29 = vld [vmem:[%s17434_s1 + $0x1edc] ss:$12 sps:$4 sm:$0xff]   ;;  %v13126_v40 = vld [vmem:[%s17434_s1 + $0x1ed8] ss:$12 sps:$4 sm:$0xff]  }
 0x37c   :  { %8831 = vmatpush1.bf16.msra.mxu0 %v13071_v39  ;;  %11584 = vmatprep.subr.bf16.mxu1 %v13079_v33  ;;  %v13129_v39 = vld [vmem:[%s17434_s1 + $0x1a60] ss:$12 sps:$4 sm:$0xff]   ;;  %v13131_v33 = vld [vmem:[%s17434_s1 + $0x1ef0] ss:$12 sps:$4 sm:$0xff]  }
 0x37d   :  { %8832 = vmatprep.subr.bf16.mxu0 %v13078_v47  ;;  %v13133_v47 = vld [vmem:[%s17434_s1 + $0x1ef4] ss:$12 sps:$4 sm:$0xff]  }
 0x37f   :  { %11585 = vmatpush3.bf16.msra.mxu1 %v13080_v11  ;;  %v13136_v11 = vld [vmem:[%s17434_s1 + $0x1f08] ss:$12 sps:$4 sm:$0xff]  }
 0x380   :  { %8833 = vmatpush1.bf16.msra.mxu0 %v13076_v55  ;;  %11592 = vmatprep.subr.bf16.mxu1 %v13084_v61  ;;  %v13138_v55 = vld [vmem:[%s17434_s1 + $0x1f0c] ss:$12 sps:$4 sm:$0xff]   ;;  %v13144_v61 = vld [vmem:[%s17434_s1 + $0x1aa8] ss:$12 sps:$4 sm:$0xff]  }
 0x381   :  { %8843 = vmatprep.subr.bf16.mxu0 %v13083_v56  ;;  %v13143_v56 = vld [vmem:[%s17434_s1 + $0x1f24] ss:$12 sps:$4 sm:$0xff]  }
 0x382   :  { %9681 = vmatmul.mubr.bf16.vlgmr.msra.gmra.mrb[64].mxu1 %v15602_v26  ;;  %v13094_v26 = vld [vmem:[%s17434_s1 + $0x18f8] ss:$12 sps:$4 sm:$0xff]  }
 0x383   :  { %8835 = vmatmul.mubr.bf16.vlgmr.msra.gmra.mrb[0].mxu0 %v16461_v49  ;;  %11593 = vmatpush3.bf16.msra.mxu1 %v13085_v59  ;;  %v13148_v59 = vld [vmem:[%s17434_s1 + $0x1f3c] ss:$12 sps:$4 sm:$0xff]  }
 0x384   :  { %8844 = vmatpush1.bf16.msra.mxu0 %v13081_v58  ;;  %11594 = vmatprep.subr.bf16.mxu1 %v13089_v0  ;;  %v13145_v58 = vld [vmem:[%s17434_s1 + $0x19e8] ss:$12 sps:$4 sm:$0xff]   ;;  %v13146_v0 = vld [vmem:[%s17434_s1 + $0x1f38] ss:$12 sps:$4 sm:$0xff]  }
 0x385   :  { %8845 = vmatprep.subr.bf16.mxu0 %v13088_v62  ;;  %9720 = vmatprep.mubr.bf16.mxu1 %v15619_v32  ;;  %v13099_v32 = vld [vmem:[%s17434_s1 + $0x1910] ss:$12 sps:$4 sm:$0xff]   ;;  %v13149_v62 = vld [vmem:[%s17434_s1 + $0x1ac0] ss:$12 sps:$4 sm:$0xff]  }
 0x386   :  { %8875 = vmatprep.mubr.bf16.mxu0 %v16478_v13 }
 0x387   :  { %11595 = vmatpush3.bf16.msra.mxu1 %v13090_v14  ;;  %v13153_v14 = vld [vmem:[%s17434_s1 + $0x1f54] ss:$12 sps:$4 sm:$0xff]  }
 0x388   :  { %8846 = vmatpush1.bf16.msra.mxu0 %v13086_v22  ;;  %11596 = vmatprep.subr.bf16.mxu1 %v13094_v26  ;;  %v13150_v22 = vld [vmem:[%s17434_s1 + $0x1a00] ss:$12 sps:$4 sm:$0xff]  }
 0x389   :  { %8847 = vmatprep.subr.bf16.mxu0 %v13093_v1  ;;  %v13154_v1 = vld [vmem:[%s17434_s1 + $0x1ad8] ss:$12 sps:$4 sm:$0xff]  }
 0x38b   :  { %11597 = vmatpush3.bf16.msra.mxu1 %v13095_v53 }
 0x38c   :  { %8848 = vmatpush1.bf16.msra.mxu0 %v13091_v4  ;;  %11598 = vmatprep.subr.bf16.mxu1 %v13099_v32  ;;  %v13151_v32 = vld [vmem:[%s17434_s1 + $0x1f50] ss:$12 sps:$4 sm:$0xff]  }
 0x38d   :  { %8849 = vmatprep.subr.bf16.mxu0 %v13098_v20 }
 0x38f   :  { %11599 = vmatpush3.bf16.msra.mxu1 %v13100_v28 }
 0x390   :  { %8850 = vmatpush1.bf16.msra.mxu0 %v13096_v5  ;;  %11600 = vmatprep.subr.bf16.mxu1 %v13104_v12  ;;  %v13155_v5 = vld [vmem:[%s17434_s1 + $0x1a18] ss:$12 sps:$4 sm:$0xff]   ;;  %v13159_v12 = vld [vmem:[%s17434_s1 + $0x1af0] ss:$12 sps:$4 sm:$0xff]  }
 0x391   :  { %8851 = vmatprep.subr.bf16.mxu0 %v13103_v6  ;;  %v13158_v6 = vld [vmem:[%s17434_s1 + $0x1f6c] ss:$12 sps:$4 sm:$0xff]  }
 0x393   :  { %11601 = vmatpush3.bf16.msra.mxu1 %v13105_v10  ;;  %v13156_v10 = vld [vmem:[%s17434_s1 + $0x1f68] ss:$12 sps:$4 sm:$0xff]  }
 0x394   :  { %8852 = vmatpush1.bf16.msra.mxu0 %v13101_v35  ;;  %11602 = vmatprep.subr.bf16.mxu1 %v13109_v16  ;;  %v55_v16 = vld [vmem:[%s17435_s0 + $0x140] sm:$0xff] }
 0x395   :  { %8853 = vmatprep.subr.bf16.mxu0 %v13108_v34  ;;  %v11454_v36 = vpop.f32.mrb[40].mxu1  ;;  %v13160_v34 = vld [vmem:[%s17434_s1 + $0x1a30] ss:$12 sps:$4 sm:$0xff]  }
 0x396   :  { %v11455_v60 = vpop.f32.mrb[41].mxu1 }
 0x397   :  { %v11456_v21 = vadd.f32 %v11455_v60, %v11454_v36  ;;  %v11457_v25 = vpop.f32.mrb[42].mxu1  ;;  %11603 = vmatpush3.bf16.msra.mxu1 %v13110_v54  ;;  %v13164_v54 = vld [vmem:[%s17434_s1 + $0x1bc8] ss:$12 sps:$4 sm:$0xff]   ;;  %v13161_v36 = vld [vmem:[%s17434_s1 + $0x1f80] ss:$12 sps:$4 sm:$0xff]  }
 0x398   :  { %8854 = vmatpush1.bf16.msra.mxu0 %v13106_v46  ;;  %v11458_v48 = vpop.f32.mrb[43].mxu1  ;;  %11604 = vmatprep.subr.bf16.mxu1 %v13114_v17  ;;  %v13163_v46 = vld [vmem:[%s17434_s1 + $0x1f84] ss:$12 sps:$4 sm:$0xff]   ;;  %v58_v17 = vld [vmem:[%s17435_s0 + $0x158] sm:$0xff]  ;;  %v13165_v60 = vld [vmem:[%s17434_s1 + $0x1b08] ss:$12 sps:$4 sm:$0xff]  }
 0x399   :  { %8855 = vmatprep.subr.bf16.mxu0 %v13113_v7  ;;  %v16557_v37 = vadd.f32 %v11456_v21, %v16444_v51  ;;  %v13135_v51 = vld [vmem:[%s17434_s1 + $0x19b8] ss:$12 sps:$4 sm:$0xff]   ;;  %v16675_v7 = vpack.c.bf16 %v55_v16, %v55_v16  ;;  %v13168_v21 = vld [vmem:[%s17434_s1 + $0x1f9c] ss:$12 sps:$4 sm:$0xff]   ;;  %v13169_v25 = vld [vmem:[%s17434_s1 + $0x1be0] ss:$12 sps:$4 sm:$0xff]  }
 0x39a   :  { %v13170_v48 = vld [vmem:[%s17434_s1 + $0x1b20] ss:$12 sps:$4 sm:$0xff]   ;;  %v13224_v16 = vld [vmem:[%s17434_s1 + $0x1da8] ss:$12 sps:$4 sm:$0xff]  }
 0x39b   :  { %11605 = vmatpush3.bf16.msra.mxu1 %v13115_v30  ;;  %v13166_v30 = vld [vmem:[%s17434_s1 + $0x1f98] ss:$12 sps:$4 sm:$0xff]  }
 0x39c   :  { %8856 = vmatpush1.bf16.msra.mxu0 %v13111_v3  ;;  %11606 = vmatprep.subr.bf16.mxu1 %v13119_v9  ;;  %v16692_v3 = vpack.c.bf16 %v58_v17, %v58_v17  ;;  %v13171_v9 = vld [vmem:[%s17434_s1 + $0x1fb0] ss:$12 sps:$4 sm:$0xff]  }
 0x39d   :  { %8857 = vmatprep.subr.bf16.mxu0 %v13118_v31  ;;  %v13173_v31 = vld [vmem:[%s17434_s1 + $0x1fb4] ss:$12 sps:$4 sm:$0xff]   ;;  %v13228_v17 = vld [vmem:[%s17434_s1 + $0x20bc] ss:$12 sps:$4 sm:$0xff]  }
 0x39f   :  { %11607 = vmatpush3.bf16.msra.mxu1 %v13120_v38  ;;  %v13176_v38 = vld [vmem:[%s17434_s1 + $0x1fc8] ss:$12 sps:$4 sm:$0xff]  }
 0x3a0   :  { %8858 = vmatpush1.bf16.msra.mxu0 %v13116_v43  ;;  %11614 = vmatprep.subr.bf16.mxu1 %v13124_v8  ;;  %v13178_v43 = vld [vmem:[%s17434_s1 + $0x1fcc] ss:$12 sps:$4 sm:$0xff]   ;;  %v13183_v8 = vld [vmem:[%s17434_s1 + $0x1fe4] ss:$12 sps:$4 sm:$0xff]  }
 0x3a1   :  { %8859 = vmatprep.subr.bf16.mxu0 %v13123_v19  ;;  %v13180_v19 = vld [vmem:[%s17434_s1 + $0x1b50] ss:$12 sps:$4 sm:$0xff]  }
 0x3a2   :  { %9721 = vmatmul.mubr.bf16.vlgmr.msra.gmra.mrb[68].mxu1 %v15822_v15  ;;  %v13134_v15 = vld [vmem:[%s17434_s1 + $0x1a78] ss:$12 sps:$4 sm:$0xff]  }
 0x3a3   :  { %11615 = vmatpush3.bf16.msra.mxu1 %v13125_v50  ;;  %9760 = vmatprep.mubr.bf16.mxu1 %v15839_v18  ;;  %v13139_v18 = vld [vmem:[%s17434_s1 + $0x1a90] ss:$12 sps:$4 sm:$0xff]   ;;  %v13181_v50 = vld [vmem:[%s17434_s1 + $0x1fe0] ss:$12 sps:$4 sm:$0xff]  }
 0x3a4   :  { %8860 = vmatpush1.bf16.msra.mxu0 %v13121_v23  ;;  %11616 = vmatprep.subr.bf16.mxu1 %v13129_v39  ;;  %v13184_v23 = vld [vmem:[%s17434_s1 + $0x1c28] ss:$12 sps:$4 sm:$0xff]  }
 0x3a5   :  { %8861 = vmatprep.subr.bf16.mxu0 %v13128_v29  ;;  %v13185_v29 = vld [vmem:[%s17434_s1 + $0x1b68] ss:$12 sps:$4 sm:$0xff]  }
 0x3a6   :  { %v13188_v39 = vld [vmem:[%s17434_s1 + $0x1ffc] ss:$12 sps:$4 sm:$0xff]  }
 0x3a7   :  { %11617 = vmatpush3.bf16.msra.mxu1 %v13130_v44  ;;  %v13186_v44 = vld [vmem:[%s17434_s1 + $0x1ff8] ss:$12 sps:$4 sm:$0xff]  }
 0x3a8   :  { %8862 = vmatpush1.bf16.msra.mxu0 %v13126_v40  ;;  %11618 = vmatprep.subr.bf16.mxu1 %v13134_v15  ;;  %v13189_v40 = vld [vmem:[%s17434_s1 + $0x1c40] ss:$12 sps:$4 sm:$0xff]  }
 0x3a9   :  { %8863 = vmatprep.subr.bf16.mxu0 %v13133_v47  ;;  %v13190_v47 = vld [vmem:[%s17434_s1 + $0x1b80] ss:$12 sps:$4 sm:$0xff]  }
 0x3aa   :  { %v13193_v15 = vld [vmem:[%s17434_s1 + $0x2014] ss:$12 sps:$4 sm:$0xff]  }
 0x3ab   :  { %11619 = vmatpush3.bf16.msra.mxu1 %v13135_v51 }
 0x3ac   :  { %8864 = vmatpush1.bf16.msra.mxu0 %v13131_v33  ;;  %11620 = vmatprep.subr.bf16.mxu1 %v13139_v18  ;;  %v13194_v33 = vld [vmem:[%s17434_s1 + $0x1c58] ss:$12 sps:$4 sm:$0xff]  }
 0x3ad   :  { %8865 = vmatprep.subr.bf16.mxu0 %v13138_v55 }
 0x3af   :  { %11621 = vmatpush3.bf16.msra.mxu1 %v13140_v52  ;;  %v13191_v52 = vld [vmem:[%s17434_s1 + $0x2010] ss:$12 sps:$4 sm:$0xff]  }
 0x3b0   :  { %8866 = vmatpush1.bf16.msra.mxu0 %v13136_v11  ;;  %11622 = vmatprep.subr.bf16.mxu1 %v13144_v61 }
 0x3b1   :  { %8867 = vmatprep.subr.bf16.mxu0 %v13143_v56  ;;  %v13195_v56 = vld [vmem:[%s17434_s1 + $0x1b98] ss:$12 sps:$4 sm:$0xff]  }
 0x3b3   :  { %11623 = vmatpush3.bf16.msra.mxu1 %v13145_v58  ;;  %v13199_v58 = vld [vmem:[%s17434_s1 + $0x1c70] ss:$12 sps:$4 sm:$0xff]  }
 0x3b4   :  { %8868 = vmatpush1.bf16.msra.mxu0 %v13141_v57  ;;  %11624 = vmatprep.subr.bf16.mxu1 %v13149_v62  ;;  %v13198_v57 = vld [vmem:[%s17434_s1 + $0x202c] ss:$12 sps:$4 sm:$0xff]   ;;  %v13196_v62 = vld [vmem:[%s17434_s1 + $0x2028] ss:$12 sps:$4 sm:$0xff]  }
 0x3b5   :  { %8869 = vmatprep.subr.bf16.mxu0 %v13148_v59  ;;  %v11476_v26 = vpop.f32.mrb[44].mxu1 }
 0x3b6   :  { %v11477_v4 = vpop.f32.mrb[45].mxu1 }
 0x3b7   :  { %v11478_v53 = vadd.f32 %v11477_v4, %v11476_v26  ;;  %v11479_v20 = vpop.f32.mrb[46].mxu1  ;;  %11625 = vmatpush3.bf16.msra.mxu1 %v13150_v22  ;;  %v13203_v22 = vld [vmem:[%s17434_s1 + $0x2044] ss:$12 sps:$4 sm:$0xff]   ;;  %v13205_v26 = vld [vmem:[%s17434_s1 + $0x1c88] ss:$12 sps:$4 sm:$0xff]  }
 0x3b8   :  { %8870 = vmatpush1.bf16.msra.mxu0 %v13146_v0  ;;  %v11480_v28 = vpop.f32.mrb[47].mxu1  ;;  %11626 = vmatprep.subr.bf16.mxu1 %v13154_v1  ;;  %v13200_v0 = vld [vmem:[%s17434_s1 + $0x1bb0] ss:$12 sps:$4 sm:$0xff]   ;;  %v13201_v1 = vld [vmem:[%s17434_s1 + $0x2040] ss:$12 sps:$4 sm:$0xff]  }
 0x3b9   :  { %8871 = vmatprep.subr.bf16.mxu0 %v13153_v14  ;;  %v16658_v35 = vadd.f32 %v11478_v53, %v16557_v37  ;;  %v13175_v37 = vld [vmem:[%s17434_s1 + $0x1b38] ss:$12 sps:$4 sm:$0xff]   ;;  %v13204_v14 = vld [vmem:[%s17434_s1 + $0x1d48] ss:$12 sps:$4 sm:$0xff]   ;;  %v13209_v53 = vld [vmem:[%s17434_s1 + $0x1d60] ss:$12 sps:$4 sm:$0xff]  }
 0x3ba   :  { %v13208_v4 = vld [vmem:[%s17434_s1 + $0x205c] ss:$12 sps:$4 sm:$0xff]   ;;  %v13206_v20 = vld [vmem:[%s17434_s1 + $0x2058] ss:$12 sps:$4 sm:$0xff]  }
 0x3bb   :  { %11627 = vmatpush3.bf16.msra.mxu1 %v13155_v5  ;;  %v13213_v5 = vld [vmem:[%s17434_s1 + $0x2074] ss:$12 sps:$4 sm:$0xff]   ;;  %v13211_v28 = vld [vmem:[%s17434_s1 + $0x2070] ss:$12 sps:$4 sm:$0xff]  }
 0x3bc   :  { %8872 = vmatpush1.bf16.msra.mxu0 %v13151_v32  ;;  %11628 = vmatprep.subr.bf16.mxu1 %v13159_v12  ;;  %v13210_v32 = vld [vmem:[%s17434_s1 + $0x1ca0] ss:$12 sps:$4 sm:$0xff]  }
 0x3bd   :  { %8873 = vmatprep.subr.bf16.mxu0 %v13158_v6  ;;  %v13215_v6 = vld [vmem:[%s17434_s1 + $0x1cb8] ss:$12 sps:$4 sm:$0xff]  }
 0x3be   :  { %v13218_v12 = vld [vmem:[%s17434_s1 + $0x208c] ss:$12 sps:$4 sm:$0xff]  }
 0x3bf   :  { %11629 = vmatpush3.bf16.msra.mxu1 %v13160_v34  ;;  %v13223_v34 = vld [vmem:[%s17434_s1 + $0x20a4] ss:$12 sps:$4 sm:$0xff]  }
 0x3c0   :  { %8874 = vmatpush1.bf16.msra.mxu0 %v13156_v10  ;;  %11636 = vmatprep.subr.bf16.mxu1 %v13164_v54  ;;  %v13220_v10 = vld [vmem:[%s17434_s1 + $0x1cd0] ss:$12 sps:$4 sm:$0xff]   ;;  %v13225_v54 = vld [vmem:[%s17434_s1 + $0x1ce8] ss:$12 sps:$4 sm:$0xff]  }
 0x3c1   :  { %8884 = vmatprep.subr.bf16.mxu0 %v13163_v46  ;;  %v13221_v46 = vld [vmem:[%s17434_s1 + $0x20a0] ss:$12 sps:$4 sm:$0xff]  }
 0x3c2   :  { %9761 = vmatmul.mubr.bf16.vlgmr.msra.gmra.mrb[72].mxu1 %v16036_v41  ;;  %v13174_v41 = vld [vmem:[%s17434_s1 + $0x1bf8] ss:$12 sps:$4 sm:$0xff]  }
 0x3c3   :  { %8876 = vmatmul.mubr.bf16.vlgmr.msra.gmra.mrb[0].mxu0 %v16675_v7  ;;  %11637 = vmatpush3.bf16.msra.mxu1 %v13165_v60  ;;  %v13226_v60 = vld [vmem:[%s17434_s1 + $0x20b8] ss:$12 sps:$4 sm:$0xff]  }
 0x3c4   :  { %8885 = vmatpush1.bf16.msra.mxu0 %v13161_v36  ;;  %11638 = vmatprep.subr.bf16.mxu1 %v13169_v25  ;;  %v13229_v36 = vld [vmem:[%s17434_s1 + $0x1dc0] ss:$12 sps:$4 sm:$0xff]  }
 0x3c5   :  { %8886 = vmatprep.subr.bf16.mxu0 %v13168_v21  ;;  %9800 = vmatprep.mubr.bf16.mxu1 %v16053_v63  ;;  %v13179_v63 = vld [vmem:[%s17434_s1 + $0x1c10] ss:$12 sps:$4 sm:$0xff]   ;;  %v13230_v21 = vld [vmem:[%s17434_s1 + $0x1d00] ss:$12 sps:$4 sm:$0xff]  }
 0x3c6   :  { %8916 = vmatprep.mubr.bf16.mxu0 %v16692_v3  ;;  %v13233_v25 = vld [vmem:[%s17434_s1 + $0x20d4] ss:$12 sps:$4 sm:$0xff]  }
 0x3c7   :  { %11639 = vmatpush3.bf16.msra.mxu1 %v13170_v48 }
 0x3c8   :  { %8887 = vmatpush1.bf16.msra.mxu0 %v13166_v30  ;;  %11640 = vmatprep.subr.bf16.mxu1 %v13174_v41  ;;  %v13234_v30 = vld [vmem:[%s17434_s1 + $0x1dd8] ss:$12 sps:$4 sm:$0xff]  }
 0x3c9   :  { %8888 = vmatprep.subr.bf16.mxu0 %v13173_v31 }
 0x3cb   :  { %11641 = vmatpush3.bf16.msra.mxu1 %v13175_v37  ;;  %v13231_v37 = vld [vmem:[%s17434_s1 + $0x20d0] ss:$12 sps:$4 sm:$0xff]  }
 0x3cc   :  { %8889 = vmatpush1.bf16.msra.mxu0 %v13171_v9  ;;  %11642 = vmatprep.subr.bf16.mxu1 %v13179_v63 }
 0x3cd   :  { %8890 = vmatprep.subr.bf16.mxu0 %v13178_v43  ;;  %v13235_v43 = vld [vmem:[%s17434_s1 + $0x1d18] ss:$12 sps:$4 sm:$0xff]  }
 0x3cf   :  { %11643 = vmatpush3.bf16.msra.mxu1 %v13180_v19  ;;  %v13239_v19 = vld [vmem:[%s17434_s1 + $0x1df0] ss:$12 sps:$4 sm:$0xff]  }
 0x3d0   :  { %8891 = vmatpush1.bf16.msra.mxu0 %v13176_v38  ;;  %11644 = vmatprep.subr.bf16.mxu1 %v13184_v23  ;;  %v13238_v38 = vld [vmem:[%s17434_s1 + $0x20ec] ss:$12 sps:$4 sm:$0xff]   ;;  %v13236_v23 = vld [vmem:[%s17434_s1 + $0x20e8] ss:$12 sps:$4 sm:$0xff]  }
 0x3d1   :  { %8892 = vmatprep.subr.bf16.mxu0 %v13183_v8 }
 0x3d3   :  { %11645 = vmatpush3.bf16.msra.mxu1 %v13185_v29  ;;  %v57_v29 = vld [vmem:[%s17435_s0 + $0x150] sm:$0xff] }
 0x3d4   :  { %8893 = vmatpush1.bf16.msra.mxu0 %v13181_v50  ;;  %11646 = vmatprep.subr.bf16.mxu1 %v13189_v40  ;;  %v13240_v50 = vld [vmem:[%s17434_s1 + $0x1d30] ss:$12 sps:$4 sm:$0xff]   ;;  %v13244_v40 = vld [vmem:[%s17434_s1 + $0x1ec8] ss:$12 sps:$4 sm:$0xff]  }
 0x3d5   :  { %8894 = vmatprep.subr.bf16.mxu0 %v13188_v39  ;;  %v11498_v51 = vpop.f32.mrb[48].mxu1  ;;  %v13243_v39 = vld [vmem:[%s17434_s1 + $0x2104] ss:$12 sps:$4 sm:$0xff]  }
 0x3d6   :  { %v11499_v55 = vpop.f32.mrb[49].mxu1 }
 0x3d7   :  { %v11500_v18 = vadd.f32 %v11499_v55, %v11498_v51  ;;  %v11501_v11 = vpop.f32.mrb[50].mxu1  ;;  %11647 = vmatpush3.bf16.msra.mxu1 %v13190_v47  ;;  %v60_v47 = vld [vmem:[%s17435_s0 + $0x168] sm:$0xff] }
 0x3d8   :  { %8895 = vmatpush1.bf16.msra.mxu0 %v13186_v44  ;;  %v11502_v61 = vpop.f32.mrb[51].mxu1  ;;  %11648 = vmatprep.subr.bf16.mxu1 %v13194_v33  ;;  %v16889_v44 = vpack.c.bf16 %v57_v29, %v57_v29  ;;  %v13245_v33 = vld [vmem:[%s17434_s1 + $0x1e08] ss:$12 sps:$4 sm:$0xff]   ;;  %v13249_v55 = vld [vmem:[%s17434_s1 + $0x1ee0] ss:$12 sps:$4 sm:$0xff]  }
 0x3d9   :  { %8896 = vmatprep.subr.bf16.mxu0 %v13193_v15  ;;  %v16771_v59 = vadd.f32 %v11500_v18, %v16658_v35  ;;  %v13216_v35 = vld [vmem:[%s17434_s1 + $0x2088] ss:$12 sps:$4 sm:$0xff]   ;;  %v13241_v15 = vld [vmem:[%s17434_s1 + $0x2100] ss:$12 sps:$4 sm:$0xff]   ;;  %v16906_v18 = vpack.c.bf16 %v60_v47, %v60_v47  ;;  %v13246_v11 = vld [vmem:[%s17434_s1 + $0x2118] ss:$12 sps:$4 sm:$0xff]  }
 0x3da   :  { %v13248_v51 = vld [vmem:[%s17434_s1 + $0x211c] ss:$12 sps:$4 sm:$0xff]   ;;  %v13306_v47 = vld [vmem:[%s17434_s1 + $0x2238] ss:$12 sps:$4 sm:$0xff]  }
 0x3db   :  { %11649 = vmatpush3.bf16.msra.mxu1 %v13195_v56  ;;  %v13253_v56 = vld [vmem:[%s17434_s1 + $0x2134] ss:$12 sps:$4 sm:$0xff]   ;;  %v13251_v61 = vld [vmem:[%s17434_s1 + $0x2130] ss:$12 sps:$4 sm:$0xff]  }
 0x3dc   :  { %8897 = vmatpush1.bf16.msra.mxu0 %v13191_v52  ;;  %11650 = vmatprep.subr.bf16.mxu1 %v13199_v58  ;;  %v13250_v52 = vld [vmem:[%s17434_s1 + $0x1e20] ss:$12 sps:$4 sm:$0xff]   ;;  %v13305_v29 = vld [vmem:[%s17434_s1 + $0x1fe8] ss:$12 sps:$4 sm:$0xff]  }
 0x3dd   :  { %8898 = vmatprep.subr.bf16.mxu0 %v13198_v57  ;;  %v13255_v57 = vld [vmem:[%s17434_s1 + $0x1e38] ss:$12 sps:$4 sm:$0xff]  }
 0x3de   :  { %v13258_v58 = vld [vmem:[%s17434_s1 + $0x214c] ss:$12 sps:$4 sm:$0xff]  }
 0x3df   :  { %11651 = vmatpush3.bf16.msra.mxu1 %v13200_v0  ;;  %v13263_v0 = vld [vmem:[%s17434_s1 + $0x2164] ss:$12 sps:$4 sm:$0xff]  }
 0x3e0   :  { %8899 = vmatpush1.bf16.msra.mxu0 %v13196_v62  ;;  %11658 = vmatprep.subr.bf16.mxu1 %v13204_v14  ;;  %v13260_v62 = vld [vmem:[%s17434_s1 + $0x1e50] ss:$12 sps:$4 sm:$0xff]   ;;  %v13261_v14 = vld [vmem:[%s17434_s1 + $0x2160] ss:$12 sps:$4 sm:$0xff]  }
 0x3e1   :  { %8900 = vmatprep.subr.bf16.mxu0 %v13203_v22  ;;  %v13264_v22 = vld [vmem:[%s17434_s1 + $0x1f28] ss:$12 sps:$4 sm:$0xff]  }
 0x3e2   :  { %9801 = vmatmul.mubr.bf16.vlgmr.msra.gmra.mrb[76].mxu1 %v16250_v27  ;;  %v13214_v27 = vld [vmem:[%s17434_s1 + $0x1d78] ss:$12 sps:$4 sm:$0xff]  }
 0x3e3   :  { %11659 = vmatpush3.bf16.msra.mxu1 %v13205_v26  ;;  %9840 = vmatprep.mubr.bf16.mxu1 %v16267_v2  ;;  %v13219_v2 = vld [vmem:[%s17434_s1 + $0x1d90] ss:$12 sps:$4 sm:$0xff]  }
 0x3e4   :  { %8901 = vmatpush1.bf16.msra.mxu0 %v13201_v1  ;;  %11660 = vmatprep.subr.bf16.mxu1 %v13209_v53  ;;  %v13265_v1 = vld [vmem:[%s17434_s1 + $0x1e68] ss:$12 sps:$4 sm:$0xff]   ;;  %v13266_v53 = vld [vmem:[%s17434_s1 + $0x2178] ss:$12 sps:$4 sm:$0xff]  }
 0x3e5   :  { %8902 = vmatprep.subr.bf16.mxu0 %v13208_v4  ;;  %v13268_v26 = vld [vmem:[%s17434_s1 + $0x217c] ss:$12 sps:$4 sm:$0xff]   ;;  %v13269_v4 = vld [vmem:[%s17434_s1 + $0x1f40] ss:$12 sps:$4 sm:$0xff]  }
 0x3e7   :  { %11661 = vmatpush3.bf16.msra.mxu1 %v13210_v32  ;;  %v13273_v32 = vld [vmem:[%s17434_s1 + $0x2194] ss:$12 sps:$4 sm:$0xff]  }
 0x3e8   :  { %8903 = vmatpush1.bf16.msra.mxu0 %v13206_v20  ;;  %11662 = vmatprep.subr.bf16.mxu1 %v13214_v27  ;;  %v13270_v20 = vld [vmem:[%s17434_s1 + $0x1e80] ss:$12 sps:$4 sm:$0xff]  }
 0x3e9   :  { %8904 = vmatprep.subr.bf16.mxu0 %v13213_v5  ;;  %v13274_v5 = vld [vmem:[%s17434_s1 + $0x1f58] ss:$12 sps:$4 sm:$0xff]  }
 0x3eb   :  { %11663 = vmatpush3.bf16.msra.mxu1 %v13215_v6 }
 0x3ec   :  { %8905 = vmatpush1.bf16.msra.mxu0 %v13211_v28  ;;  %11664 = vmatprep.subr.bf16.mxu1 %v13219_v2  ;;  %v13271_v2 = vld [vmem:[%s17434_s1 + $0x2190] ss:$12 sps:$4 sm:$0xff]  }
 0x3ed   :  { %8906 = vmatprep.subr.bf16.mxu0 %v13218_v12 }
 0x3ef   :  { %11665 = vmatpush3.bf16.msra.mxu1 %v13220_v10 }
 0x3f0   :  { %8907 = vmatpush1.bf16.msra.mxu0 %v13216_v35  ;;  %11666 = vmatprep.subr.bf16.mxu1 %v13224_v16  ;;  %v13275_v35 = vld [vmem:[%s17434_s1 + $0x1e98] ss:$12 sps:$4 sm:$0xff]   ;;  %v13279_v16 = vld [vmem:[%s17434_s1 + $0x1f70] ss:$12 sps:$4 sm:$0xff]  }
 0x3f1   :  { %8908 = vmatprep.subr.bf16.mxu0 %v13223_v34  ;;  %v13278_v34 = vld [vmem:[%s17434_s1 + $0x21ac] ss:$12 sps:$4 sm:$0xff]  }
 0x3f3   :  { %11667 = vmatpush3.bf16.msra.mxu1 %v13225_v54  ;;  %v13276_v54 = vld [vmem:[%s17434_s1 + $0x21a8] ss:$12 sps:$4 sm:$0xff]  }
 0x3f4   :  { %8909 = vmatpush1.bf16.msra.mxu0 %v13221_v46  ;;  %11668 = vmatprep.subr.bf16.mxu1 %v13229_v36  ;;  %v13283_v36 = vld [vmem:[%s17434_s1 + $0x21c4] ss:$12 sps:$4 sm:$0xff]  }
 0x3f5   :  { %8910 = vmatprep.subr.bf16.mxu0 %v13228_v17  ;;  %v11520_v48 = vpop.f32.mrb[52].mxu1  ;;  %v13280_v17 = vld [vmem:[%s17434_s1 + $0x1eb0] ss:$12 sps:$4 sm:$0xff]  }
 0x3f6   :  { %v11521_v31 = vpop.f32.mrb[53].mxu1 }
 0x3f7   :  { %v11522_v41 = vadd.f32 %v11521_v31, %v11520_v48  ;;  %v11523_v9 = vpop.f32.mrb[54].mxu1  ;;  %11669 = vmatpush3.bf16.msra.mxu1 %v13230_v21  ;;  %v13281_v21 = vld [vmem:[%s17434_s1 + $0x21c0] ss:$12 sps:$4 sm:$0xff]   ;;  %v13286_v31 = vld [vmem:[%s17434_s1 + $0x21d8] ss:$12 sps:$4 sm:$0xff]  }
 0x3f8   :  { %8911 = vmatpush1.bf16.msra.mxu0 %v13226_v60  ;;  %v11524_v63 = vpop.f32.mrb[55].mxu1  ;;  %11670 = vmatprep.subr.bf16.mxu1 %v13234_v30  ;;  %v13284_v60 = vld [vmem:[%s17434_s1 + $0x2048] ss:$12 sps:$4 sm:$0xff]   ;;  %v13289_v48 = vld [vmem:[%s17434_s1 + $0x2060] ss:$12 sps:$4 sm:$0xff]  }
 0x3f9   :  { %8912 = vmatprep.subr.bf16.mxu0 %v13233_v25  ;;  %v16872_v8 = vadd.f32 %v11522_v41, %v16771_v59  ;;  %v13256_v59 = vld [vmem:[%s17434_s1 + $0x2148] ss:$12 sps:$4 sm:$0xff]   ;;  %v13290_v41 = vld [vmem:[%s17434_s1 + $0x1fa0] ss:$12 sps:$4 sm:$0xff]  }
 0x3fa   :  { %v13285_v25 = vld [vmem:[%s17434_s1 + $0x1f88] ss:$12 sps:$4 sm:$0xff]   ;;  %v13298_v63 = vld [vmem:[%s17434_s1 + $0x220c] ss:$12 sps:$4 sm:$0xff]  }
 0x3fb   :  { %11671 = vmatpush3.bf16.msra.mxu1 %v13235_v43  ;;  %v13288_v30 = vld [vmem:[%s17434_s1 + $0x21dc] ss:$12 sps:$4 sm:$0xff]   ;;  %v13293_v9 = vld [vmem:[%s17434_s1 + $0x21f4] ss:$12 sps:$4 sm:$0xff]   ;;  %v13295_v43 = vld [vmem:[%s17434_s1 + $0x1fb8] ss:$12 sps:$4 sm:$0xff]  }
 0x3fc   :  { %8913 = vmatpush1.bf16.msra.mxu0 %v13231_v37  ;;  %11672 = vmatprep.subr.bf16.mxu1 %v13239_v19  ;;  %v13291_v37 = vld [vmem:[%s17434_s1 + $0x21f0] ss:$12 sps:$4 sm:$0xff]  }
 0x3fd   :  { %8914 = vmatprep.subr.bf16.mxu0 %v13238_v38  ;;  %v13296_v38 = vld [vmem:[%s17434_s1 + $0x2208] ss:$12 sps:$4 sm:$0xff]   ;;  %v13300_v19 = vld [vmem:[%s17434_s1 + $0x1fd0] ss:$12 sps:$4 sm:$0xff]  }
 0x3ff   :  { %11673 = vmatpush3.bf16.msra.mxu1 %v13240_v50  ;;  %v13301_v50 = vld [vmem:[%s17434_s1 + $0x2220] ss:$12 sps:$4 sm:$0xff]  }
 0x400   :  { %8915 = vmatpush1.bf16.msra.mxu0 %v13236_v23  ;;  %11680 = vmatprep.subr.bf16.mxu1 %v13244_v40  ;;  %v13304_v23 = vld [vmem:[%s17434_s1 + $0x20a8] ss:$12 sps:$4 sm:$0xff]   ;;  %v13309_v40 = vld [vmem:[%s17434_s1 + $0x20c0] ss:$12 sps:$4 sm:$0xff]  }
 0x401   :  { %8925 = vmatprep.subr.bf16.mxu0 %v13243_v39  ;;  %v13308_v39 = vld [vmem:[%s17434_s1 + $0x223c] ss:$12 sps:$4 sm:$0xff]  }
 0x402   :  { %9841 = vmatmul.mubr.bf16.vlgmr.msra.gmra.mrb[80].mxu1 %v16461_v49  ;;  %v13254_v49 = vld [vmem:[%s17434_s1 + $0x1ef8] ss:$12 sps:$4 sm:$0xff]  }
 0x403   :  { %8917 = vmatmul.mubr.bf16.vlgmr.msra.gmra.mrb[0].mxu0 %v16889_v44  ;;  %11681 = vmatpush3.bf16.msra.mxu1 %v13245_v33  ;;  %v13313_v33 = vld [vmem:[%s17434_s1 + $0x2254] ss:$12 sps:$4 sm:$0xff]  }
 0x404   :  { %8926 = vmatpush1.bf16.msra.mxu0 %v13241_v15  ;;  %11682 = vmatprep.subr.bf16.mxu1 %v13249_v55  ;;  %v13310_v15 = vld [vmem:[%s17434_s1 + $0x2000] ss:$12 sps:$4 sm:$0xff]  }
 0x405   :  { %8927 = vmatprep.subr.bf16.mxu0 %v13248_v51  ;;  %9880 = vmatprep.mubr.bf16.mxu1 %v16478_v13  ;;  %v13259_v13 = vld [vmem:[%s17434_s1 + $0x1f10] ss:$12 sps:$4 sm:$0xff]   ;;  %v13314_v51 = vld [vmem:[%s17434_s1 + $0x20d8] ss:$12 sps:$4 sm:$0xff]  }
 0x406   :  { %8957 = vmatprep.mubr.bf16.mxu0 %v16906_v18 }
 0x407   :  { %11683 = vmatpush3.bf16.msra.mxu1 %v13250_v52 }
 0x408   :  { %8928 = vmatpush1.bf16.msra.mxu0 %v13246_v11  ;;  %11684 = vmatprep.subr.bf16.mxu1 %v13254_v49  ;;  %v13311_v49 = vld [vmem:[%s17434_s1 + $0x2250] ss:$12 sps:$4 sm:$0xff]  }
 0x409   :  { %8929 = vmatprep.subr.bf16.mxu0 %v13253_v56 }
 0x40b   :  { %11685 = vmatpush3.bf16.msra.mxu1 %v13255_v57 }
 0x40c   :  { %8930 = vmatpush1.bf16.msra.mxu0 %v13251_v61  ;;  %11686 = vmatprep.subr.bf16.mxu1 %v13259_v13  ;;  %v13315_v61 = vld [vmem:[%s17434_s1 + $0x2018] ss:$12 sps:$4 sm:$0xff]   ;;  %v13319_v13 = vld [vmem:[%s17434_s1 + $0x20f0] ss:$12 sps:$4 sm:$0xff]  }
 0x40d   :  { %8931 = vmatprep.subr.bf16.mxu0 %v13258_v58  ;;  %v13318_v58 = vld [vmem:[%s17434_s1 + $0x226c] ss:$12 sps:$4 sm:$0xff]  }
 0x40f   :  { %11687 = vmatpush3.bf16.msra.mxu1 %v13260_v62  ;;  %v13316_v62 = vld [vmem:[%s17434_s1 + $0x2268] ss:$12 sps:$4 sm:$0xff]  }
 0x410   :  { %8932 = vmatpush1.bf16.msra.mxu0 %v13256_v59  ;;  %11688 = vmatprep.subr.bf16.mxu1 %v13264_v22  ;;  %v59_v22 = vld [vmem:[%s17435_s0 + $0x160] sm:$0xff] }
 0x411   :  { %8933 = vmatprep.subr.bf16.mxu0 %v13263_v0  ;;  %v13320_v0 = vld [vmem:[%s17434_s1 + $0x2030] ss:$12 sps:$4 sm:$0xff]  }
 0x413   :  { %11689 = vmatpush3.bf16.msra.mxu1 %v13265_v1  ;;  %v13324_v1 = vld [vmem:[%s17434_s1 + $0x21c8] ss:$12 sps:$4 sm:$0xff]  }
 0x414   :  { %8934 = vmatpush1.bf16.msra.mxu0 %v13261_v14  ;;  %11690 = vmatprep.subr.bf16.mxu1 %v13269_v4  ;;  %v13323_v14 = vld [vmem:[%s17434_s1 + $0x2284] ss:$12 sps:$4 sm:$0xff]   ;;  %v62_v4 = vld [vmem:[%s17435_s0 + $0x178] sm:$0xff] }
 0x415   :  { %8935 = vmatprep.subr.bf16.mxu0 %v13268_v26  ;;  %v11542_v27 = vpop.f32.mrb[56].mxu1  ;;  %v17103_v26 = vpack.c.bf16 %v59_v22, %v59_v22  ;;  %v13385_v22 = vld [vmem:[%s17434_s1 + $0x22e8] ss:$12 sps:$4 sm:$0xff]  }
 0x416   :  { %v11543_v28 = vpop.f32.mrb[57].mxu1 }
 0x417   :  { %v11544_v6 = vadd.f32 %v11543_v28, %v11542_v27  ;;  %v11545_v12 = vpop.f32.mrb[58].mxu1  ;;  %11691 = vmatpush3.bf16.msra.mxu1 %v13270_v20  ;;  %v13325_v20 = vld [vmem:[%s17434_s1 + $0x2108] ss:$12 sps:$4 sm:$0xff]   ;;  %v17120_v27 = vpack.c.bf16 %v62_v4, %v62_v4  ;;  %v13326_v28 = vld [vmem:[%s17434_s1 + $0x2298] ss:$12 sps:$4 sm:$0xff]  }
 0x418   :  { %8936 = vmatpush1.bf16.msra.mxu0 %v13266_v53  ;;  %v11546_v10 = vpop.f32.mrb[59].mxu1  ;;  %11692 = vmatprep.subr.bf16.mxu1 %v13274_v5  ;;  %v13321_v53 = vld [vmem:[%s17434_s1 + $0x2280] ss:$12 sps:$4 sm:$0xff]  }
 0x419   :  { %8937 = vmatprep.subr.bf16.mxu0 %v13273_v32  ;;  %v16985_v46 = vadd.f32 %v11544_v6, %v16872_v8  ;;  %v13303_v8 = vld [vmem:[%s17434_s1 + $0x2224] ss:$12 sps:$4 sm:$0xff]   ;;  %v13328_v32 = vld [vmem:[%s17434_s1 + $0x229c] ss:$12 sps:$4 sm:$0xff]   ;;  %v13329_v5 = vld [vmem:[%s17434_s1 + $0x21e0] ss:$12 sps:$4 sm:$0xff]  }
 0x41a   :  { %v13330_v6 = vld [vmem:[%s17434_s1 + $0x2120] ss:$12 sps:$4 sm:$0xff]  }
 0x41b   :  { %11693 = vmatpush3.bf16.msra.mxu1 %v13275_v35  ;;  %v13333_v12 = vld [vmem:[%s17434_s1 + $0x22b4] ss:$12 sps:$4 sm:$0xff]   ;;  %v13335_v35 = vld [vmem:[%s17434_s1 + $0x2138] ss:$12 sps:$4 sm:$0xff]  }
 0x41c   :  { %8938 = vmatpush1.bf16.msra.mxu0 %v13271_v2  ;;  %11694 = vmatprep.subr.bf16.mxu1 %v13279_v16  ;;  %v13331_v2 = vld [vmem:[%s17434_s1 + $0x22b0] ss:$12 sps:$4 sm:$0xff]   ;;  %v13338_v10 = vld [vmem:[%s17434_s1 + $0x22cc] ss:$12 sps:$4 sm:$0xff]  }
 0x41d   :  { %8939 = vmatprep.subr.bf16.mxu0 %v13278_v34  ;;  %v13336_v34 = vld [vmem:[%s17434_s1 + $0x22c8] ss:$12 sps:$4 sm:$0xff]   ;;  %v13340_v16 = vld [vmem:[%s17434_s1 + $0x2150] ss:$12 sps:$4 sm:$0xff]   ;;  %v13390_v4 = vld [vmem:[%s17434_s1 + $0x2300] ss:$12 sps:$4 sm:$0xff]  }
 0x41f   :  { %11695 = vmatpush3.bf16.msra.mxu1 %v13280_v17  ;;  %v13341_v17 = vld [vmem:[%s17434_s1 + $0x22e0] ss:$12 sps:$4 sm:$0xff]  }
 0x420   :  { %8940 = vmatpush1.bf16.msra.mxu0 %v13276_v54  ;;  %11702 = vmatprep.subr.bf16.mxu1 %v13284_v60  ;;  %v13344_v54 = vld [vmem:[%s17434_s1 + $0x2228] ss:$12 sps:$4 sm:$0xff]  }
 0x421   :  { %8941 = vmatprep.subr.bf16.mxu0 %v13283_v36  ;;  %v13345_v36 = vld [vmem:[%s17434_s1 + $0x2168] ss:$12 sps:$4 sm:$0xff]  }
 0x422   :  { %9881 = vmatmul.mubr.bf16.vlgmr.msra.gmra.mrb[84].mxu1 %v16675_v7  ;;  %v13294_v7 = vld [vmem:[%s17434_s1 + $0x2078] ss:$12 sps:$4 sm:$0xff]   ;;  %v13348_v60 = vld [vmem:[%s17434_s1 + $0x22fc] ss:$12 sps:$4 sm:$0xff]  }
 0x423   :  { %11703 = vmatpush3.bf16.msra.mxu1 %v13285_v25  ;;  %9920 = vmatprep.mubr.bf16.mxu1 %v16692_v3  ;;  %v13299_v3 = vld [vmem:[%s17434_s1 + $0x2090] ss:$12 sps:$4 sm:$0xff]   ;;  %v13346_v25 = vld [vmem:[%s17434_s1 + $0x22f8] ss:$12 sps:$4 sm:$0xff]  }
 0x424   :  { %8942 = vmatpush1.bf16.msra.mxu0 %v13281_v21  ;;  %11704 = vmatprep.subr.bf16.mxu1 %v13289_v48  ;;  %v13349_v21 = vld [vmem:[%s17434_s1 + $0x2240] ss:$12 sps:$4 sm:$0xff]  }
 0x425   :  { %8943 = vmatprep.subr.bf16.mxu0 %v13288_v30  ;;  %v13350_v30 = vld [vmem:[%s17434_s1 + $0x2180] ss:$12 sps:$4 sm:$0xff]  }
 0x426   :  { %v13353_v48 = vld [vmem:[%s17434_s1 + $0x2314] ss:$12 sps:$4 sm:$0xff]  }
 0x427   :  { %11705 = vmatpush3.bf16.msra.mxu1 %v13290_v41 }
 0x428   :  { %8944 = vmatpush1.bf16.msra.mxu0 %v13286_v31  ;;  %11706 = vmatprep.subr.bf16.mxu1 %v13294_v7  ;;  %v13354_v31 = vld [vmem:[%s17434_s1 + $0x2258] ss:$12 sps:$4 sm:$0xff]  }
 0x429   :  { %8945 = vmatprep.subr.bf16.mxu0 %v13293_v9 }
 0x42b   :  { %11707 = vmatpush3.bf16.msra.mxu1 %v13295_v43  ;;  %v13351_v43 = vld [vmem:[%s17434_s1 + $0x2310] ss:$12 sps:$4 sm:$0xff]  }
 0x42c   :  { %8946 = vmatpush1.bf16.msra.mxu0 %v13291_v37  ;;  %11708 = vmatprep.subr.bf16.mxu1 %v13299_v3 }
 0x42d   :  { %8947 = vmatprep.subr.bf16.mxu0 %v13298_v63  ;;  %v13355_v63 = vld [vmem:[%s17434_s1 + $0x2198] ss:$12 sps:$4 sm:$0xff]  }
 0x42f   :  { %11709 = vmatpush3.bf16.msra.mxu1 %v13300_v19  ;;  %v13359_v19 = vld [vmem:[%s17434_s1 + $0x2270] ss:$12 sps:$4 sm:$0xff]  }
 0x430   :  { %8948 = vmatpush1.bf16.msra.mxu0 %v13296_v38  ;;  %11710 = vmatprep.subr.bf16.mxu1 %v13304_v23  ;;  %v13358_v38 = vld [vmem:[%s17434_s1 + $0x232c] ss:$12 sps:$4 sm:$0xff]   ;;  %v13356_v23 = vld [vmem:[%s17434_s1 + $0x2328] ss:$12 sps:$4 sm:$0xff]  }
 0x431   :  { %8949 = vmatprep.subr.bf16.mxu0 %v13303_v8 }
 0x433   :  { %11711 = vmatpush3.bf16.msra.mxu1 %v13305_v29  ;;  %v13363_v29 = vld [vmem:[%s17434_s1 + $0x2344] ss:$12 sps:$4 sm:$0xff]  }
 0x434   :  { %8950 = vmatpush1.bf16.msra.mxu0 %v13301_v50  ;;  %11712 = vmatprep.subr.bf16.mxu1 %v13309_v40  ;;  %v13360_v50 = vld [vmem:[%s17434_s1 + $0x21b0] ss:$12 sps:$4 sm:$0xff]   ;;  %v13361_v40 = vld [vmem:[%s17434_s1 + $0x2340] ss:$12 sps:$4 sm:$0xff]  }
 0x435   :  { %8951 = vmatprep.subr.bf16.mxu0 %v13308_v39  ;;  %v11564_v55 = vpop.f32.mrb[60].mxu1  ;;  %v13364_v39 = vld [vmem:[%s17434_s1 + $0x2348] ss:$12 sps:$4 sm:$0xff]  }
 0x436   :  { %v11565_v11 = vpop.f32.mrb[61].mxu1 }
 0x437   :  { %v11566_v52 = vadd.f32 %v11565_v11, %v11564_v55  ;;  %v11567_v56 = vpop.f32.mrb[62].mxu1  ;;  %11713 = vmatpush3.bf16.msra.mxu1 %v13310_v15  ;;  %v13368_v15 = vld [vmem:[%s17434_s1 + $0x235c] ss:$12 sps:$4 sm:$0xff]   ;;  %v13370_v55 = vld [vmem:[%s17434_s1 + $0x22a0] ss:$12 sps:$4 sm:$0xff]  }
 0x438   :  { %8952 = vmatpush1.bf16.msra.mxu0 %v13306_v47  ;;  %v11568_v57 = vpop.f32.mrb[63].mxu1  ;;  %11714 = vmatprep.subr.bf16.mxu1 %v13314_v51  ;;  %v13365_v47 = vld [vmem:[%s17434_s1 + $0x2288] ss:$12 sps:$4 sm:$0xff]   ;;  %v13366_v51 = vld [vmem:[%s17434_s1 + $0x2358] ss:$12 sps:$4 sm:$0xff]  }
 0x439   :  { %8953 = vmatprep.subr.bf16.mxu0 %v13313_v33  ;;  %v17086_v59 = vadd.f32 %v11566_v52, %v16985_v46  ;;  %v13343_v46 = vld [vmem:[%s17434_s1 + $0x22e4] ss:$12 sps:$4 sm:$0xff]   ;;  %v13369_v33 = vld [vmem:[%s17434_s1 + $0x2360] ss:$12 sps:$4 sm:$0xff]  }
 0x43a   :  { %v13373_v11 = vld [vmem:[%s17434_s1 + $0x2374] ss:$12 sps:$4 sm:$0xff]   ;;  %v13374_v52 = vld [vmem:[%s17434_s1 + $0x2378] ss:$12 sps:$4 sm:$0xff]   ;;  %v13371_v56 = vld [vmem:[%s17434_s1 + $0x2370] ss:$12 sps:$4 sm:$0xff]  }
 0x43b   :  { %11715 = vmatpush3.bf16.msra.mxu1 %v13315_v61  ;;  %v13378_v61 = vld [vmem:[%s17434_s1 + $0x238c] ss:$12 sps:$4 sm:$0xff]   ;;  %v13379_v57 = vld [vmem:[%s17434_s1 + $0x2390] ss:$12 sps:$4 sm:$0xff]  }
 0x43c   :  { %8954 = vmatpush1.bf16.msra.mxu0 %v13311_v49  ;;  %11716 = vmatprep.subr.bf16.mxu1 %v13319_v13  ;;  %v13375_v49 = vld [vmem:[%s17434_s1 + $0x22b8] ss:$12 sps:$4 sm:$0xff]   ;;  %v13380_v13 = vld [vmem:[%s17434_s1 + $0x22d0] ss:$12 sps:$4 sm:$0xff]  }
 0x43d   :  { %8955 = vmatprep.subr.bf16.mxu0 %v13318_v58  ;;  %v13376_v58 = vld [vmem:[%s17434_s1 + $0x2388] ss:$12 sps:$4 sm:$0xff]  }
 0x43f   :  { %11717 = vmatpush3.bf16.msra.mxu1 %v13320_v0  ;;  %v13381_v0 = vld [vmem:[%s17434_s1 + $0x23a0] ss:$12 sps:$4 sm:$0xff]  }
 0x440   :  { %8956 = vmatpush1.bf16.msra.mxu0 %v13316_v62  ;;  %11724 = vmatprep.subr.bf16.mxu1 %v13324_v1  ;;  %v13384_v62 = vld [vmem:[%s17434_s1 + $0x23a8] ss:$12 sps:$4 sm:$0xff]   ;;  %v13389_v1 = vld [vmem:[%s17434_s1 + $0x23c0] ss:$12 sps:$4 sm:$0xff]  }
 0x441   :  { %8966 = vmatprep.subr.bf16.mxu0 %v13323_v14  ;;  %v13388_v14 = vld [vmem:[%s17434_s1 + $0x23bc] ss:$12 sps:$4 sm:$0xff]  }
 0x442   :  { %9921 = vmatmul.mubr.bf16.vlgmr.msra.gmra.mrb[88].mxu1 %v16889_v44  ;;  %v13334_v44 = vld [vmem:[%s17434_s1 + $0x21f8] ss:$12 sps:$4 sm:$0xff]  }
 0x443   :  { %8958 = vmatmul.mubr.bf16.vlgmr.msra.gmra.mrb[0].mxu0 %v17103_v26  ;;  %11725 = vmatpush3.bf16.msra.mxu1 %v13325_v20  ;;  %v13394_v20 = vld [vmem:[%s17434_s1 + $0x23d8] ss:$12 sps:$4 sm:$0xff]  }
 0x444   :  { %8967 = vmatpush1.bf16.msra.mxu0 %v13321_v53  ;;  %11726 = vmatprep.subr.bf16.mxu1 %v13329_v5  ;;  %v13393_v53 = vld [vmem:[%s17434_s1 + $0x23d4] ss:$12 sps:$4 sm:$0xff]  }
 0x445   :  { %8968 = vmatprep.subr.bf16.mxu0 %v13328_v32  ;;  %9960 = vmatprep.mubr.bf16.mxu1 %v16906_v18  ;;  %v13339_v18 = vld [vmem:[%s17434_s1 + $0x2210] ss:$12 sps:$4 sm:$0xff]  }
 0x446   :  { %8998 = vmatprep.mubr.bf16.mxu0 %v17120_v27 }
 0x447   :  { %11727 = vmatpush3.bf16.msra.mxu1 %v13330_v6  ;;  %v13391_v6 = vld [vmem:[%s17434_s1 + $0x23d0] ss:$12 sps:$4 sm:$0xff]  }
 0x448   :  { %8969 = vmatpush1.bf16.msra.mxu0 %v13326_v28  ;;  %11728 = vmatprep.subr.bf16.mxu1 %v13334_v44 }
 0x449   :  { %8970 = vmatprep.subr.bf16.mxu0 %v13333_v12  ;;  %v13395_v12 = vld [vmem:[%s17434_s1 + $0x2318] ss:$12 sps:$4 sm:$0xff]  }
 0x44b   :  { %11729 = vmatpush3.bf16.msra.mxu1 %v13335_v35  ;;  %v13399_v35 = vld [vmem:[%s17434_s1 + $0x23f0] ss:$12 sps:$4 sm:$0xff]  }
 0x44c   :  { %8971 = vmatpush1.bf16.msra.mxu0 %v13331_v2  ;;  %11730 = vmatprep.subr.bf16.mxu1 %v13339_v18  ;;  %v13398_v2 = vld [vmem:[%s17434_s1 + $0x23ec] ss:$12 sps:$4 sm:$0xff]   ;;  %v13396_v18 = vld [vmem:[%s17434_s1 + $0x23e8] ss:$12 sps:$4 sm:$0xff]  }
 0x44d   :  { %8972 = vmatprep.subr.bf16.mxu0 %v13338_v10 }
 0x44f   :  { %11731 = vmatpush3.bf16.msra.mxu1 %v13340_v16  ;;  %v61_v16 = vld [vmem:[%s17435_s0 + $0x170] sm:$0xff] }
 0x450   :  { %8973 = vmatpush1.bf16.msra.mxu0 %v13336_v34  ;;  %11732 = vmatprep.subr.bf16.mxu1 %v13344_v54  ;;  %v13400_v34 = vld [vmem:[%s17434_s1 + $0x2330] ss:$12 sps:$4 sm:$0xff]   ;;  %v111_v54 = vpack.c.bf16 %v61_v16, %v61_v16 }
 0x451   :  { %8974 = vmatprep.subr.bf16.mxu0 %v13343_v46  ;;  %v13403_v46 = vld [vmem:[%s17434_s1 + $0x2404] ss:$12 sps:$4 sm:$0xff]  }
 0x453   :  { %11733 = vmatpush3.bf16.msra.mxu1 %v13345_v36  ;;  %v13401_v36 = vld [vmem:[%s17434_s1 + $0x2400] ss:$12 sps:$4 sm:$0xff]  }
 0x454   :  { %8975 = vmatpush1.bf16.msra.mxu0 %v13341_v17  ;;  %11734 = vmatprep.subr.bf16.mxu1 %v13349_v21  ;;  %v64_v17 = vld [vmem:[%s17435_s0 + $0x188] sm:$0xff]  ;;  %v13442_v21 = vmov 0  }
 0x455   :  { %8976 = vmatprep.subr.bf16.mxu0 %v13348_v60  ;;  %v11586_v41 = vpop.f32.mrb[64].mxu1  ;;  %v13404_v60 = vld [vmem:[%s17434_s1 + $0x2408] ss:$12 sps:$4 sm:$0xff]  }
 0x456   :  { %v11587_v9 = vpop.f32.mrb[65].mxu1 }
 0x457   :  { %v11588_v7 = vadd.f32 %v11587_v9, %v11586_v41  ;;  %v11589_v37 = vpop.f32.mrb[66].mxu1  ;;  %11735 = vmatpush3.bf16.msra.mxu1 %v13350_v30  ;;  %v114_v30 = vpack.c.bf16 %v64_v17, %v64_v17  ;;  %v13411_v41 = vld [vmem:[%s17434_s1 + $0x2434] ss:$12 sps:$4 sm:$0xff]   ;;  %v13409_v9 = vld [vmem:[%s17434_s1 + $0x2430] ss:$12 sps:$4 sm:$0xff]  }
 0x458   :  { %8977 = vmatpush1.bf16.msra.mxu0 %v13346_v25  ;;  %v11590_v3 = vpop.f32.mrb[67].mxu1  ;;  %11736 = vmatprep.subr.bf16.mxu1 %v13354_v31  ;;  %v13407_v25 = vld [vmem:[%s17434_s1 + $0x241c] ss:$12 sps:$4 sm:$0xff]   ;;  %v13408_v31 = vld [vmem:[%s17434_s1 + $0x2420] ss:$12 sps:$4 sm:$0xff]  }
 0x459   :  { %8978 = vmatprep.subr.bf16.mxu0 %v13353_v48  ;;  %v17199_v8 = vadd.f32 %v11588_v7, %v17086_v59  ;;  %v13383_v59 = vld [vmem:[%s17434_s1 + $0x23a4] ss:$12 sps:$4 sm:$0xff]   ;;  %v13415_v37 = vld [vmem:[%s17434_s1 + $0x244c] ss:$12 sps:$4 sm:$0xff]  }
 0x45a   :  { %v13405_v48 = vld [vmem:[%s17434_s1 + $0x2418] ss:$12 sps:$4 sm:$0xff]  }
 0x45b   :  { %11737 = vmatpush3.bf16.msra.mxu1 %v13355_v63  ;;  %v13412_v7 = vld [vmem:[%s17434_s1 + $0x2438] ss:$12 sps:$4 sm:$0xff]   ;;  %v13416_v63 = vld [vmem:[%s17434_s1 + $0x2450] ss:$12 sps:$4 sm:$0xff]  }
 0x45c   :  { %8979 = vmatpush1.bf16.msra.mxu0 %v13351_v43  ;;  %11738 = vmatprep.subr.bf16.mxu1 %v13359_v19  ;;  %v13413_v43 = vld [vmem:[%s17434_s1 + $0x2448] ss:$12 sps:$4 sm:$0xff]   ;;  %v13419_v3 = vld [vmem:[%s17434_s1 + $0x2464] ss:$12 sps:$4 sm:$0xff]  }
 0x45d   :  { %8980 = vmatprep.subr.bf16.mxu0 %v13358_v38  ;;  %v13417_v38 = vld [vmem:[%s17434_s1 + $0x2460] ss:$12 sps:$4 sm:$0xff]   ;;  %v13420_v19 = vld [vmem:[%s17434_s1 + $0x2468] ss:$12 sps:$4 sm:$0xff]  }
 0x45f   :  { %11739 = vmatpush3.bf16.msra.mxu1 %v13360_v50  ;;  %v13424_v50 = vld [vmem:[%s17434_s1 + $0x2480] ss:$12 sps:$4 sm:$0xff]  }
 0x460   :  { %8981 = vmatpush1.bf16.msra.mxu0 %v13356_v23  ;;  %11746 = vmatprep.subr.bf16.mxu1 %v13364_v39  ;;  %v13421_v23 = vld [vmem:[%s17434_s1 + $0x2478] ss:$12 sps:$4 sm:$0xff]  }
 0x461   :  { %8982 = vmatprep.subr.bf16.mxu0 %v13363_v29  ;;  %v13427_v29 = vld [vmem:[%s17434_s1 + $0x2494] ss:$12 sps:$4 sm:$0xff]  }
 0x462   :  { %9961 = vmatmul.mubr.bf16.vlgmr.msra.gmra.mrb[92].mxu1 %v17103_v26  ;;  %v13386_v26 = vld [vmem:[%s17434_s1 + $0x23b8] ss:$12 sps:$4 sm:$0xff]  }
 0x463   :  { %11747 = vmatpush3.bf16.msra.mxu1 %v13365_v47  ;;  %10000 = vmatprep.mubr.bf16.mxu1 %v17120_v27 }
 0x464   :  { %8983 = vmatpush1.bf16.msra.mxu0 %v13361_v40  ;;  %11748 = vmatprep.subr.bf16.mxu1 %v13369_v33  ;;  %v13425_v33 = vld [vmem:[%s17434_s1 + $0x2490] ss:$12 sps:$4 sm:$0xff]  }
 0x465   :  { %8984 = vmatprep.subr.bf16.mxu0 %v13368_v15 }
 0x467   :  { %11749 = vmatpush3.bf16.msra.mxu1 %v13370_v55 }
 0x468   :  { %8985 = vmatpush1.bf16.msra.mxu0 %v13366_v51  ;;  %11750 = vmatprep.subr.bf16.mxu1 %v13374_v52  ;;  %v13428_v51 = vld [vmem:[%s17434_s1 + $0x2498] ss:$12 sps:$4 sm:$0xff]  }
 0x469   :  { %8986 = vmatprep.subr.bf16.mxu0 %v13373_v11  ;;  %v13431_v11 = vld [vmem:[%s17434_s1 + $0x24ac] ss:$12 sps:$4 sm:$0xff]  }
 0x46b   :  { %11751 = vmatpush3.bf16.msra.mxu1 %v13375_v49  ;;  %v13432_v49 = vld [vmem:[%s17434_s1 + $0x24b0] ss:$12 sps:$4 sm:$0xff]  }
 0x46c   :  { %8987 = vmatpush1.bf16.msra.mxu0 %v13371_v56  ;;  %11752 = vmatprep.subr.bf16.mxu1 %v13379_v57  ;;  %v13429_v56 = vld [vmem:[%s17434_s1 + $0x24a8] ss:$12 sps:$4 sm:$0xff]   ;;  %v13433_v57 = vld [vmem:[%s17434_s1 + $0x24c0] ss:$12 sps:$4 sm:$0xff]  }
 0x46d   :  { %8988 = vmatprep.subr.bf16.mxu0 %v13378_v61  ;;  %v13435_v61 = vld [vmem:[%s17434_s1 + $0x24c4] ss:$12 sps:$4 sm:$0xff]  }
 0x46f   :  { %11753 = vmatpush3.bf16.msra.mxu1 %v13380_v13  ;;  %v13437_v13 = vld [vmem:[%s17434_s1 + $0x24dc] ss:$12 sps:$4 sm:$0x3f]  }
 0x470   :  { %8989 = vmatpush1.bf16.msra.mxu0 %v13376_v58  ;;  %11754 = vmatprep.subr.bf16.mxu1 %v13384_v62  ;;  %v13436_v58 = vld [vmem:[%s17434_s1 + $0x24c8] ss:$12 sps:$4 sm:$0xff]   ;;  %v13440_v62 = vld [vmem:[%s17434_s1 + $0x24e0] ss:$12 sps:$4 sm:$0x3f]  }
 0x471   :  { %8990 = vmatprep.subr.bf16.mxu0 %v13383_v59  ;;  %v13439_v59 = vld [vmem:[%s17434_s1 + $0x24d8] ss:$12 sps:$4 sm:$0x3f]  }
 0x473   :  { %11755 = vmatpush3.bf16.msra.mxu1 %v13385_v22  ;;  %v8015_v22 = vsel %vm8013_vm1, %v13439_v59, 0 }
 0x474   :  { %8991 = vmatpush1.bf16.msra.mxu0 %v13381_v0  ;;  %11756 = vmatprep.subr.bf16.mxu1 %v13389_v1  ;;  %v63_v0 = vld [vmem:[%s17435_s0 + $0x180] sm:$0xff] }
 0x475   :  { %8992 = vmatprep.subr.bf16.mxu0 %v13388_v14  ;;  %v11608_v32 = vpop.f32.mrb[68].mxu1  ;;  %v8021_v14 = vsel %vm8013_vm1, %v13440_v62, 0  ;;  %v113_v1 = vpack.c.bf16 %v63_v0, %v63_v0 }
 0x476   :  { %v11609_v5 = vpop.f32.mrb[69].mxu1 }
 0x477   :  { %v11610_v27 = vadd.f32 %v11609_v5, %v11608_v32  ;;  %v11611_v28 = vpop.f32.mrb[70].mxu1  ;;  %11757 = vmatpush3.bf16.msra.mxu1 %v13390_v4 }
 0x478   :  { %8993 = vmatpush1.bf16.msra.mxu0 %v13386_v26  ;;  %v11612_v44 = vpop.f32.mrb[71].mxu1  ;;  %11758 = vmatprep.subr.bf16.mxu1 %v13394_v20 }
 0x479   :  { %8994 = vmatprep.subr.bf16.mxu0 %v13393_v53  ;;  %v17300_v10 = vadd.f32 %v11610_v27, %v17199_v8  ;;  %v13423_v8 = vld [vmem:[%s17434_s1 + $0x247c] ss:$12 sps:$4 sm:$0xff]  }
 0x47b   :  { %11759 = vmatpush3.bf16.msra.mxu1 %v13395_v12 }
 0x47c   :  { %8995 = vmatpush1.bf16.msra.mxu0 %v13391_v6  ;;  %11760 = vmatprep.subr.bf16.mxu1 %v13399_v35 }
 0x47d   :  { %8996 = vmatprep.subr.bf16.mxu0 %v13398_v2 }
 0x47f   :  { %11761 = vmatpush3.bf16.msra.mxu1 %v13400_v34 }
 0x480   :  { %8997 = vmatpush1.bf16.msra.mxu0 %v13396_v18  ;;  %10008 = vmatprep.subr.bf16.mxu1 %v13442_v21 }
 0x481   :  { %9007 = vmatprep.subr.bf16.mxu0 %v13403_v46 }
 0x482   :  { %10001 = vmatmul.mubr.bf16.vlgmr.msra.gmra.mrb[96].mxu1 %v111_v54 }
 0x483   :  { %8999 = vmatmul.mubr.bf16.vlgmr.msra.gmra.mrb[0].mxu0 %v111_v54  ;;  %10009 = vmatpush1.bf16.msra.mxu1 %v13404_v60 }
 0x484   :  { %9008 = vmatpush1.bf16.msra.mxu0 %v13401_v36  ;;  %10010 = vmatprep.subr.bf16.mxu1 %v13442_v21 }
 0x485   :  { %9009 = vmatprep.subr.bf16.mxu0 %v13407_v25  ;;  %11238 = vmatprep.mubr.msk.bf16.mxu0 %vm8009_vm0, %v114_v30 }
 0x486   :  { %11239 = vmatprep.mubr.msk.bf16.mxu1 %vm8009_vm0, %v114_v30 }
 0x487   :  { %10011 = vmatpush1.bf16.msra.mxu1 %v13408_v31 }
 0x488   :  { %9010 = vmatpush1.bf16.msra.mxu0 %v13405_v48  ;;  %10012 = vmatprep.subr.bf16.mxu1 %v13442_v21 }
 0x489   :  { %9011 = vmatprep.subr.bf16.mxu0 %v13411_v41 }
 0x48b   :  { %10013 = vmatpush1.bf16.msra.mxu1 %v13412_v7 }
 0x48c   :  { %9012 = vmatpush1.bf16.msra.mxu0 %v13409_v9  ;;  %10014 = vmatprep.subr.bf16.mxu1 %v13442_v21 }
 0x48d   :  { %9013 = vmatprep.subr.bf16.mxu0 %v13415_v37 }
 0x48f   :  { %10015 = vmatpush1.bf16.msra.mxu1 %v13416_v63 }
 0x490   :  { %9014 = vmatpush1.bf16.msra.mxu0 %v13413_v43  ;;  %10016 = vmatprep.subr.bf16.mxu1 %v13442_v21 }
 0x491   :  { %9015 = vmatprep.subr.bf16.mxu0 %v13419_v3 }
 0x493   :  { %10017 = vmatpush1.bf16.msra.mxu1 %v13420_v19 }
 0x494   :  { %9016 = vmatpush1.bf16.msra.mxu0 %v13417_v38  ;;  %10018 = vmatprep.subr.bf16.mxu1 %v13442_v21 }
 0x495   :  { %9017 = vmatprep.subr.bf16.mxu0 %v13423_v8  ;;  %v11630_v39 = vpop.f32.mrb[72].mxu1  ;;  %v1695_v8 = vsub.s32 0, %v15655_v42 }
 0x496   :  { %v11631_v40 = vpop.f32.mrb[73].mxu1 }
 0x497   :  { %v11632_v47 = vadd.f32 %v11631_v40, %v11630_v39  ;;  %v11633_v15 = vpop.f32.mrb[74].mxu1  ;;  %10019 = vmatpush1.bf16.msra.mxu1 %v13424_v50  ;;  %v13441_v50 = vld [vmem:[%s17436_s2] sm:$0x7] }
 0x498   :  { %9018 = vmatpush1.bf16.msra.mxu0 %v13421_v23  ;;  %v11634_v55 = vpop.f32.mrb[75].mxu1  ;;  %10020 = vmatprep.subr.bf16.mxu1 %v13442_v21  ;;  %v1699_v23 = vsub.s32 1, %v15655_v42 }
 0x499   :  { %9019 = vmatprep.subr.bf16.mxu0 %v13427_v29  ;;  %v9763_v52 = vadd.f32 %v11632_v47, %v17300_v10  ;;  %v1696_v29 = vrot.slane %v13441_v50, %v1695_v8 }
 0x49a   :  { %v1700_v39 = vrot.slane %v13441_v50, %v1699_v23 }
 0x49b   :  { %10021 = vmatpush1.bf16.msra.mxu1 %v13428_v51  ;;  %v11768_v40 = vadd.f32 %v15468_v45, %v1696_v29 }
 0x49c   :  { %9020 = vmatpush1.bf16.msra.mxu0 %v13425_v33  ;;  %10022 = vmatprep.subr.bf16.mxu1 %v13442_v21  ;;  %v11770_v47 = vadd.f32 %v15476_v24, %v1700_v39 }
 0x49d   :  { %9021 = vmatprep.subr.bf16.mxu0 %v13431_v11 }
 0x49f   :  { %10023 = vmatpush1.bf16.msra.mxu1 %v13432_v49 }
 0x4a0   :  { %9022 = vmatpush1.bf16.msra.mxu0 %v13429_v56  ;;  %10024 = vmatprep.subr.bf16.mxu1 %v13442_v21 }
 0x4a1   :  { %9023 = vmatprep.subr.bf16.mxu0 %v13435_v61 }
 0x4a3   :  { %10025 = vmatpush1.bf16.msra.mxu1 %v13436_v58 }
 0x4a4   :  { %9024 = vmatpush1.bf16.msra.mxu0 %v13433_v57  ;;  %10026 = vmatprep.subr.bf16.mxu1 %v13442_v21 }
 0x4a5   :  { %11237 = vmatprep.subr.msk.bf16.mxu0 %vm8013_vm1, %v13437_v13 }
 0x4a7   :  { %10027 = vmatpush1.bf16.msra.mxu1 %v8021_v14 }
 0x4a8   :  { %9026 = vmatpush1.bf16.msra.mxu0 %v8015_v22 }
 0x4aa   :  { %10041 = vmatmul.mubr.bf16.vlgmr.msra.gmra.mrb[100].mxu1 %v113_v1 }
 0x4ab   :  { %9040 = vmatmul.mubr.bf16.vlgmr.msra.gmra.mrb[0].mxu0 %v113_v1 }
 0x4b5   :  { %v11652_v26 = vpop.f32.mrb[76].mxu1 }
 0x4b6   :  { %v11653_v4 = vpop.f32.mrb[77].mxu1 }
 0x4b7   :  { %v11654_v53 = vadd.f32 %v11653_v4, %v11652_v26  ;;  %v11655_v20 = vpop.f32.mrb[78].mxu1 }
 0x4b8   :  { %v11656_v32 = vpop.f32.mrb[79].mxu1 }
 0x4b9   :  { %v9803_v5 = vadd.f32 %v11654_v53, %v9763_v52 }
 0x4d5   :  { %v11674_v27 = vpop.f32.mrb[80].mxu1 }
 0x4d6   :  { %v11675_v28 = vpop.f32.mrb[81].mxu1 }
 0x4d7   :  { %v11676_v6 = vadd.f32 %v11675_v28, %v11674_v27  ;;  %v11677_v12 = vpop.f32.mrb[82].mxu1 }
 0x4d8   :  { %v11678_v44 = vpop.f32.mrb[83].mxu1 }
 0x4d9   :  { %v9843_v2 = vadd.f32 %v11676_v6, %v9803_v5 }
 0x4f5   :  { %v11696_v35 = vpop.f32.mrb[84].mxu1 }
 0x4f6   :  { %v11697_v10 = vpop.f32.mrb[85].mxu1 }
 0x4f7   :  { %v11698_v18 = vadd.f32 %v11697_v10, %v11696_v35  ;;  %v11699_v34 = vpop.f32.mrb[86].mxu1 }
 0x4f8   :  { %v11700_v16 = vpop.f32.mrb[87].mxu1 }
 0x4f9   :  { %v9883_v46 = vadd.f32 %v11698_v18, %v9843_v2 }
 0x515   :  { %v11718_v54 = vpop.f32.mrb[88].mxu1 }
 0x516   :  { %v11719_v17 = vpop.f32.mrb[89].mxu1 }
 0x517   :  { %v11720_v36 = vadd.f32 %v11719_v17, %v11718_v54  ;;  %v11721_v60 = vpop.f32.mrb[90].mxu1 }
 0x518   :  { %v11722_v21 = vpop.f32.mrb[91].mxu1 }
 0x519   :  { %v9923_v25 = vadd.f32 %v11720_v36, %v9883_v46 }
 0x535   :  { %v11740_v30 = vpop.f32.mrb[92].mxu1 }
 0x536   :  { %v11741_v48 = vpop.f32.mrb[93].mxu1 }
 0x537   :  { %v11742_v31 = vadd.f32 %v11741_v48, %v11740_v30  ;;  %v11743_v41 = vpop.f32.mrb[94].mxu1 }
 0x538   :  { %v11744_v9 = vpop.f32.mrb[95].mxu1 }
 0x539   :  { %v9963_v7 = vadd.f32 %v11742_v31, %v9923_v25 }
 0x555   :  { %v11762_v37 = vpop.f32.mrb[96].mxu1 }
 0x556   :  { %v11763_v43 = vpop.f32.mrb[97].mxu1 }
 0x557   :  { %v11764_v63 = vadd.f32 %v11763_v43, %v11762_v37  ;;  %v11765_v3 = vpop.f32.mrb[98].mxu1 }
 0x558   :  { %v11766_v38 = vpop.f32.mrb[99].mxu1 }
 0x559   :  { %v10003_v19 = vadd.f32 %v11764_v63, %v9963_v7 }
 0x57d   :  { %v10042_v33 = vpop.f32.mrb[100].mxu1 }
 0x57e   :  { %v9041_v15 = vpop.f32.mrb[0].mxu0  ;;  %v10043_v55 = vadd.f32 %v10042_v33, %v10003_v19  ;;  %v10044_v52 = vpop.f32.mrb[101].mxu1 }
 0x57f   :  { %v11769_v51 = vadd.f32 %v11768_v40, %v9041_v15  ;;  %v9043_v11 = vpop.f32.mrb[1].mxu0  ;;  %v10045_v61 = vpop.f32.mrb[102].mxu1 }
 0x580   :  { %v11771_v56 = vadd.f32 %v11770_v47, %v9043_v11  ;;  %v9045_v49 = vpop.f32.mrb[2].mxu0  ;;  %10050 = vst [vmem:[%s17437_s3 + $0x10] sm:$0xff] %v10043_v55  ;;  %v10046_v42 = vpop.f32.mrb[103].mxu1 }
 0x581   :  { %10048 = vst [vmem:[%s17437_s3] sm:$0xff] %v11769_v51  ;;  %v9046_v45 = vpop.f32.mrb[3].mxu0 }
 0x582   :  { %10049 = vst [vmem:[%s17437_s3 + $0x8] sm:$0xff] %v11771_v56 }

</bundles_post_ra>
